<compile_context>
chip_gen: v7x
topology: tpu7x:2x2x1
jax: 0.10.0
libtpu: 0.0.40
codegen_flags: <defaults>
</compile_context>

<pallas_src>
import functools
import math

import jax
import jax.numpy as jnp
from jax import lax
from jax.experimental import pallas as pl
from jax.experimental.pallas import tpu as pltpu

_EPS = 1e-5
_INV_SQRT2 = 1.0 / math.sqrt(2.0)
_LANE = 128
_KS = 3     # main-branch convs in ResidualConvBlock are always 3x3, padding=1
_PAD = 1


def _round_up(v, m):
    return (v + m - 1) // m * m


def _exact_gelu(x):
    # PyTorch nn.GELU default (approximate='none'): 0.5*x*(1+erf(x/sqrt(2)))
    return 0.5 * x * (1.0 + lax.erf(x * _INV_SQRT2))


# ---------------------------------------------------------------------------
# Fused whole-block kernel (runs once per batch image)
# ---------------------------------------------------------------------------
def _block_kernel(*refs, cfg):
    n_layers = cfg["n_layers"]
    has_sc = cfg["has_sc"]
    cin_p = cfg["cin_p"]
    cout_p = cfg["cout_p"]
    ho, wo = cfg["ho"], cfg["wo"]
    tr = cfg["tr"]
    m = tr * wo

    x_ref = refs[0]
    w_refs = [refs[1 + 2 * i] for i in range(n_layers)]
    s_refs = [refs[2 + 2 * i] for i in range(n_layers)]
    pos = 1 + 2 * n_layers
    if has_sc:
        wsc_ref, ssc_ref = refs[pos], refs[pos + 1]
        pos += 2
    out_ref = refs[pos]
    p_refs = list(refs[pos + 1:pos + 1 + n_layers])

    # Zero the padded scratch activations: halo rows/cols and lane padding must
    # be exact zeros (uninitialised VMEM may hold NaN even under a zero weight).
    for p in p_refs:
        p[...] = jnp.zeros_like(p)

    # ---- fill the layer-0 scratch: padded, W-lane-merged, row-phase-split ----
    l0 = cfg["layers"][0]
    s0 = l0["stride"]
    q0 = l0["colpad"] // s0
    h_in, wm_in = x_ref.shape[0], x_ref.shape[1]
    if s0 == 1:
        p_refs[0][0, pl.ds(_PAD, h_in), pl.ds(q0, wm_in), :] = x_ref[...]
    else:
        for rph in range(s0):                                  # static row phase
            k_lo = max(0, -((rph - _PAD) // s0))               # ceil((pad-rph)/s0)
            k_hi = (h_in - 1 + _PAD - rph) // s0

            def _fill(k, carry, rph=rph):
                p_refs[0][rph, k, pl.ds(q0, wm_in), :] = x_ref[k * s0 + rph - _PAD]
                return carry

            lax.fori_loop(k_lo, k_hi + 1, _fill, 0)

    # ---- layers ---------------------------------------------------------------
    for li in range(n_layers):
        lc = cfg["layers"][li]
        s, n_g = lc["stride"], lc["n_g"]
        p_in = p_refs[li]
        kdim = p_in.shape[-1]                                  # merged K = s * C_in_p
        w_ref = w_refs[li]
        is_last = li == n_layers - 1

        for i0 in cfg["chunk_starts"]:                         # static row chunks
            acc = jnp.zeros((m, cout_p), jnp.float32)
            for kh in range(_KS):
                rph = kh % s
                r0 = i0 + kh // s
                for g in range(n_g):
                    patch = p_in[rph, pl.ds(r0, tr), pl.ds(g, wo), :]
                    acc = acc + jnp.dot(patch.reshape(m, kdim),
                                        w_ref[kh * n_g + g],
                                        preferred_element_type=jnp.float32)
            y = _exact_gelu(acc + s_refs[li][...])             # folded BN shift + GELU

            if not is_last:
                # Write straight into the next layer's padded scratch interior.
                p_refs[li + 1][0, pl.ds(i0 + _PAD, tr), pl.ds(_PAD, wo), :] = (
                    y.reshape(tr, wo, cout_p).astype(p_refs[li + 1].dtype))
            else:
                # Fused residual: the stride-sampled input already sits in the
                # layer-0 scratch -> no HBM gather, no extra pallas_call.
                sc = p_refs[0][_PAD % s0,
                               pl.ds(i0 + _PAD // s0, tr),
                               pl.ds(l0["colpad"] // s0, wo),
                               pl.ds(0, cin_p)].reshape(m, cin_p)
                if has_sc:                                     # Conv1x1(stride)+BN
                    y = (y + jnp.dot(sc, wsc_ref[...],
                                     preferred_element_type=jnp.float32)
                         + ssc_ref[...])
                else:                                          # nn.Identity
                    y = y + sc.astype(jnp.float32)
                out_ref[pl.ds(i0, tr), :, :] = (
                    y.reshape(tr, wo, cout_p).astype(out_ref.dtype))


# ---------------------------------------------------------------------------
# BN folding + weight packing for the lane-merged layout
# ---------------------------------------------------------------------------
def _fold_bn(c):
    scale = c["gamma"] / jnp.sqrt(c["var"] + _EPS)
    shift = c["beta"] + (c["b"] - c["mean"]) * scale
    return scale, shift


def _assemble_main_weight(c, s, cin_real, cin_p, cout_p):
    """Fold BN scale into a 3x3 conv weight and pack it per (kh, merged-kw
    group): (KS*n_g, s*cin_p, cout_p) bf16, plus a (1, cout_p) f32 shift."""
    scale, shift = _fold_bn(c)
    wf = c["w"] * scale[:, None, None, None]                   # (Cout, Cin, 3, 3)
    cout_real = wf.shape[0]
    colpad = _round_up(_PAD, s)
    n_g = (_KS - 1 - _PAD + colpad) // s + 1
    blk = jnp.zeros((_KS, n_g, s * cin_p, cout_p), jnp.float32)
    for kh in range(_KS):
        for g in range(n_g):
            for hh in range(s):
                kw = s * g + hh - (colpad - _PAD)
                if 0 <= kw < _KS:
                    blk = blk.at[kh, g, hh * cin_p:hh * cin_p + cin_real,
                                 :cout_real].set(wf[:, :, kh, kw].T)
    shift_p = jnp.zeros((1, cout_p), jnp.float32).at[0, :cout_real].set(shift)
    return blk.reshape(_KS * n_g, s * cin_p, cout_p).astype(jnp.bfloat16), shift_p


def _assemble_shortcut_weight(c, cin_real, cin_p, cout_p):
    scale, shift = _fold_bn(c)
    wf = c["w"][:, :, 0, 0] * scale[:, None]                   # (Cout, Cin)
    cout_real = wf.shape[0]
    w_p = jnp.zeros((cin_p, cout_p), jnp.float32).at[:cin_real, :cout_real].set(wf.T)
    shift_p = jnp.zeros((1, cout_p), jnp.float32).at[0, :cout_real].set(shift)
    return w_p.astype(jnp.bfloat16), shift_p


# ---------------------------------------------------------------------------
# ResidualConvBlock forward (Pallas)
# ---------------------------------------------------------------------------
@functools.partial(jax.jit, static_argnums=(2,))
def residual_conv_block_forward(x_nchw, params, stride):
    convs = params["block"]
    sc = params.get("shortcut")
    n_layers = len(convs)
    n, cin, h, w = x_nchw.shape
    cout = convs[0]["w"].shape[0]
    cin_p = _round_up(cin, _LANE)
    cout_p = _round_up(cout, _LANE)
    if sc is None:
        assert cin == cout and stride == 1, (
            "nn.Identity shortcut requires in_channels == out_channels and stride == 1")

    # ---- XLA-side prep (raw input only; everything else stays in VMEM) ------
    x = jnp.transpose(x_nchw, (0, 2, 3, 1))                    # NHWC
    if cin_p != cin:
        x = jnp.pad(x, ((0, 0), (0, 0), (0, 0), (0, cin_p - cin)))
    w_pad = _round_up(w, stride)
    if w_pad != w:                                             # rare: W % stride != 0
        x = jnp.pad(x, ((0, 0), (0, 0), (0, w_pad - w), (0, 0)))
    x = x.astype(jnp.bfloat16)
    wm = w_pad // stride
    x_view = x.reshape(n, h, wm, stride * cin_p)               # free (bitcast) view

    # ---- geometry -------------------------------------------------------------
    ho = (h + 2 * _PAD - _KS) // stride + 1
    wo = (w + 2 * _PAD - _KS) // stride + 1
    colpad0 = _round_up(_PAD, stride)
    n_g0 = (_KS - 1 - _PAD + colpad0) // stride + 1
    r0_rows = max(ho + (_KS - 1) // stride, (h - 1 + _PAD) // stride + 1)
    wq0 = max(wo + n_g0 - 1, colpad0 // stride + wm)
    layers = [dict(stride=stride, n_g=n_g0, colpad=colpad0)]
    for _ in range(1, n_layers):
        layers.append(dict(stride=1, n_g=_KS, colpad=_PAD))

    # Output-row chunk: keep the f32 accumulator (~tr*wo x cout_p) near the
    # vreg file (v5e feedback); ragged tails handled by overlapped chunks.
    tr = max(1, min(ho, max(1, 256 // max(wo, 1))))
    n_chunks = -(-ho // tr)
    chunk_starts = tuple(dict.fromkeys(min(c * tr, ho - tr) for c in range(n_chunks)))

    # ---- folded weights -------------------------------------------------------
    args = [x_view]
    in_specs = [pl.BlockSpec((None, h, wm, stride * cin_p), lambda b: (b, 0, 0, 0))]
    weight_bytes = 0
    flops_per_img = 0
    for i, c in enumerate(convs):
        s_i = stride if i == 0 else 1
        ci = cin if i == 0 else cout
        ci_p = cin_p if i == 0 else cout_p
        wgt, shf = _assemble_main_weight(c, s_i, ci, ci_p, cout_p)
        args += [wgt, shf]
        in_specs += [pl.BlockSpec(wgt.shape, lambda b: (0, 0, 0)),
                     pl.BlockSpec(shf.shape, lambda b: (0, 0))]
        weight_bytes += int(wgt.size) * 2 + int(shf.size) * 4
        flops_per_img += 2 * ho * wo * wgt.shape[0] * wgt.shape[1] * cout_p
    if sc is not None:
        wsc, ssc = _assemble_shortcut_weight(sc, cin, cin_p, cout_p)
        args += [wsc, ssc]
        in_specs += [pl.BlockSpec(wsc.shape, lambda b: (0, 0)),
                     pl.BlockSpec(ssc.shape, lambda b: (0, 0))]
        weight_bytes += int(wsc.size) * 2 + int(ssc.size) * 4
        flops_per_img += 2 * ho * wo * cin_p * cout_p

    cfg = dict(n_layers=n_layers, has_sc=sc is not None, cin_p=cin_p,
               cout_p=cout_p, ho=ho, wo=wo, tr=tr, chunk_starts=chunk_starts,
               layers=layers)

    # ---- VMEM scratch (whole per-image activations stay on-chip) -------------
    scratch_shapes_py = [(stride, r0_rows, wq0, stride * cin_p)]
    for _ in range(1, n_layers):
        scratch_shapes_py.append((1, ho + 2, wo + 2, cout_p))
    scratch = [pltpu.VMEM(s_, jnp.bfloat16) for s_ in scratch_shapes_py]

    in_block_bytes = h * wm * stride * cin_p * 2
    out_block_bytes = ho * wo * cout_p * 4
    scratch_bytes = sum(int(math.prod(s_)) * 2 for s_ in scratch_shapes_py)
    vmem_need = (2 * in_block_bytes + 2 * out_block_bytes
                 + weight_bytes + scratch_bytes)
    assert vmem_need < 100 * 2 ** 20, (
        f"per-image VMEM footprint {vmem_need / 2**20:.1f} MiB too large for "
        "whole-block fusion; TODO(synk): tiled fallback")
    vmem_limit = min(127 * 2 ** 20,
                     max(32 * 2 ** 20, int(vmem_need * 1.3) + (2 << 20)))

    cost = pl.CostEstimate(
        flops=n * flops_per_img,
        transcendentals=n * n_layers * ho * wo * cout_p,
        bytes_accessed=int(x_view.size) * 2 + weight_bytes + n * out_block_bytes)

    out = pl.pallas_call(
        functools.partial(_block_kernel, cfg=cfg),
        out_shape=jax.ShapeDtypeStruct((n, ho, wo, cout_p), jnp.float32),
        grid=(n,),
        in_specs=in_specs,
        out_specs=pl.BlockSpec((None, ho, wo, cout_p), lambda b: (b, 0, 0, 0)),
        scratch_shapes=scratch,
        compiler_params=pltpu.CompilerParams(
            dimension_semantics=("parallel",),
            vmem_limit_bytes=vmem_limit),
        cost_estimate=cost,
    )(*args)

    return jnp.transpose(out[:, :, :, :cout], (0, 3, 1, 2))    # back to NCHW (f32)


# ---------------------------------------------------------------------------
# Pure-JAX (lax.conv) reference for correctness checks
# ---------------------------------------------------------------------------
def reference_forward(x_nchw, params, stride, *, bf16_match=False):
    """bf16_match=True mirrors the kernel's bf16 operands / bf16 intermediate
    activations (with f32 accumulation); False is the full-f32 module math."""
    x = jnp.transpose(x_nchw, (0, 2, 3, 1)).astype(jnp.float32)

    def conv_bn(hh, c, s, pad, gelu):
        scale, shift = _fold_bn(c)
        w_hwio = jnp.transpose(c["w"] * scale[:, None, None, None], (2, 3, 1, 0))
        if bf16_match:
            hh, w_hwio = hh.astype(jnp.bfloat16), w_hwio.astype(jnp.bfloat16)
        y = lax.conv_general_dilated(
            hh, w_hwio, (s, s), [(pad, pad), (pad, pad)],
            dimension_numbers=("NHWC", "HWIO", "NHWC"),
            preferred_element_type=jnp.float32) + shift
        return _exact_gelu(y) if gelu else y

    sc = params.get("shortcut")
    r = conv_bn(x, sc, stride, 0, False) if sc is not None else x
    h = x
    nconv = len(params["block"])
    for i, c in enumerate(params["block"]):
        h = conv_bn(h, c, stride if i == 0 else 1, 1, True)
        if bf16_match and i < nconv - 1:
            h = h.astype(jnp.bfloat16).astype(jnp.float32)
    return jnp.transpose(h + r, (0, 3, 1, 2))


# ---------------------------------------------------------------------------
# Deterministic parameter init (synthetic; mirrors nn.Conv2d/BatchNorm2d shapes)
# ---------------------------------------------------------------------------
def make_conv_bn(key, cin, cout, ksize):
    k = jax.random.split(key, 6)
    fan_in = cin * ksize * ksize
    return dict(
        w=jax.random.normal(k[0], (cout, cin, ksize, ksize), jnp.float32) / math.sqrt(fan_in),
        b=0.1 * jax.random.normal(k[1], (cout,), jnp.float32),
        gamma=1.0 + 0.1 * jax.random.normal(k[2], (cout,), jnp.float32),
        beta=0.1 * jax.random.normal(k[3], (cout,), jnp.float32),
        mean=0.05 * jax.random.normal(k[4], (cout,), jnp.float32),
        var=1.0 + 0.1 * jnp.abs(jax.random.normal(k[5], (cout,), jnp.float32)),
    )


if __name__ == "__main__":
    in_channels, out_channels, num_convs, stride = 4, 8, 2, 2
    N, H, W = 2, 16, 16

    key = jax.random.PRNGKey(0)
    kx, kp = jax.random.split(key)
    x = jax.random.normal(kx, (N, in_channels, H, W), jnp.float32)

    pkeys = jax.random.split(kp, num_convs + 1)
    block = [make_conv_bn(pkeys[0], in_channels, out_channels, 3)]
    for i in range(1, num_convs):
        block.append(make_conv_bn(pkeys[i], out_channels, out_channels, 3))
    shortcut = make_conv_bn(pkeys[num_convs], in_channels, out_channels, 1)
    params = dict(block=block, shortcut=shortcut)

    out = jax.block_until_ready(residual_conv_block_forward(x, params, stride))
    ref_bf16 = jax.block_until_ready(
        reference_forward(x, params, stride, bf16_match=True))
    ref_f32 = jax.block_until_ready(
        reference_forward(x, params, stride, bf16_match=False))

    assert out.shape == (N, out_channels, H // stride, W // stride), out.shape
    err_bf16 = float(jnp.max(jnp.abs(out - ref_bf16)))
    err_f32 = float(jnp.max(jnp.abs(out - ref_f32)))
    if err_bf16 > 1e-2:
        raise AssertionError(
            f"Pallas mismatch vs bf16-matched reference: max abs err {err_bf16}")
    if err_f32 > 8e-2:
        raise AssertionError(
            f"Pallas mismatch vs f32 reference: max abs err {err_f32}")
    print("KERNEL_OK")
</pallas_src>

<mosaic_0001>
module attributes {stable_mosaic.version = 11 : i64} {
  func.func @_block_kernel(%arg0: i32, %arg1: memref<1x16x8x256xbf16, #tpu.memory_space<vmem>>, %arg2: memref<6x256x128xbf16, #tpu.memory_space<vmem>>, %arg3: memref<1x128xf32, #tpu.memory_space<vmem>>, %arg4: memref<9x128x128xbf16, #tpu.memory_space<vmem>>, %arg5: memref<1x128xf32, #tpu.memory_space<vmem>>, %arg6: memref<128x128xbf16, #tpu.memory_space<vmem>>, %arg7: memref<1x128xf32, #tpu.memory_space<vmem>>, %arg8: memref<1x8x8x128xf32, #tpu.memory_space<vmem>>, %arg9: memref<2x9x9x256xbf16, #tpu.memory_space<vmem>>, %arg10: memref<1x10x10x128xbf16, #tpu.memory_space<vmem>>) attributes {dimension_semantics = [#tpu.dimension_semantics<parallel>], iteration_bounds = array<i64: 2>, scalar_prefetch = 0 : i64, scratch_operands = 2 : i64, tpu.core_type = #tpu.core_type<tc>, window_params = [{transform_indices = @transform_0, window_bounds = array<i64: 1, 16, 8, 256>}, {pipeline_mode = #tpu.pipeline_mode<synchronous>, transform_indices = @transform_1, window_bounds = array<i64: 6, 256, 128>}, {pipeline_mode = #tpu.pipeline_mode<synchronous>, transform_indices = @transform_2, window_bounds = array<i64: 1, 128>}, {pipeline_mode = #tpu.pipeline_mode<synchronous>, transform_indices = @transform_3, window_bounds = array<i64: 9, 128, 128>}, {pipeline_mode = #tpu.pipeline_mode<synchronous>, transform_indices = @transform_4, window_bounds = array<i64: 1, 128>}, {pipeline_mode = #tpu.pipeline_mode<synchronous>, transform_indices = @transform_5, window_bounds = array<i64: 128, 128>}, {pipeline_mode = #tpu.pipeline_mode<synchronous>, transform_indices = @transform_6, window_bounds = array<i64: 1, 128>}, {transform_indices = @transform_7, window_bounds = array<i64: 1, 8, 8, 128>}]} {
    %cst = arith.constant 0.000000e+00 : bf16
    %0 = vector.broadcast %cst : bf16 to vector<2x9x9x256xbf16>
    %c0 = arith.constant 0 : index
    %c0_0 = arith.constant 0 : index
    %c0_1 = arith.constant 0 : index
    %c0_2 = arith.constant 0 : index
    %1 = vector.load %arg9[%c0, %c0_0, %c0_1, %c0_2] : memref<2x9x9x256xbf16, #tpu.memory_space<vmem>>, vector<2x9x9x256xbf16>
    tpu.vector_store %arg9[%c0, %c0_0, %c0_1, %c0_2], %0 {strides = array<i32>} : memref<2x9x9x256xbf16, #tpu.memory_space<vmem>>, vector<2x9x9x256xbf16>,
    %cst_3 = arith.constant 0.000000e+00 : bf16
    %2 = vector.broadcast %cst_3 : bf16 to vector<1x10x10x128xbf16>
    %c0_4 = arith.constant 0 : index
    %c0_5 = arith.constant 0 : index
    %c0_6 = arith.constant 0 : index
    %c0_7 = arith.constant 0 : index
    %3 = vector.load %arg10[%c0_4, %c0_5, %c0_6, %c0_7] : memref<1x10x10x128xbf16, #tpu.memory_space<vmem>>, vector<1x10x10x128xbf16>
    tpu.vector_store %arg10[%c0_4, %c0_5, %c0_6, %c0_7], %2 {strides = array<i32>} : memref<1x10x10x128xbf16, #tpu.memory_space<vmem>>, vector<1x10x10x128xbf16>,
    %c1_i32 = arith.constant 1 : i32
    %c8_i32 = arith.constant 8 : i32
    %4 = arith.addi %c1_i32, %c8_i32 : i32
    %c1_i32_8 = arith.constant 1 : i32
    scf.for %arg11 = %c1_i32 to %4 step %c1_i32_8  : i32 {
      %c2_i32 = arith.constant 2 : i32
      %153 = arith.muli %arg11, %c2_i32 : i32
      %c0_i32_154 = arith.constant 0 : i32
      %154 = arith.addi %153, %c0_i32_154 : i32
      %c1_i32_155 = arith.constant 1 : i32
      %155 = arith.subi %154, %c1_i32_155 : i32
      %c0_156 = arith.constant 0 : index
      %156 = arith.index_cast %155 : i32 to index
      %c0_157 = arith.constant 0 : index
      %c0_158 = arith.constant 0 : index
      %157 = vector.load %arg1[%c0_156, %156, %c0_157, %c0_158] : memref<1x16x8x256xbf16, #tpu.memory_space<vmem>>, vector<1x1x8x256xbf16>
      %158 = vector.shape_cast %157 : vector<1x1x8x256xbf16> to vector<8x256xbf16>
      %c0_159 = arith.constant 0 : index
      %159 = arith.index_cast %arg11 : i32 to index
      %c1_160 = arith.constant 1 : index
      %c0_161 = arith.constant 0 : index
      %160 = vector.load %arg9[%c0_159, %159, %c1_160, %c0_161] : memref<2x9x9x256xbf16, #tpu.memory_space<vmem>>, vector<1x1x8x256xbf16>
      %161 = vector.shape_cast %160 : vector<1x1x8x256xbf16> to vector<8x256xbf16>
      %162 = vector.shape_cast %158 : vector<8x256xbf16> to vector<1x1x8x256xbf16>
      tpu.vector_store %arg9[%c0_159, %159, %c1_160, %c0_161], %162 {strides = array<i32>} : memref<2x9x9x256xbf16, #tpu.memory_space<vmem>>, vector<1x1x8x256xbf16>,
    }
    %c8_i32_9 = arith.constant 8 : i32
    %c0_i32 = arith.constant 0 : i32
    %c8_i32_10 = arith.constant 8 : i32
    %5 = arith.addi %c0_i32, %c8_i32_10 : i32
    %c1_i32_11 = arith.constant 1 : i32
    scf.for %arg11 = %c0_i32 to %5 step %c1_i32_11  : i32 {
      %c2_i32 = arith.constant 2 : i32
      %153 = arith.muli %arg11, %c2_i32 : i32
      %c1_i32_154 = arith.constant 1 : i32
      %154 = arith.addi %153, %c1_i32_154 : i32
      %c1_i32_155 = arith.constant 1 : i32
      %155 = arith.subi %154, %c1_i32_155 : i32
      %c0_156 = arith.constant 0 : index
      %156 = arith.index_cast %155 : i32 to index
      %c0_157 = arith.constant 0 : index
      %c0_158 = arith.constant 0 : index
      %157 = vector.load %arg1[%c0_156, %156, %c0_157, %c0_158] : memref<1x16x8x256xbf16, #tpu.memory_space<vmem>>, vector<1x1x8x256xbf16>
      %158 = vector.shape_cast %157 : vector<1x1x8x256xbf16> to vector<8x256xbf16>
      %c1_159 = arith.constant 1 : index
      %159 = arith.index_cast %arg11 : i32 to index
      %c1_160 = arith.constant 1 : index
      %c0_161 = arith.constant 0 : index
      %160 = vector.load %arg9[%c1_159, %159, %c1_160, %c0_161] : memref<2x9x9x256xbf16, #tpu.memory_space<vmem>>, vector<1x1x8x256xbf16>
      %161 = vector.shape_cast %160 : vector<1x1x8x256xbf16> to vector<8x256xbf16>
      %162 = vector.shape_cast %158 : vector<8x256xbf16> to vector<1x1x8x256xbf16>
      tpu.vector_store %arg9[%c1_159, %159, %c1_160, %c0_161], %162 {strides = array<i32>} : memref<2x9x9x256xbf16, #tpu.memory_space<vmem>>, vector<1x1x8x256xbf16>,
    }
    %c8_i32_12 = arith.constant 8 : i32
    %cst_13 = arith.constant 0.000000e+00 : f32
    %6 = vector.broadcast %cst_13 : f32 to vector<64x128xf32>
    %c0_14 = arith.constant 0 : index
    %c0_15 = arith.constant 0 : index
    %c0_16 = arith.constant 0 : index
    %c0_17 = arith.constant 0 : index
    %7 = vector.load %arg9[%c0_14, %c0_15, %c0_16, %c0_17] : memref<2x9x9x256xbf16, #tpu.memory_space<vmem>>, vector<1x8x8x256xbf16>
    %8 = vector.shape_cast %7 : vector<1x8x8x256xbf16> to vector<8x8x256xbf16>
    %9 = vector.shape_cast %8 : vector<8x8x256xbf16> to vector<64x256xbf16>
    %c0_18 = arith.constant 0 : index
    %c0_19 = arith.constant 0 : index
    %c0_20 = arith.constant 0 : index
    %10 = vector.load %arg2[%c0_18, %c0_19, %c0_20] : memref<6x256x128xbf16, #tpu.memory_space<vmem>>, vector<1x256x128xbf16>
    %11 = vector.shape_cast %10 : vector<1x256x128xbf16> to vector<256x128xbf16>
    %cst_21 = arith.constant dense<0.000000e+00> : vector<64x128xf32>
    %12 = tpu.matmul %9, %11, %cst_21 {dimension_numbers = #tpu.dot_dimension_numbers<[1], [0], [0], [1], [0, 0, 1, 1], [], []>} : vector<64x256xbf16>, vector<256x128xbf16>, vector<64x128xf32> -> vector<64x128xf32>
    %13 = arith.addf %6, %12 : vector<64x128xf32>
    %c0_22 = arith.constant 0 : index
    %c0_23 = arith.constant 0 : index
    %c1 = arith.constant 1 : index
    %c0_24 = arith.constant 0 : index
    %14 = vector.load %arg9[%c0_22, %c0_23, %c1, %c0_24] : memref<2x9x9x256xbf16, #tpu.memory_space<vmem>>, vector<1x8x8x256xbf16>
    %15 = vector.shape_cast %14 : vector<1x8x8x256xbf16> to vector<8x8x256xbf16>
    %16 = vector.shape_cast %15 : vector<8x8x256xbf16> to vector<64x256xbf16>
    %c1_25 = arith.constant 1 : index
    %c0_26 = arith.constant 0 : index
    %c0_27 = arith.constant 0 : index
    %17 = vector.load %arg2[%c1_25, %c0_26, %c0_27] : memref<6x256x128xbf16, #tpu.memory_space<vmem>>, vector<1x256x128xbf16>
    %18 = vector.shape_cast %17 : vector<1x256x128xbf16> to vector<256x128xbf16>
    %cst_28 = arith.constant dense<0.000000e+00> : vector<64x128xf32>
    %19 = tpu.matmul %16, %18, %cst_28 {dimension_numbers = #tpu.dot_dimension_numbers<[1], [0], [0], [1], [0, 0, 1, 1], [], []>} : vector<64x256xbf16>, vector<256x128xbf16>, vector<64x128xf32> -> vector<64x128xf32>
    %20 = arith.addf %13, %19 : vector<64x128xf32>
    %c1_29 = arith.constant 1 : index
    %c0_30 = arith.constant 0 : index
    %c0_31 = arith.constant 0 : index
    %c0_32 = arith.constant 0 : index
    %21 = vector.load %arg9[%c1_29, %c0_30, %c0_31, %c0_32] : memref<2x9x9x256xbf16, #tpu.memory_space<vmem>>, vector<1x8x8x256xbf16>
    %22 = vector.shape_cast %21 : vector<1x8x8x256xbf16> to vector<8x8x256xbf16>
    %23 = vector.shape_cast %22 : vector<8x8x256xbf16> to vector<64x256xbf16>
    %c2 = arith.constant 2 : index
    %c0_33 = arith.constant 0 : index
    %c0_34 = arith.constant 0 : index
    %24 = vector.load %arg2[%c2, %c0_33, %c0_34] : memref<6x256x128xbf16, #tpu.memory_space<vmem>>, vector<1x256x128xbf16>
    %25 = vector.shape_cast %24 : vector<1x256x128xbf16> to vector<256x128xbf16>
    %cst_35 = arith.constant dense<0.000000e+00> : vector<64x128xf32>
    %26 = tpu.matmul %23, %25, %cst_35 {dimension_numbers = #tpu.dot_dimension_numbers<[1], [0], [0], [1], [0, 0, 1, 1], [], []>} : vector<64x256xbf16>, vector<256x128xbf16>, vector<64x128xf32> -> vector<64x128xf32>
    %27 = arith.addf %20, %26 : vector<64x128xf32>
    %c1_36 = arith.constant 1 : index
    %c0_37 = arith.constant 0 : index
    %c1_38 = arith.constant 1 : index
    %c0_39 = arith.constant 0 : index
    %28 = vector.load %arg9[%c1_36, %c0_37, %c1_38, %c0_39] : memref<2x9x9x256xbf16, #tpu.memory_space<vmem>>, vector<1x8x8x256xbf16>
    %29 = vector.shape_cast %28 : vector<1x8x8x256xbf16> to vector<8x8x256xbf16>
    %30 = vector.shape_cast %29 : vector<8x8x256xbf16> to vector<64x256xbf16>
    %c3 = arith.constant 3 : index
    %c0_40 = arith.constant 0 : index
    %c0_41 = arith.constant 0 : index
    %31 = vector.load %arg2[%c3, %c0_40, %c0_41] : memref<6x256x128xbf16, #tpu.memory_space<vmem>>, vector<1x256x128xbf16>
    %32 = vector.shape_cast %31 : vector<1x256x128xbf16> to vector<256x128xbf16>
    %cst_42 = arith.constant dense<0.000000e+00> : vector<64x128xf32>
    %33 = tpu.matmul %30, %32, %cst_42 {dimension_numbers = #tpu.dot_dimension_numbers<[1], [0], [0], [1], [0, 0, 1, 1], [], []>} : vector<64x256xbf16>, vector<256x128xbf16>, vector<64x128xf32> -> vector<64x128xf32>
    %34 = arith.addf %27, %33 : vector<64x128xf32>
    %c0_43 = arith.constant 0 : index
    %c1_44 = arith.constant 1 : index
    %c0_45 = arith.constant 0 : index
    %c0_46 = arith.constant 0 : index
    %35 = vector.load %arg9[%c0_43, %c1_44, %c0_45, %c0_46] : memref<2x9x9x256xbf16, #tpu.memory_space<vmem>>, vector<1x8x8x256xbf16>
    %36 = vector.shape_cast %35 : vector<1x8x8x256xbf16> to vector<8x8x256xbf16>
    %37 = vector.shape_cast %36 : vector<8x8x256xbf16> to vector<64x256xbf16>
    %c4 = arith.constant 4 : index
    %c0_47 = arith.constant 0 : index
    %c0_48 = arith.constant 0 : index
    %38 = vector.load %arg2[%c4, %c0_47, %c0_48] : memref<6x256x128xbf16, #tpu.memory_space<vmem>>, vector<1x256x128xbf16>
    %39 = vector.shape_cast %38 : vector<1x256x128xbf16> to vector<256x128xbf16>
    %cst_49 = arith.constant dense<0.000000e+00> : vector<64x128xf32>
    %40 = tpu.matmul %37, %39, %cst_49 {dimension_numbers = #tpu.dot_dimension_numbers<[1], [0], [0], [1], [0, 0, 1, 1], [], []>} : vector<64x256xbf16>, vector<256x128xbf16>, vector<64x128xf32> -> vector<64x128xf32>
    %41 = arith.addf %34, %40 : vector<64x128xf32>
    %c0_50 = arith.constant 0 : index
    %c1_51 = arith.constant 1 : index
    %c1_52 = arith.constant 1 : index
    %c0_53 = arith.constant 0 : index
    %42 = vector.load %arg9[%c0_50, %c1_51, %c1_52, %c0_53] : memref<2x9x9x256xbf16, #tpu.memory_space<vmem>>, vector<1x8x8x256xbf16>
    %43 = vector.shape_cast %42 : vector<1x8x8x256xbf16> to vector<8x8x256xbf16>
    %44 = vector.shape_cast %43 : vector<8x8x256xbf16> to vector<64x256xbf16>
    %c5 = arith.constant 5 : index
    %c0_54 = arith.constant 0 : index
    %c0_55 = arith.constant 0 : index
    %45 = vector.load %arg2[%c5, %c0_54, %c0_55] : memref<6x256x128xbf16, #tpu.memory_space<vmem>>, vector<1x256x128xbf16>
    %46 = vector.shape_cast %45 : vector<1x256x128xbf16> to vector<256x128xbf16>
    %cst_56 = arith.constant dense<0.000000e+00> : vector<64x128xf32>
    %47 = tpu.matmul %44, %46, %cst_56 {dimension_numbers = #tpu.dot_dimension_numbers<[1], [0], [0], [1], [0, 0, 1, 1], [], []>} : vector<64x256xbf16>, vector<256x128xbf16>, vector<64x128xf32> -> vector<64x128xf32>
    %48 = arith.addf %41, %47 : vector<64x128xf32>
    %c0_57 = arith.constant 0 : index
    %c0_58 = arith.constant 0 : index
    %49 = vector.load %arg3[%c0_57, %c0_58] : memref<1x128xf32, #tpu.memory_space<vmem>>, vector<1x128xf32>
    %50 = vector.broadcast %49 : vector<1x128xf32> to vector<64x128xf32>
    %51 = arith.addf %48, %50 : vector<64x128xf32>
    %cst_59 = arith.constant 5.000000e-01 : f32
    %52 = vector.broadcast %cst_59 : f32 to vector<64x128xf32>
    %53 = arith.mulf %52, %51 : vector<64x128xf32>
    %cst_60 = arith.constant 0.707106769 : f32
    %54 = vector.broadcast %cst_60 : f32 to vector<64x128xf32>
    %55 = arith.mulf %51, %54 : vector<64x128xf32>
    %56 = math.erf %55 : vector<64x128xf32>
    %cst_61 = arith.constant 1.000000e+00 : f32
    %57 = vector.broadcast %cst_61 : f32 to vector<64x128xf32>
    %58 = arith.addf %57, %56 : vector<64x128xf32>
    %59 = arith.mulf %53, %58 : vector<64x128xf32>
    %60 = vector.shape_cast %59 : vector<64x128xf32> to vector<8x8x128xf32>
    %61 = arith.truncf %60 : vector<8x8x128xf32> to vector<8x8x128xbf16>
    %c0_62 = arith.constant 0 : index
    %c1_63 = arith.constant 1 : index
    %c1_64 = arith.constant 1 : index
    %c0_65 = arith.constant 0 : index
    %62 = vector.load %arg10[%c0_62, %c1_63, %c1_64, %c0_65] : memref<1x10x10x128xbf16, #tpu.memory_space<vmem>>, vector<1x8x8x128xbf16>
    %63 = vector.shape_cast %62 : vector<1x8x8x128xbf16> to vector<8x8x128xbf16>
    %64 = vector.shape_cast %61 : vector<8x8x128xbf16> to vector<1x8x8x128xbf16>
    tpu.vector_store %arg10[%c0_62, %c1_63, %c1_64, %c0_65], %64 {strides = array<i32>} : memref<1x10x10x128xbf16, #tpu.memory_space<vmem>>, vector<1x8x8x128xbf16>,
    %cst_66 = arith.constant 0.000000e+00 : f32
    %65 = vector.broadcast %cst_66 : f32 to vector<64x128xf32>
    %c0_67 = arith.constant 0 : index
    %c0_68 = arith.constant 0 : index
    %c0_69 = arith.constant 0 : index
    %c0_70 = arith.constant 0 : index
    %66 = vector.load %arg10[%c0_67, %c0_68, %c0_69, %c0_70] : memref<1x10x10x128xbf16, #tpu.memory_space<vmem>>, vector<1x8x8x128xbf16>
    %67 = vector.shape_cast %66 : vector<1x8x8x128xbf16> to vector<8x8x128xbf16>
    %68 = vector.shape_cast %67 : vector<8x8x128xbf16> to vector<64x128xbf16>
    %c0_71 = arith.constant 0 : index
    %c0_72 = arith.constant 0 : index
    %c0_73 = arith.constant 0 : index
    %69 = vector.load %arg4[%c0_71, %c0_72, %c0_73] : memref<9x128x128xbf16, #tpu.memory_space<vmem>>, vector<1x128x128xbf16>
    %70 = vector.shape_cast %69 : vector<1x128x128xbf16> to vector<128x128xbf16>
    %cst_74 = arith.constant dense<0.000000e+00> : vector<64x128xf32>
    %71 = tpu.matmul %68, %70, %cst_74 {dimension_numbers = #tpu.dot_dimension_numbers<[1], [0], [0], [1], [0, 0, 1, 1], [], []>} : vector<64x128xbf16>, vector<128x128xbf16>, vector<64x128xf32> -> vector<64x128xf32>
    %72 = arith.addf %65, %71 : vector<64x128xf32>
    %c0_75 = arith.constant 0 : index
    %c0_76 = arith.constant 0 : index
    %c1_77 = arith.constant 1 : index
    %c0_78 = arith.constant 0 : index
    %73 = vector.load %arg10[%c0_75, %c0_76, %c1_77, %c0_78] : memref<1x10x10x128xbf16, #tpu.memory_space<vmem>>, vector<1x8x8x128xbf16>
    %74 = vector.shape_cast %73 : vector<1x8x8x128xbf16> to vector<8x8x128xbf16>
    %75 = vector.shape_cast %74 : vector<8x8x128xbf16> to vector<64x128xbf16>
    %c1_79 = arith.constant 1 : index
    %c0_80 = arith.constant 0 : index
    %c0_81 = arith.constant 0 : index
    %76 = vector.load %arg4[%c1_79, %c0_80, %c0_81] : memref<9x128x128xbf16, #tpu.memory_space<vmem>>, vector<1x128x128xbf16>
    %77 = vector.shape_cast %76 : vector<1x128x128xbf16> to vector<128x128xbf16>
    %cst_82 = arith.constant dense<0.000000e+00> : vector<64x128xf32>
    %78 = tpu.matmul %75, %77, %cst_82 {dimension_numbers = #tpu.dot_dimension_numbers<[1], [0], [0], [1], [0, 0, 1, 1], [], []>} : vector<64x128xbf16>, vector<128x128xbf16>, vector<64x128xf32> -> vector<64x128xf32>
    %79 = arith.addf %72, %78 : vector<64x128xf32>
    %c0_83 = arith.constant 0 : index
    %c0_84 = arith.constant 0 : index
    %c2_85 = arith.constant 2 : index
    %c0_86 = arith.constant 0 : index
    %80 = vector.load %arg10[%c0_83, %c0_84, %c2_85, %c0_86] : memref<1x10x10x128xbf16, #tpu.memory_space<vmem>>, vector<1x8x8x128xbf16>
    %81 = vector.shape_cast %80 : vector<1x8x8x128xbf16> to vector<8x8x128xbf16>
    %82 = vector.shape_cast %81 : vector<8x8x128xbf16> to vector<64x128xbf16>
    %c2_87 = arith.constant 2 : index
    %c0_88 = arith.constant 0 : index
    %c0_89 = arith.constant 0 : index
    %83 = vector.load %arg4[%c2_87, %c0_88, %c0_89] : memref<9x128x128xbf16, #tpu.memory_space<vmem>>, vector<1x128x128xbf16>
    %84 = vector.shape_cast %83 : vector<1x128x128xbf16> to vector<128x128xbf16>
    %cst_90 = arith.constant dense<0.000000e+00> : vector<64x128xf32>
    %85 = tpu.matmul %82, %84, %cst_90 {dimension_numbers = #tpu.dot_dimension_numbers<[1], [0], [0], [1], [0, 0, 1, 1], [], []>} : vector<64x128xbf16>, vector<128x128xbf16>, vector<64x128xf32> -> vector<64x128xf32>
    %86 = arith.addf %79, %85 : vector<64x128xf32>
    %c0_91 = arith.constant 0 : index
    %c1_92 = arith.constant 1 : index
    %c0_93 = arith.constant 0 : index
    %c0_94 = arith.constant 0 : index
    %87 = vector.load %arg10[%c0_91, %c1_92, %c0_93, %c0_94] : memref<1x10x10x128xbf16, #tpu.memory_space<vmem>>, vector<1x8x8x128xbf16>
    %88 = vector.shape_cast %87 : vector<1x8x8x128xbf16> to vector<8x8x128xbf16>
    %89 = vector.shape_cast %88 : vector<8x8x128xbf16> to vector<64x128xbf16>
    %c3_95 = arith.constant 3 : index
    %c0_96 = arith.constant 0 : index
    %c0_97 = arith.constant 0 : index
    %90 = vector.load %arg4[%c3_95, %c0_96, %c0_97] : memref<9x128x128xbf16, #tpu.memory_space<vmem>>, vector<1x128x128xbf16>
    %91 = vector.shape_cast %90 : vector<1x128x128xbf16> to vector<128x128xbf16>
    %cst_98 = arith.constant dense<0.000000e+00> : vector<64x128xf32>
    %92 = tpu.matmul %89, %91, %cst_98 {dimension_numbers = #tpu.dot_dimension_numbers<[1], [0], [0], [1], [0, 0, 1, 1], [], []>} : vector<64x128xbf16>, vector<128x128xbf16>, vector<64x128xf32> -> vector<64x128xf32>
    %93 = arith.addf %86, %92 : vector<64x128xf32>
    %c0_99 = arith.constant 0 : index
    %c1_100 = arith.constant 1 : index
    %c1_101 = arith.constant 1 : index
    %c0_102 = arith.constant 0 : index
    %94 = vector.load %arg10[%c0_99, %c1_100, %c1_101, %c0_102] : memref<1x10x10x128xbf16, #tpu.memory_space<vmem>>, vector<1x8x8x128xbf16>
    %95 = vector.shape_cast %94 : vector<1x8x8x128xbf16> to vector<8x8x128xbf16>
    %96 = vector.shape_cast %95 : vector<8x8x128xbf16> to vector<64x128xbf16>
    %c4_103 = arith.constant 4 : index
    %c0_104 = arith.constant 0 : index
    %c0_105 = arith.constant 0 : index
    %97 = vector.load %arg4[%c4_103, %c0_104, %c0_105] : memref<9x128x128xbf16, #tpu.memory_space<vmem>>, vector<1x128x128xbf16>
    %98 = vector.shape_cast %97 : vector<1x128x128xbf16> to vector<128x128xbf16>
    %cst_106 = arith.constant dense<0.000000e+00> : vector<64x128xf32>
    %99 = tpu.matmul %96, %98, %cst_106 {dimension_numbers = #tpu.dot_dimension_numbers<[1], [0], [0], [1], [0, 0, 1, 1], [], []>} : vector<64x128xbf16>, vector<128x128xbf16>, vector<64x128xf32> -> vector<64x128xf32>
    %100 = arith.addf %93, %99 : vector<64x128xf32>
    %c0_107 = arith.constant 0 : index
    %c1_108 = arith.constant 1 : index
    %c2_109 = arith.constant 2 : index
    %c0_110 = arith.constant 0 : index
    %101 = vector.load %arg10[%c0_107, %c1_108, %c2_109, %c0_110] : memref<1x10x10x128xbf16, #tpu.memory_space<vmem>>, vector<1x8x8x128xbf16>
    %102 = vector.shape_cast %101 : vector<1x8x8x128xbf16> to vector<8x8x128xbf16>
    %103 = vector.shape_cast %102 : vector<8x8x128xbf16> to vector<64x128xbf16>
    %c5_111 = arith.constant 5 : index
    %c0_112 = arith.constant 0 : index
    %c0_113 = arith.constant 0 : index
    %104 = vector.load %arg4[%c5_111, %c0_112, %c0_113] : memref<9x128x128xbf16, #tpu.memory_space<vmem>>, vector<1x128x128xbf16>
    %105 = vector.shape_cast %104 : vector<1x128x128xbf16> to vector<128x128xbf16>
    %cst_114 = arith.constant dense<0.000000e+00> : vector<64x128xf32>
    %106 = tpu.matmul %103, %105, %cst_114 {dimension_numbers = #tpu.dot_dimension_numbers<[1], [0], [0], [1], [0, 0, 1, 1], [], []>} : vector<64x128xbf16>, vector<128x128xbf16>, vector<64x128xf32> -> vector<64x128xf32>
    %107 = arith.addf %100, %106 : vector<64x128xf32>
    %c0_115 = arith.constant 0 : index
    %c2_116 = arith.constant 2 : index
    %c0_117 = arith.constant 0 : index
    %c0_118 = arith.constant 0 : index
    %108 = vector.load %arg10[%c0_115, %c2_116, %c0_117, %c0_118] : memref<1x10x10x128xbf16, #tpu.memory_space<vmem>>, vector<1x8x8x128xbf16>
    %109 = vector.shape_cast %108 : vector<1x8x8x128xbf16> to vector<8x8x128xbf16>
    %110 = vector.shape_cast %109 : vector<8x8x128xbf16> to vector<64x128xbf16>
    %c6 = arith.constant 6 : index
    %c0_119 = arith.constant 0 : index
    %c0_120 = arith.constant 0 : index
    %111 = vector.load %arg4[%c6, %c0_119, %c0_120] : memref<9x128x128xbf16, #tpu.memory_space<vmem>>, vector<1x128x128xbf16>
    %112 = vector.shape_cast %111 : vector<1x128x128xbf16> to vector<128x128xbf16>
    %cst_121 = arith.constant dense<0.000000e+00> : vector<64x128xf32>
    %113 = tpu.matmul %110, %112, %cst_121 {dimension_numbers = #tpu.dot_dimension_numbers<[1], [0], [0], [1], [0, 0, 1, 1], [], []>} : vector<64x128xbf16>, vector<128x128xbf16>, vector<64x128xf32> -> vector<64x128xf32>
    %114 = arith.addf %107, %113 : vector<64x128xf32>
    %c0_122 = arith.constant 0 : index
    %c2_123 = arith.constant 2 : index
    %c1_124 = arith.constant 1 : index
    %c0_125 = arith.constant 0 : index
    %115 = vector.load %arg10[%c0_122, %c2_123, %c1_124, %c0_125] : memref<1x10x10x128xbf16, #tpu.memory_space<vmem>>, vector<1x8x8x128xbf16>
    %116 = vector.shape_cast %115 : vector<1x8x8x128xbf16> to vector<8x8x128xbf16>
    %117 = vector.shape_cast %116 : vector<8x8x128xbf16> to vector<64x128xbf16>
    %c7 = arith.constant 7 : index
    %c0_126 = arith.constant 0 : index
    %c0_127 = arith.constant 0 : index
    %118 = vector.load %arg4[%c7, %c0_126, %c0_127] : memref<9x128x128xbf16, #tpu.memory_space<vmem>>, vector<1x128x128xbf16>
    %119 = vector.shape_cast %118 : vector<1x128x128xbf16> to vector<128x128xbf16>
    %cst_128 = arith.constant dense<0.000000e+00> : vector<64x128xf32>
    %120 = tpu.matmul %117, %119, %cst_128 {dimension_numbers = #tpu.dot_dimension_numbers<[1], [0], [0], [1], [0, 0, 1, 1], [], []>} : vector<64x128xbf16>, vector<128x128xbf16>, vector<64x128xf32> -> vector<64x128xf32>
    %121 = arith.addf %114, %120 : vector<64x128xf32>
    %c0_129 = arith.constant 0 : index
    %c2_130 = arith.constant 2 : index
    %c2_131 = arith.constant 2 : index
    %c0_132 = arith.constant 0 : index
    %122 = vector.load %arg10[%c0_129, %c2_130, %c2_131, %c0_132] : memref<1x10x10x128xbf16, #tpu.memory_space<vmem>>, vector<1x8x8x128xbf16>
    %123 = vector.shape_cast %122 : vector<1x8x8x128xbf16> to vector<8x8x128xbf16>
    %124 = vector.shape_cast %123 : vector<8x8x128xbf16> to vector<64x128xbf16>
    %c8 = arith.constant 8 : index
    %c0_133 = arith.constant 0 : index
    %c0_134 = arith.constant 0 : index
    %125 = vector.load %arg4[%c8, %c0_133, %c0_134] : memref<9x128x128xbf16, #tpu.memory_space<vmem>>, vector<1x128x128xbf16>
    %126 = vector.shape_cast %125 : vector<1x128x128xbf16> to vector<128x128xbf16>
    %cst_135 = arith.constant dense<0.000000e+00> : vector<64x128xf32>
    %127 = tpu.matmul %124, %126, %cst_135 {dimension_numbers = #tpu.dot_dimension_numbers<[1], [0], [0], [1], [0, 0, 1, 1], [], []>} : vector<64x128xbf16>, vector<128x128xbf16>, vector<64x128xf32> -> vector<64x128xf32>
    %128 = arith.addf %121, %127 : vector<64x128xf32>
    %c0_136 = arith.constant 0 : index
    %c0_137 = arith.constant 0 : index
    %129 = vector.load %arg5[%c0_136, %c0_137] : memref<1x128xf32, #tpu.memory_space<vmem>>, vector<1x128xf32>
    %130 = vector.broadcast %129 : vector<1x128xf32> to vector<64x128xf32>
    %131 = arith.addf %128, %130 : vector<64x128xf32>
    %cst_138 = arith.constant 5.000000e-01 : f32
    %132 = vector.broadcast %cst_138 : f32 to vector<64x128xf32>
    %133 = arith.mulf %132, %131 : vector<64x128xf32>
    %cst_139 = arith.constant 0.707106769 : f32
    %134 = vector.broadcast %cst_139 : f32 to vector<64x128xf32>
    %135 = arith.mulf %131, %134 : vector<64x128xf32>
    %136 = math.erf %135 : vector<64x128xf32>
    %cst_140 = arith.constant 1.000000e+00 : f32
    %137 = vector.broadcast %cst_140 : f32 to vector<64x128xf32>
    %138 = arith.addf %137, %136 : vector<64x128xf32>
    %139 = arith.mulf %133, %138 : vector<64x128xf32>
    %c1_141 = arith.constant 1 : index
    %c0_142 = arith.constant 0 : index
    %c1_143 = arith.constant 1 : index
    %c0_144 = arith.constant 0 : index
    %140 = vector.load %arg9[%c1_141, %c0_142, %c1_143, %c0_144] : memref<2x9x9x256xbf16, #tpu.memory_space<vmem>>, vector<1x8x8x128xbf16>
    %141 = vector.shape_cast %140 : vector<1x8x8x128xbf16> to vector<8x8x128xbf16>
    %142 = vector.shape_cast %141 : vector<8x8x128xbf16> to vector<64x128xbf16>
    %c0_145 = arith.constant 0 : index
    %c0_146 = arith.constant 0 : index
    %143 = vector.load %arg6[%c0_145, %c0_146] : memref<128x128xbf16, #tpu.memory_space<vmem>>, vector<128x128xbf16>
    %cst_147 = arith.constant dense<0.000000e+00> : vector<64x128xf32>
    %144 = tpu.matmul %142, %143, %cst_147 {dimension_numbers = #tpu.dot_dimension_numbers<[1], [0], [0], [1], [0, 0, 1, 1], [], []>} : vector<64x128xbf16>, vector<128x128xbf16>, vector<64x128xf32> -> vector<64x128xf32>
    %145 = arith.addf %139, %144 : vector<64x128xf32>
    %c0_148 = arith.constant 0 : index
    %c0_149 = arith.constant 0 : index
    %146 = vector.load %arg7[%c0_148, %c0_149] : memref<1x128xf32, #tpu.memory_space<vmem>>, vector<1x128xf32>
    %147 = vector.broadcast %146 : vector<1x128xf32> to vector<64x128xf32>
    %148 = arith.addf %145, %147 : vector<64x128xf32>
    %149 = vector.shape_cast %148 : vector<64x128xf32> to vector<8x8x128xf32>
    %c0_150 = arith.constant 0 : index
    %c0_151 = arith.constant 0 : index
    %c0_152 = arith.constant 0 : index
    %c0_153 = arith.constant 0 : index
    %150 = vector.load %arg8[%c0_150, %c0_151, %c0_152, %c0_153] : memref<1x8x8x128xf32, #tpu.memory_space<vmem>>, vector<1x8x8x128xf32>
    %151 = vector.shape_cast %150 : vector<1x8x8x128xf32> to vector<8x8x128xf32>
    %152 = vector.shape_cast %149 : vector<8x8x128xf32> to vector<1x8x8x128xf32>
    tpu.vector_store %arg8[%c0_150, %c0_151, %c0_152, %c0_153], %152 {strides = array<i32>} : memref<1x8x8x128xf32, #tpu.memory_space<vmem>>, vector<1x8x8x128xf32>,
    return
  }
  func.func @transform_0(%arg0: i32) -> (i32, i32, i32, i32) {
    %c0_i32 = arith.constant 0 : i32
    %c0_i32_0 = arith.constant 0 : i32
    %c0_i32_1 = arith.constant 0 : i32
    %c0_i32_2 = arith.constant 0 : i32
    return %arg0, %c0_i32, %c0_i32_0, %c0_i32_1 : i32, i32, i32, i32
  }
  func.func @transform_1(%arg0: i32) -> (i32, i32, i32) {
    %c0_i32 = arith.constant 0 : i32
    %c0_i32_0 = arith.constant 0 : i32
    %c0_i32_1 = arith.constant 0 : i32
    %c0_i32_2 = arith.constant 0 : i32
    return %c0_i32, %c0_i32_0, %c0_i32_1 : i32, i32, i32
  }
  func.func @transform_2(%arg0: i32) -> (i32, i32) {
    %c0_i32 = arith.constant 0 : i32
    %c0_i32_0 = arith.constant 0 : i32
    %c0_i32_1 = arith.constant 0 : i32
    return %c0_i32, %c0_i32_0 : i32, i32
  }
  func.func @transform_3(%arg0: i32) -> (i32, i32, i32) {
    %c0_i32 = arith.constant 0 : i32
    %c0_i32_0 = arith.constant 0 : i32
    %c0_i32_1 = arith.constant 0 : i32
    %c0_i32_2 = arith.constant 0 : i32
    return %c0_i32, %c0_i32_0, %c0_i32_1 : i32, i32, i32
  }
  func.func @transform_4(%arg0: i32) -> (i32, i32) {
    %c0_i32 = arith.constant 0 : i32
    %c0_i32_0 = arith.constant 0 : i32
    %c0_i32_1 = arith.constant 0 : i32
    return %c0_i32, %c0_i32_0 : i32, i32
  }
  func.func @transform_5(%arg0: i32) -> (i32, i32) {
    %c0_i32 = arith.constant 0 : i32
    %c0_i32_0 = arith.constant 0 : i32
    %c0_i32_1 = arith.constant 0 : i32
    return %c0_i32, %c0_i32_0 : i32, i32
  }
  func.func @transform_6(%arg0: i32) -> (i32, i32) {
    %c0_i32 = arith.constant 0 : i32
    %c0_i32_0 = arith.constant 0 : i32
    %c0_i32_1 = arith.constant 0 : i32
    return %c0_i32, %c0_i32_0 : i32, i32
  }
  func.func @transform_7(%arg0: i32) -> (i32, i32, i32, i32) {
    %c0_i32 = arith.constant 0 : i32
    %c0_i32_0 = arith.constant 0 : i32
    %c0_i32_1 = arith.constant 0 : i32
    %c0_i32_2 = arith.constant 0 : i32
    return %arg0, %c0_i32, %c0_i32_0, %c0_i32_1 : i32, i32, i32, i32
  }
}

</mosaic_0001>

<bundles_post_ra>
// kernel: residual_conv_block_forward.1
= control target key start
LH: loop header
LB: loop body
LE: loop exit
PB: predicated region body
PF: predicated region fallthrough
CT: control target
= control target key end

     0   :  { %s6517_s24 = smov 0   ;;  %s7759_s0 = inlined_call_operand.vmem [shape: bf16[2,16,8,256], index: 0, kind: input, shape index: {}]   ;;  %s7760_s1 = inlined_call_operand.vmem [shape: bf16[6,256,128], index: 1, kind: input, shape index: {}]   ;;  %s7761_s2 = inlined_call_operand.vmem [shape: f32[1,128], index: 2, kind: input, shape index: {}]   ;;  %s7762_s3 = inlined_call_operand.vmem [shape: bf16[9,128,128], index: 3, kind: input, shape index: {}]   ;;  %s7763_s4 = inlined_call_operand.vmem [shape: f32[1,128], index: 4, kind: input, shape index: {}]   ;;  %s7764_s5 = inlined_call_operand.vmem [shape: bf16[128,128], index: 5, kind: input, shape index: {}]   ;;  %s7765_s6 = inlined_call_operand.vmem [shape: f32[1,128], index: 6, kind: input, shape index: {}]   ;;  %s7766_s7 = inlined_call_operand.vmem [shape: f32[2,8,8,128], index: 7, kind: output, shape index: {}]  }
   0x1 LB: > { %s4891_s25 = sadd.s32 4294967295, %s6466_s24   ;;  %p4895_p0 = scmp.ge.s32.totalorder %s6466_s24, 1  ;;  %s6466_s24 = sphi %s6517_s24, %s17_s24  }
   0x2   : > { %p237_p1 = scmp.lt.s32.totalorder %s6466_s24, 3 }
   0x4   : > { %p238_p2 = pnand %p4895_p0, %p237_p1 }
   0x5   : > { %p6527_p3 = scmp.lt.s32.totalorder (!%p238_p2), %s4891_s25, 1  ;;  %vm281_vm0 = vcmask (!%p238_p2), 1040384   ;;  %vm282_vm1 = vsmask.f32 (!%p238_p2), 256  ;;  %vm284_vm2 = vcmask (!%p238_p2), 1044484   ;;  %v6476_v0 = vmov (!%p238_p2), 0  }
   0x6   : > { %241 = sbr.rel (%p238_p2) target bundleno = 984 (0x3d8), region = 48  ;;  %280 = vst [vmem:[#allocation2] sm:$0xff] (!%p238_p2), %v6476_v0  ;;  %291 = vst [vmem:[#allocation2 + $0x10] sm:$0xff] (!%p238_p2), %v6476_v0  ;;  %vm285_vm4 = vsmask.f32 (!%p238_p2), 4352  ;;  %s6468_s12 = smov (!%p238_p2), 1  }
   0x7   : > { %295 = vst [vmem:[#allocation2 + $0x20] sm:$0xff] (!%p238_p2), %v6476_v0  ;;  %299 = vst [vmem:[#allocation2 + $0x30] sm:$0xff] (!%p238_p2), %v6476_v0  ;;  %v288_v2 = vld [vmem:[#allocation2 + $0x8] sm:$0x11] (!%p238_p2)  ;;  %v292_v3 = vld [vmem:[#allocation2 + $0x18] sm:$0x11] (!%p238_p2) }
   0x8   : > { %303 = vst [vmem:[#allocation2 + $0x40] sm:$0xff] (!%p238_p2), %v6476_v0  ;;  %307 = vst [vmem:[#allocation2 + $0x50] sm:$0xff] (!%p238_p2), %v6476_v0  ;;  %v296_v4 = vld [vmem:[#allocation2 + $0x28] sm:$0x11] (!%p238_p2)  ;;  %v300_v5 = vld [vmem:[#allocation2 + $0x38] sm:$0x11] (!%p238_p2) }
   0x9   : > { %311 = vst [vmem:[#allocation2 + $0x60] sm:$0xff] (!%p238_p2), %v6476_v0  ;;  %315 = vst [vmem:[#allocation2 + $0x70] sm:$0xff] (!%p238_p2), %v6476_v0  ;;  %v304_v7 = vld [vmem:[#allocation2 + $0x48] sm:$0x11] (!%p238_p2)  ;;  %v308_v8 = vld [vmem:[#allocation2 + $0x58] sm:$0x11] (!%p238_p2) }
   0xa   : > { %319 = vst [vmem:[#allocation2 + $0x80] sm:$0xff] (!%p238_p2), %v6476_v0  ;;  %323 = vst [vmem:[#allocation2 + $0x90] sm:$0xff] (!%p238_p2), %v6476_v0  ;;  %v312_v15 = vld [vmem:[#allocation2 + $0x68] sm:$0x11] (!%p238_p2)  ;;  %v316_v16 = vld [vmem:[#allocation2 + $0x78] sm:$0x11] (!%p238_p2) }
   0xb   : > { %327 = vst [vmem:[#allocation2 + $0xa0] sm:$0xff] (!%p238_p2), %v6476_v0  ;;  %331 = vst [vmem:[#allocation2 + $0xb0] sm:$0xff] (!%p238_p2), %v6476_v0  ;;  %v320_v19 = vld [vmem:[#allocation2 + $0x88] sm:$0x11] (!%p238_p2)  ;;  %v324_v20 = vld [vmem:[#allocation2 + $0x98] sm:$0x11] (!%p238_p2) }
   0xc   : > { %335 = vst [vmem:[#allocation2 + $0xc0] sm:$0xff] (!%p238_p2), %v6476_v0  ;;  %339 = vst [vmem:[#allocation2 + $0xd0] sm:$0xff] (!%p238_p2), %v6476_v0  ;;  %v328_v23 = vld [vmem:[#allocation2 + $0xa8] sm:$0x11] (!%p238_p2)  ;;  %v332_v24 = vld [vmem:[#allocation2 + $0xb8] sm:$0x11] (!%p238_p2) }
   0xd   : > { %343 = vst [vmem:[#allocation2 + $0xe0] sm:$0xff] %v6476_v0  ;;  %347 = vst [vmem:[#allocation2 + $0xf0] sm:$0xff] %v6476_v0  ;;  %s7781_s25 = smov (!%p6527_p3, %s4891_s25), 1  ;;  %v336_v27 = vld [vmem:[#allocation2 + $0xc8] sm:$0x11] }
   0xe   : > { %351 = vst [vmem:[#allocation2 + $0x100] sm:$0xff] %v6476_v0  ;;  %355 = vst [vmem:[#allocation2 + $0x110] sm:$0xff] %v6476_v0  ;;  %s5503_s27 = sshll.u32 %s7781_s25, 7  ;;  %s5504_s28 = sshll.u32 %s7781_s25, 6  ;;  %v340_v28 = vld [vmem:[#allocation2 + $0xd8] sm:$0x11] }
   0xf   : > { %359 = vst [vmem:[#allocation3] sm:$0xf] %v6476_v0  ;;  %360 = vst [vmem:[#allocation3 + $0x4] sm:$0x1] %v6476_v0  ;;  %s6559_s8 = scalar_lea.vmem %s7759_s0, %s5503_s27  ;;  %s6564_s11 = scalar_lea.vmem %s7766_s7, %s5504_s28  ;;  %v344_v31 = vld [vmem:[#allocation2 + $0xe8] sm:$0x11] }
  0x10   : > { %361 = vst [vmem:[#allocation3 + $0x8] sm:$0xf] %v6476_v0  ;;  %362 = vst [vmem:[#allocation3 + $0xc] sm:$0x1] %v6476_v0  ;;  %v348_v32 = vld [vmem:[#allocation2 + $0xf8] sm:$0x11] }
  0x11   : > { %363 = vst [vmem:[#allocation3 + $0x10] sm:$0xf] %v6476_v0  ;;  %364 = vst [vmem:[#allocation3 + $0x14] sm:$0x1] %v6476_v0  ;;  %v352_v35 = vld [vmem:[#allocation2 + $0x108] sm:$0x11] }
  0x12   : > { %365 = vst [vmem:[#allocation3 + $0x18] sm:$0xf] %v6476_v0  ;;  %366 = vst [vmem:[#allocation3 + $0x1c] sm:$0x1] %v6476_v0  ;;  %v356_v36 = vld [vmem:[#allocation2 + $0x118] sm:$0x11] }
  0x13   : > { %367 = vst [vmem:[#allocation3 + $0x20] sm:$0xf] %v6476_v0  ;;  %368 = vst [vmem:[#allocation3 + $0x24] sm:$0x1] %v6476_v0 }
  0x14   : > { %369 = vst [vmem:[#allocation3 + $0x28] sm:$0xf] %v6476_v0  ;;  %370 = vst [vmem:[#allocation3 + $0x2c] sm:$0x1] %v6476_v0 }
  0x15   : > { %371 = vst [vmem:[#allocation3 + $0x30] sm:$0xf] %v6476_v0  ;;  %372 = vst [vmem:[#allocation3 + $0x34] sm:$0x1] %v6476_v0 }
  0x16   : > { %373 = vst [vmem:[#allocation3 + $0x38] sm:$0xf] %v6476_v0  ;;  %374 = vst [vmem:[#allocation3 + $0x3c] sm:$0x1] %v6476_v0 }
  0x17   : > { %375 = vst [vmem:[#allocation3 + $0x40] sm:$0xf] %v6476_v0  ;;  %376 = vst [vmem:[#allocation3 + $0x44] sm:$0x1] %v6476_v0 }
  0x18   : > { %377 = vst [vmem:[#allocation3 + $0x48] sm:$0xf] %v6476_v0  ;;  %378 = vst [vmem:[#allocation3 + $0x4c] sm:$0x1] %v6476_v0 }
  0x19   : > { %vm6533_vm3 = vmand %vm281_vm0, %vm282_vm1 }
  0x1a   : > { %vm286_vm5 = vmand %vm284_vm2, %vm285_vm4 }
  0x1b   : > { %vm6544_vm6 = vmor %vm286_vm5, %vm6533_vm3 }
  0x1c   : > { %v289_v9 = vsel %vm6544_vm6, 0, %v288_v2  ;;  %v293_v10 = vsel %vm6544_vm6, 0, %v292_v3  ;;  %v297_v11 = vsel %vm6544_vm6, 0, %v296_v4  ;;  %v301_v12 = vsel %vm6544_vm6, 0, %v300_v5 }
  0x1d   : > { %290 = vst [vmem:[#allocation2 + $0x8] sm:$0x11] %v289_v9  ;;  %294 = vst [vmem:[#allocation2 + $0x18] sm:$0x11] %v293_v10  ;;  %v305_v13 = vsel %vm6544_vm6, 0, %v304_v7  ;;  %v309_v14 = vsel %vm6544_vm6, 0, %v308_v8 }
  0x1e   : > { %298 = vst [vmem:[#allocation2 + $0x28] sm:$0x11] %v297_v11  ;;  %302 = vst [vmem:[#allocation2 + $0x38] sm:$0x11] %v301_v12  ;;  %v313_v17 = vsel %vm6544_vm6, 0, %v312_v15  ;;  %v317_v18 = vsel %vm6544_vm6, 0, %v316_v16 }
  0x1f   : > { %306 = vst [vmem:[#allocation2 + $0x48] sm:$0x11] %v305_v13  ;;  %310 = vst [vmem:[#allocation2 + $0x58] sm:$0x11] %v309_v14  ;;  %v321_v21 = vsel %vm6544_vm6, 0, %v320_v19  ;;  %v325_v22 = vsel %vm6544_vm6, 0, %v324_v20 }
  0x20   : > { %314 = vst [vmem:[#allocation2 + $0x68] sm:$0x11] %v313_v17  ;;  %318 = vst [vmem:[#allocation2 + $0x78] sm:$0x11] %v317_v18  ;;  %v329_v25 = vsel %vm6544_vm6, 0, %v328_v23  ;;  %v333_v26 = vsel %vm6544_vm6, 0, %v332_v24 }
  0x21   : > { %322 = vst [vmem:[#allocation2 + $0x88] sm:$0x11] %v321_v21  ;;  %326 = vst [vmem:[#allocation2 + $0x98] sm:$0x11] %v325_v22  ;;  %v337_v29 = vsel %vm6544_vm6, 0, %v336_v27  ;;  %v341_v30 = vsel %vm6544_vm6, 0, %v340_v28 }
  0x22   : > { %330 = vst [vmem:[#allocation2 + $0xa8] sm:$0x11] %v329_v25  ;;  %334 = vst [vmem:[#allocation2 + $0xb8] sm:$0x11] %v333_v26  ;;  %v345_v33 = vsel %vm6544_vm6, 0, %v344_v31  ;;  %v349_v34 = vsel %vm6544_vm6, 0, %v348_v32 }
  0x23   : > { %338 = vst [vmem:[#allocation2 + $0xc8] sm:$0x11] %v337_v29  ;;  %342 = vst [vmem:[#allocation2 + $0xd8] sm:$0x11] %v341_v30  ;;  %v353_v37 = vsel %vm6544_vm6, 0, %v352_v35  ;;  %v357_v38 = vsel %vm6544_vm6, 0, %v356_v36 }
  0x24   : > { %346 = vst [vmem:[#allocation2 + $0xe8] sm:$0x11] %v345_v33  ;;  %350 = vst [vmem:[#allocation2 + $0xf8] sm:$0x11] %v349_v34 }
  0x25   : > { %354 = vst [vmem:[#allocation2 + $0x108] sm:$0x11] %v353_v37  ;;  %358 = vst [vmem:[#allocation2 + $0x118] sm:$0x11] %v357_v38 }
  0x26 LB: >> { %vm404_vm7 = vcmask 1043456   ;;  %vm405_vm8 = vsmask.f32 7938  ;;  %s5505_s13 = sshll.u32 %s6470_s12, 4  ;;  %vm407_vm9 = vcmask 1047556   ;;  %s384_s12 = sadd.s32 1, %s6470_s12   ;;  %s6470_s12 = sphi %s6468_s12, %s384_s12  }
  0x27   : >> { %vm408_vm10 = vsmask.f32 7954  ;;  %s4847_s14 = scalar_lea.vmem %s6559_s8, %s5505_s13  ;;  %vm6595_vm11 = vmand %vm404_vm7, %vm405_vm8  ;;  %s403_s15 = scalar_lea.vmem [#allocation2], %s5505_s13 }
  0x28   : >> { %v4902_v39 = vld [vmem:[%s4847_s14 - $0x8] sm:$0xff]  ;;  %vm6599_vm12 = vmand %vm407_vm9, %vm408_vm10  ;;  %p381_p4 = scmp.ge.s32.totalorder %s384_s12, 9  }
  0x29   : >> { %v392_v41 = vshrl.u32 %v4902_v39, 16  ;;  %v395_v42 = vshll.u32 %v4902_v39, 16  ;;  %vm410_vm13 = vmor %vm6599_vm12, %vm6595_vm11  ;;  %s6472_s16 = smov (%p381_p4), 0  }
  0x2a   : > { %383 = sbr.rel (!%p381_p4) target bundleno = 38 (0x26), region = 113 }
  0x2b   : >> { %v394_v44 = vrot.slane %v392_v41, 7 }
  0x2c   : >> { %v411_v45 = vld [vmem:[%s403_s15] sm:$0xff]  ;;  %v414_v46 = vld [vmem:[%s403_s15 + $0x8] sm:$0x11] }
  0x2d   : >> { %v397_v47 = vor.u32 %v395_v42, %v394_v44  ;;  %v398_v48 = vrot.slane %v394_v44, 4 }
  0x2f   : >> { %v412_v49 = vsel %vm410_vm13, %v397_v47, %v411_v45  ;;  %v415_v50 = vsel %vm6544_vm6, %v398_v48, %v414_v46 }
  0x30   : >> { %413 = vst [vmem:[%s403_s15] sm:$0xff] %v412_v49  ;;  %416 = vst [vmem:[%s403_s15 + $0x8] sm:$0x11] %v415_v50 }
  0x31 LB: >> { %s5508_s17 = sshll.u32 %s6474_s16, 4  ;;  %s422_s16 = sadd.s32 1, %s6474_s16   ;;  %s6474_s16 = sphi %s6472_s16, %s422_s16  }
  0x32   : >> { %s426_s18 = scalar_lea.vmem %s6559_s8, %s5508_s17  ;;  %s4855_s19 = scalar_lea.vmem [#allocation2], %s5508_s17 }
  0x33   : >> { %v427_v51 = vld [vmem:[%s426_s18] sm:$0xff]  ;;  %p419_p5 = scmp.ge.s32.totalorder %s422_s16, 8  }
  0x34   : >> { %v429_v52 = vshrl.u32 %v427_v51, 16  ;;  %v432_v53 = vshll.u32 %v427_v51, 16  ;;  %v6207_v61 = vld [vmem:[%s7760_s1 + $0xc0] sm:$0xff] (%p419_p5)   ;;  %v6209_v63 = vld [vmem:[%s7760_s1 + $0xc8] sm:$0xff] (%p419_p5)   ;;  %v6211_v2 = vld [vmem:[%s7760_s1 + $0xd0] sm:$0xff] (%p419_p5)   ;;  %vm2941_vm1 = vcmask (%p419_p5), 1042432  }
  0x35   : > { %421 = sbr.rel (!%p419_p5) target bundleno = 49 (0x31), region = 124  ;;  %v6208_v62 = vld [vmem:[%s7760_s1 + $0x80] sm:$0xff] (%p419_p5)   ;;  %5518 = vmatprep.subr.bf16.mxu1 (%p419_p5), %v6207_v61  ;;  %v6210_v0 = vld [vmem:[%s7760_s1 + $0x88] sm:$0xff] (%p419_p5)   ;;  %v6212_v3 = vld [vmem:[%s7760_s1 + $0x90] sm:$0xff] (%p419_p5)   ;;  %vm503_vm14 = vsmask.f32 (%p419_p5), 3328 }
  0x36   : >> { %v431_v54 = vrot.slane %v429_v52, 7  ;;  %5519 = vmatpush3.bf16.msra.mxu1 (%p419_p5), %v6208_v62  ;;  %v6213_v4 = vld [vmem:[%s7760_s1 + $0xd8] sm:$0xff] (%p419_p5)   ;;  %v6215_v6 = vld [vmem:[%s7760_s1 + $0xe0] sm:$0xff] (%p419_p5)   ;;  %v6217_v8 = vld [vmem:[%s7760_s1 + $0xe8] sm:$0xff] (%p419_p5)   ;;  %vm504_vm15 = vsmask.f32 (%p419_p5), 7440 }
  0x37   : >> { %v4910_v55 = vld [vmem:[%s4855_s19 + $0x90] sm:$0xff]  ;;  %v4912_v56 = vld [vmem:[%s4855_s19 + $0x98] sm:$0x11]  ;;  %5520 = vmatprep.subr.bf16.mxu1 (%p419_p5), %v6209_v63  ;;  %v6216_v7 = vld [vmem:[%s7760_s1 + $0xa0] sm:$0xff] (%p419_p5)   ;;  %vm2942_vm2 = vcmask (%p419_p5), 1046532  }
  0x38   : >> { %v434_v57 = vor.u32 %v432_v53, %v431_v54  ;;  %v435_v58 = vrot.slane %v431_v54, 4  ;;  %v6214_v5 = vld [vmem:[%s7760_s1 + $0x98] sm:$0xff] (%p419_p5)   ;;  %v6218_v12 = vld [vmem:[%s7760_s1 + $0xa8] sm:$0xff] (%p419_p5)   ;;  %v6219_v22 = vld [vmem:[%s7760_s1 + $0xf0] sm:$0xff] (%p419_p5)  }
  0x39   : > { %v6220_v26 = vld [vmem:[%s7760_s1 + $0xb0] sm:$0xff] (%p419_p5)   ;;  %vm6673_vm0 = vmor (%p419_p5), %vm503_vm14, %vm504_vm15  ;;  %v6221_v31 = vld [vmem:[%s7760_s1 + $0xf8] sm:$0xff] (%p419_p5)  }
  0x3a   : >> { %v450_v59 = vsel %vm410_vm13, %v434_v57, %v4910_v55  ;;  %v453_v60 = vsel %vm6544_vm6, %v435_v58, %v4912_v56  ;;  %5521 = vmatpush3.bf16.msra.mxu1 (%p419_p5), %v6210_v0  ;;  %v6222_v48 = vld [vmem:[%s7760_s1 + $0xb8] sm:$0xff] (%p419_p5)   ;;  %v6223_v51 = vld [vmem:[%s7760_s1 + $0x40] sm:$0xff] (%p419_p5)   ;;  %v6225_v58 = vld [vmem:[%s7760_s1 + $0x48] sm:$0xff] (%p419_p5)  }
  0x3b   : >> { %4911 = vst [vmem:[%s4855_s19 + $0x90] sm:$0xff] %v450_v59  ;;  %4913 = vst [vmem:[%s4855_s19 + $0x98] sm:$0x11] %v453_v60  ;;  %5522 = vmatprep.subr.bf16.mxu1 (%p419_p5), %v6211_v2  ;;  %v6224_v55 = vld [vmem:[%s7760_s1] sm:$0xff] (%p419_p5)  }
  0x3c   : > { %v6407_v28 = vld [vmem:[%s7762_s3 + $0x220] sm:$0xff]  }
  0x3e   : > { %5523 = vmatpush3.bf16.msra.mxu1 %v6212_v3 }
  0x3f   : > { %5524 = vmatprep.subr.bf16.mxu1 %v6213_v4 }
  0x42   : > { %5525 = vmatpush3.bf16.msra.mxu1 %v6214_v5  ;;  %v6655_v9 = vld [vmem:[#allocation2] sm:$0xff]  ;;  %v6657_v10 = vld [vmem:[#allocation2 + $0x10] sm:$0xff]  ;;  %v495_v11 = vld [vmem:[#allocation2 + $0x8] sm:$0x11] }
  0x43   : > { %5526 = vmatprep.subr.bf16.mxu1 %v6215_v6  ;;  %v496_v13 = vld [vmem:[#allocation2 + $0x18] sm:$0x11]  ;;  %v507_v14 = vshrl.u32 %v6655_v9, 16  ;;  %v510_v15 = vshll.u32 %v6655_v9, 16  ;;  %v516_v16 = vshll.u32 %v495_v11, 16  ;;  %v521_v17 = vshrl.u32 %v6657_v10, 16 }
  0x44   : > { %v524_v18 = vshll.u32 %v6657_v10, 16  ;;  %v530_v19 = vshll.u32 %v496_v13, 16  ;;  %v6680_v33 = vld [vmem:[#allocation2 + $0x20] sm:$0xff]  ;;  %v6682_v34 = vld [vmem:[#allocation2 + $0x30] sm:$0xff]  ;;  %v497_v36 = vld [vmem:[#allocation2 + $0x28] sm:$0x11] }
  0x45   : > { %v509_v20 = vrot.slane %v507_v14, 4  ;;  %v512_v21 = vrot.slane %v510_v15, 5  ;;  %v518_v23 = vrot.slane %v516_v16, 5  ;;  %v523_v24 = vrot.slane %v521_v17, 4  ;;  %v498_v37 = vld [vmem:[#allocation2 + $0x38] sm:$0x11] }
  0x46   : > { %5527 = vmatpush3.bf16.msra.mxu1 %v6216_v7  ;;  %v526_v25 = vrot.slane %v524_v18, 5  ;;  %v532_v30 = vrot.slane %v530_v19, 5  ;;  %v535_v38 = vshrl.u32 %v6680_v33, 16  ;;  %v538_v41 = vshll.u32 %v6680_v33, 16  ;;  %v6704_v61 = vld [vmem:[#allocation2 + $0x40] sm:$0xff]  ;;  %v6706_v62 = vld [vmem:[#allocation2 + $0x50] sm:$0xff] }
  0x47   : > { %5528 = vmatprep.subr.bf16.mxu1 %v6217_v8  ;;  %v513_v27 = vor.u32 %v512_v21, %v509_v20  ;;  %v544_v42 = vshll.u32 %v497_v36, 16  ;;  %v549_v43 = vshrl.u32 %v6682_v34, 16  ;;  %v552_v46 = vshll.u32 %v6682_v34, 16  ;;  %v499_v0 = vld [vmem:[#allocation2 + $0x48] sm:$0x11]  ;;  %v6227_v20 = vld [vmem:[%s7760_s1 + $0x50] sm:$0xff]  }
  0x48   : > { %v527_v29 = vor.u32 %v526_v25, %v523_v24  ;;  %v537_v45 = vrot.slane %v535_v38, 4  ;;  %v558_v47 = vshll.u32 %v498_v37, 16  ;;  %v540_v50 = vrot.slane %v538_v41, 5  ;;  %v500_v2 = vld [vmem:[#allocation2 + $0x58] sm:$0x11]  ;;  %v6226_v17 = vld [vmem:[%s7760_s1 + $0x8] sm:$0xff]  }
  0x49   : > { %v514_v32 = vrot.slane %v513_v27, 4  ;;  %v546_v52 = vrot.slane %v544_v42, 5  ;;  %v551_v53 = vrot.slane %v549_v43, 4  ;;  %v554_v54 = vrot.slane %v552_v46, 5  ;;  %v6228_v25 = vld [vmem:[%s7760_s1 + $0x10] sm:$0xff]   ;;  %v6229_v42 = vld [vmem:[%s7760_s1 + $0x58] sm:$0xff]  }
  0x4a   : > { %5529 = vmatpush3.bf16.msra.mxu1 %v6218_v12  ;;  %v528_v35 = vrot.slane %v527_v29, 4  ;;  %v541_v56 = vor.u32 %v540_v50, %v537_v45  ;;  %v560_v60 = vrot.slane %v558_v47, 5  ;;  %v563_v3 = vshrl.u32 %v6704_v61, 16  ;;  %v6729_v29 = vld [vmem:[#allocation2 + $0x60] sm:$0xff]  ;;  %v502_v36 = vld [vmem:[#allocation2 + $0x78] sm:$0x11] }
  0x4b   : > { %5530 = vmatprep.subr.bf16.mxu1 %v6219_v22  ;;  %v519_v39 = vsel %vm6673_vm0, %v514_v32, %v518_v23  ;;  %v555_v59 = vor.u32 %v554_v54, %v551_v53  ;;  %v566_v5 = vshll.u32 %v6704_v61, 16  ;;  %v572_v6 = vshll.u32 %v499_v0, 16  ;;  %v6731_v32 = vld [vmem:[#allocation2 + $0x70] sm:$0xff]  ;;  %v6230_v53 = vld [vmem:[%s7760_s1 + $0x18] sm:$0xff]  }
  0x4c   : > { %v533_v44 = vsel %vm6673_vm0, %v528_v35, %v532_v30  ;;  %v542_v63 = vrot.slane %v541_v56, 4  ;;  %v577_v7 = vshrl.u32 %v6706_v62, 16  ;;  %v565_v11 = vrot.slane %v563_v3, 4  ;;  %v501_v35 = vld [vmem:[#allocation2 + $0x68] sm:$0x11]  ;;  %v6231_v56 = vld [vmem:[%s7760_s1 + $0x60] sm:$0xff]  }
  0x4d   : > { %v4947_v49 = vcombine.high %v519_v39, %v533_v44  ;;  %v4946_v57 = vcombine.low %v519_v39, %v533_v44  ;;  %v556_v4 = vrot.slane %v555_v59, 4  ;;  %v580_v12 = vshll.u32 %v6706_v62, 16  ;;  %v6232_v3 = vld [vmem:[%s7760_s1 + $0x20] sm:$0xff]  }
  0x4e   : > { %5531 = vmatpush3.bf16.msra.mxu1 %v6220_v26  ;;  %v547_v8 = vsel %vm6673_vm0, %v542_v63, %v546_v52  ;;  %v586_v13 = vshll.u32 %v500_v2, 16  ;;  %v568_v15 = vrot.slane %v566_v5, 5  ;;  %v579_v16 = vrot.slane %v577_v7, 4  ;;  %v6233_v7 = vld [vmem:[%s7760_s1 + $0x68] sm:$0xff]  }
  0x4f   : > { %5532 = vmatprep.subr.bf16.mxu1 %v6221_v31  ;;  %811 = vmatprep.mubr.bf16.mxu1 %v4947_v49  ;;  %v561_v14 = vsel %vm6673_vm0, %v556_v4, %v560_v60  ;;  %v582_v19 = vrot.slane %v580_v12, 5  ;;  %v574_v22 = vrot.slane %v572_v6, 5  ;;  %v5138_v23 = vcombine.low %v6657_v10, %v6680_v33  ;;  %v6234_v12 = vld [vmem:[%s7760_s1 + $0x28] sm:$0xff]  }
  0x50   : > { %v4949_v18 = vcombine.high %v547_v8, %v561_v14  ;;  %v569_v21 = vor.u32 %v568_v15, %v565_v11  ;;  %v5139_v24 = vcombine.high %v6657_v10, %v6680_v33  ;;  %v588_v27 = vrot.slane %v586_v13, 5  ;;  %v6235_v13 = vld [vmem:[%s7760_s1 + $0x70] sm:$0xff]  }
  0x51   : > { %v583_v26 = vor.u32 %v582_v19, %v579_v16  ;;  %v4948_v30 = vcombine.low %v547_v8, %v561_v14  ;;  %v591_v38 = vshrl.u32 %v6729_v29, 16  ;;  %v594_v39 = vshll.u32 %v6729_v29, 16  ;;  %v6236_v15 = vld [vmem:[%s7760_s1 + $0x30] sm:$0xff]   ;;  %v6241_v19 = vld [vmem:[%s7760_s1 + $0x140] sm:$0xff]  }
  0x52   : > { %5533 = vmatpush3.bf16.msra.mxu1 %v6222_v48  ;;  %v570_v31 = vrot.slane %v569_v21, 4  ;;  %v600_v41 = vshll.u32 %v501_v35, 16  ;;  %v605_v44 = vshrl.u32 %v6731_v32, 16  ;;  %v608_v45 = vshll.u32 %v6731_v32, 16  ;;  %v6242_v21 = vld [vmem:[%s7760_s1 + $0x100] sm:$0xff]   ;;  %v6249_v35 = vld [vmem:[%s7760_s1 + $0x158] sm:$0xff]  }
  0x53   : > { %5558 = vmatprep.subr.bf16.mxu1 %v6223_v51  ;;  %v584_v37 = vrot.slane %v583_v26, 4  ;;  %v614_v46 = vshll.u32 %v502_v36, 16  ;;  %v593_v48 = vrot.slane %v591_v38, 4  ;;  %v596_v49 = vrot.slane %v594_v39, 5  ;;  %v6244_v26 = vld [vmem:[%s7760_s1 + $0x108] sm:$0xff]   ;;  %v6250_v36 = vld [vmem:[%s7760_s1 + $0x118] sm:$0xff]  }
  0x54   : > { %v575_v43 = vsel %vm6673_vm0, %v570_v31, %v574_v22  ;;  %v607_v51 = vrot.slane %v605_v44, 4  ;;  %v610_v52 = vrot.slane %v608_v45, 5  ;;  %v5141_v59 = vcombine.high %v6682_v34, %v6704_v61  ;;  %v6254_v39 = vld [vmem:[%s7760_s1 + $0x120] sm:$0xff]   ;;  %v6259_v44 = vld [vmem:[%s7760_s1 + $0x170] sm:$0xff]  }
  0x55   : > { %812 = vmatmul.mubr.bf16.vlgmr.msra.gmra.mrb[0].mxu1 %v4946_v57  ;;  %v589_v47 = vsel %vm6673_vm0, %v584_v37, %v588_v27  ;;  %v597_v54 = vor.u32 %v596_v49, %v593_v48  ;;  %v5140_v60 = vcombine.low %v6682_v34, %v6704_v61  ;;  %v5143_v5 = vcombine.high %v6706_v62, %v6729_v29  ;;  %v6253_v37 = vld [vmem:[%s7760_s1 + $0x160] sm:$0xff]   ;;  %v1046_v45 = vld [vmem:[#allocation2 + $0x90] sm:$0xff]  ;;  %v6261_v49 = vld [vmem:[%s7760_s1 + $0x178] sm:$0xff]  }
  0x56   : > { %5559 = vmatpush3.bf16.msra.mxu1 %v6224_v55  ;;  %819 = vmatprep.mubr.bf16.mxu1 %v4949_v18  ;;  %v4951_v50 = vcombine.high %v575_v43, %v589_v47  ;;  %v602_v55 = vrot.slane %v600_v41, 5  ;;  %v611_v57 = vor.u32 %v610_v52, %v607_v51  ;;  %v4950_v0 = vcombine.low %v575_v43, %v589_v47  ;;  %v6238_v18 = vld [vmem:[%s7760_s1 + $0x38] sm:$0xff]   ;;  %v6256_v43 = vld [vmem:[%s7760_s1 + $0x128] sm:$0xff]   ;;  %v6260_v48 = vld [vmem:[%s7760_s1 + $0x130] sm:$0xff]  }
  0x57   : > { %5560 = vmatprep.subr.bf16.mxu1 %v6225_v58  ;;  %v616_v58 = vrot.slane %v614_v46, 5  ;;  %v598_v63 = vrot.slane %v597_v54, 4  ;;  %v5142_v6 = vcombine.low %v6706_v62, %v6729_v29  ;;  %v4971_v16 = vcombine.high %v6655_v9, %v6657_v10  ;;  %v1047_v46 = vld [vmem:[#allocation2 + $0xa0] sm:$0xff]  ;;  %v1048_v54 = vld [vmem:[#allocation2 + $0xb0] sm:$0xff] }
  0x58   : > { %v612_v2 = vrot.slane %v611_v57, 4  ;;  %v4973_v22 = vcombine.high %v6680_v33, %v6682_v34  ;;  %v4972_v27 = vcombine.low %v6680_v33, %v6682_v34  ;;  %v4975_v31 = vcombine.high %v6704_v61, %v6706_v62  ;;  %v6317_v33 = vld [vmem:[%s7760_s1 + $0x2e0] sm:$0xff]   ;;  %v6319_v34 = vld [vmem:[%s7760_s1 + $0x2e8] sm:$0xff]  }
  0x59   : > { %v603_v4 = vsel %vm6673_vm0, %v598_v63, %v602_v55  ;;  %v4974_v38 = vcombine.low %v6704_v61, %v6706_v62  ;;  %v4977_v41 = vcombine.high %v6729_v29, %v6731_v32  ;;  %v4976_v47 = vcombine.low %v6729_v29, %v6731_v32  ;;  %v6265_v32 = vld [vmem:[%s7760_s1 + $0x1c0] sm:$0xff]   ;;  %v6451_v61 = vld [vmem:[#allocation2 + $0x70] sm:$0xff] }
  0x5a   : > { %5561 = vmatpush3.bf16.msra.mxu1 %v6226_v17  ;;  %v617_v8 = vsel %vm6673_vm0, %v612_v2, %v616_v58  ;;  %v6237_v17 = vld [vmem:[%s7760_s1 + $0x78] sm:$0xff]   ;;  %v1313_v51 = vshrl.u32 %v1046_v45, 16  ;;  %v1316_v52 = vshll.u32 %v1046_v45, 16  ;;  %v1049_v55 = vld [vmem:[#allocation2 + $0xc0] sm:$0xff]  ;;  %v1327_v58 = vshrl.u32 %v1047_v46, 16  ;;  %v6324_v62 = vld [vmem:[%s7760_s1 + $0x2b0] sm:$0xff]  }
  0x5b   : > { %5562 = vmatprep.subr.bf16.mxu1 %v6227_v20  ;;  %v4953_v11 = vcombine.high %v603_v4, %v617_v8  ;;  %v4952_v14 = vcombine.low %v603_v4, %v617_v8  ;;  %v4970_v20 = vcombine.low %v6655_v9, %v6657_v10  ;;  %v6247_v9 = vld [vmem:[%s7760_s1 + $0x150] sm:$0xff]   ;;  %v1330_v63 = vshll.u32 %v1047_v46, 16  ;;  %v6266_v4 = vld [vmem:[%s7760_s1 + $0x180] sm:$0xff]   ;;  %v6267_v8 = vld [vmem:[%s7760_s1 + $0x1c8] sm:$0xff]  }
  0x5c   : > { %v1318_v57 = vrot.slane %v1316_v52, 5  ;;  %v1344_v2 = vshll.u32 %v1048_v54, 16  ;;  %v1301_v52 = vld [vmem:[#allocation2 + $0xb8] sm:$0x11] }
  0x5d   : > { %820 = vmatmul.mubr.bf16.gmra.mrb[4].mxu1 %v4948_v30  ;;  %v6248_v30 = vld [vmem:[%s7760_s1 + $0x110] sm:$0xff]   ;;  %v6314_v10 = vld [vmem:[%s7760_s1 + $0x298] sm:$0xff]  }
  0x5e   : > { %5563 = vmatpush3.bf16.msra.mxu1 %v6228_v25  ;;  %827 = vmatprep.mubr.bf16.mxu1 %v4951_v50  ;;  %v6243_v25 = vld [vmem:[%s7760_s1 + $0x148] sm:$0xff]   ;;  %v5027_v50 = vcombine.high %v1046_v45, %v1047_v46 }
  0x5f   : > { %5564 = vmatprep.subr.bf16.mxu1 %v6229_v42  ;;  %v6255_v42 = vld [vmem:[%s7760_s1 + $0x168] sm:$0xff]  }
  0x62   : > { %5565 = vmatpush3.bf16.msra.mxu1 %v6230_v53  ;;  %v6262_v53 = vld [vmem:[%s7760_s1 + $0x138] sm:$0xff]  }
  0x63   : > { %5566 = vmatprep.subr.bf16.mxu1 %v6231_v56  ;;  %v1315_v56 = vrot.slane %v1313_v51, 4 }
  0x65   : > { %828 = vmatmul.mubr.bf16.gmra.mrb[8].mxu1 %v4950_v0  ;;  %v1341_v0 = vshrl.u32 %v1048_v54, 16 }
  0x66   : > { %5567 = vmatpush3.bf16.msra.mxu1 %v6232_v3  ;;  %835 = vmatprep.mubr.bf16.mxu1 %v4953_v11  ;;  %v5026_v3 = vcombine.low %v1046_v45, %v1047_v46  ;;  %v1329_v11 = vrot.slane %v1327_v58, 4  ;;  %v6277_v45 = vld [vmem:[%s7760_s1 + $0x1e0] sm:$0xff]   ;;  %v6874_v46 = vld [vmem:[#allocation2 + $0xf0] sm:$0xff] }
  0x67   : > { %5568 = vmatprep.subr.bf16.mxu1 %v6233_v7  ;;  %v5029_v7 = vcombine.high %v1048_v54, %v1049_v55 }
  0x6a   : > { %5569 = vmatpush3.bf16.msra.mxu1 %v6234_v12  ;;  %v1332_v12 = vrot.slane %v1330_v63, 5 }
  0x6b   : > { %5570 = vmatprep.subr.bf16.mxu1 %v6235_v13  ;;  %v6268_v13 = vld [vmem:[%s7760_s1 + $0x188] sm:$0xff]  }
  0x6d   : > { %836 = vmatmul.mubr.bf16.gmra.mrb[12].mxu1 %v4952_v14  ;;  %v1319_v14 = vor.u32 %v1318_v57, %v1315_v56 }
  0x6e   : > { %5571 = vmatpush3.bf16.msra.mxu1 %v6236_v15  ;;  %1012 = vmatprep.mubr.bf16.mxu1 %v4971_v16  ;;  %v1343_v15 = vrot.slane %v1341_v0, 4  ;;  %v1346_v16 = vrot.slane %v1344_v2, 5  ;;  %v1350_v2 = vshll.u32 %v1301_v52, 16 }
  0x6f   : > { %5572 = vmatprep.subr.bf16.mxu1 %v6237_v17  ;;  %v6271_v17 = vld [vmem:[%s7760_s1 + $0x1d0] sm:$0xff]  }
  0x72   : > { %5573 = vmatpush3.bf16.msra.mxu1 %v6238_v18  ;;  %v1050_v18 = vld [vmem:[#allocation2 + $0xd0] sm:$0xff] }
  0x73   : > { %5598 = vmatprep.subr.bf16.mxu1 %v6241_v19  ;;  %v1051_v19 = vld [vmem:[#allocation2 + $0xe0] sm:$0xff] }
  0x74   : > { %v1383_v63 = vshrl.u32 %v1051_v19, 16  ;;  %v1386_v0 = vshll.u32 %v1051_v19, 16 }
  0x75   : > { %1013 = vmatmul.mubr.bf16.vlgmr.msra.gmra.mrb[16].mxu1 %v4970_v20  ;;  %v1355_v20 = vshrl.u32 %v1049_v55, 16 }
  0x76   : > { %5599 = vmatpush3.bf16.msra.mxu1 %v6242_v21  ;;  %1020 = vmatprep.mubr.bf16.mxu1 %v4973_v22  ;;  %v1297_v21 = vld [vmem:[#allocation2 + $0x98] sm:$0x11]  ;;  %v1333_v22 = vor.u32 %v1332_v12, %v1329_v11  ;;  %v6283_v11 = vld [vmem:[%s7760_s1 + $0x1f0] sm:$0xff]   ;;  %v1307_v12 = vld [vmem:[#allocation2 + $0xe8] sm:$0x11] }
  0x77   : > { %5600 = vmatprep.subr.bf16.mxu1 %v6243_v25  ;;  %v6272_v25 = vld [vmem:[%s7760_s1 + $0x190] sm:$0xff]  }
  0x7a   : > { %5601 = vmatpush3.bf16.msra.mxu1 %v6244_v26  ;;  %v1320_v26 = vrot.slane %v1319_v14, 4 }
  0x7b   : > { %5602 = vmatprep.subr.bf16.mxu1 %v6247_v9  ;;  %v1347_v9 = vor.u32 %v1346_v16, %v1343_v15  ;;  %v1385_v15 = vrot.slane %v1383_v63, 4  ;;  %v1388_v16 = vrot.slane %v1386_v0, 5 }
  0x7d   : > { %1021 = vmatmul.mubr.bf16.gmra.mrb[20].mxu1 %v4972_v27  ;;  %v1358_v27 = vshll.u32 %v1049_v55, 16 }
  0x7e   : > { %5603 = vmatpush3.bf16.msra.mxu1 %v6248_v30  ;;  %1028 = vmatprep.mubr.bf16.mxu1 %v4975_v31  ;;  %v5028_v30 = vcombine.low %v1048_v54, %v1049_v55  ;;  %v6273_v31 = vld [vmem:[%s7760_s1 + $0x1d8] sm:$0xff]   ;;  %v5030_v54 = vcombine.low %v1050_v18, %v1051_v19  ;;  %v6279_v55 = vld [vmem:[%s7760_s1 + $0x1e8] sm:$0xff]  }
  0x7f   : > { %5604 = vmatprep.subr.bf16.mxu1 %v6249_v35  ;;  %v1299_v35 = vld [vmem:[#allocation2 + $0xa8] sm:$0x11] }
  0x82   : > { %5605 = vmatpush3.bf16.msra.mxu1 %v6250_v36  ;;  %v5031_v36 = vcombine.high %v1050_v18, %v1051_v19 }
  0x83   : > { %5606 = vmatprep.subr.bf16.mxu1 %v6253_v37  ;;  %v1322_v37 = vshll.u32 %v1297_v21, 16 }
  0x85   : > { %1029 = vmatmul.mubr.bf16.gmra.mrb[24].mxu1 %v4974_v38  ;;  %v1369_v38 = vshrl.u32 %v1050_v18, 16 }
  0x86   : > { %5607 = vmatpush3.bf16.msra.mxu1 %v6254_v39  ;;  %1036 = vmatprep.mubr.bf16.mxu1 %v4977_v41  ;;  %v1334_v39 = vrot.slane %v1333_v22, 4  ;;  %v1357_v41 = vrot.slane %v1355_v20, 4  ;;  %v1392_v22 = vshll.u32 %v1307_v12, 16 }
  0x87   : > { %5608 = vmatprep.subr.bf16.mxu1 %v6255_v42  ;;  %v6274_v42 = vld [vmem:[%s7760_s1 + $0x198] sm:$0xff]   ;;  %v1371_v51 = vrot.slane %v1369_v38, 4 }
  0x8a   : > { %5609 = vmatpush3.bf16.msra.mxu1 %v6256_v43  ;;  %v1348_v43 = vrot.slane %v1347_v9, 4 }
  0x8b   : > { %5610 = vmatprep.subr.bf16.mxu1 %v6259_v44  ;;  %v1360_v44 = vrot.slane %v1358_v27, 5 }
  0x8d   : > { %1037 = vmatmul.mubr.bf16.gmra.mrb[28].mxu1 %v4976_v47  ;;  %v6876_v47 = vld [vmem:[#allocation2 + $0x100] sm:$0xff] }
  0x8e   : > { %5611 = vmatpush3.bf16.msra.mxu1 %v6260_v48  ;;  %1255 = vmatprep.mubr.bf16.mxu1 %v5027_v50  ;;  %v1336_v48 = vshll.u32 %v1299_v35, 16  ;;  %v1324_v50 = vrot.slane %v1322_v37, 5  ;;  %v5033_v58 = vcombine.high %v6874_v46, %v6876_v47  ;;  %v5032_v9 = vcombine.low %v6874_v46, %v6876_v47 }
  0x8f   : > { %5612 = vmatprep.subr.bf16.mxu1 %v6261_v49  ;;  %v1372_v49 = vshll.u32 %v1050_v18, 16  ;;  %v1389_v35 = vor.u32 %v1388_v16, %v1385_v15  ;;  %v1400_v37 = vshll.u32 %v6874_v46, 16  ;;  %v1411_v38 = vshrl.u32 %v6876_v47, 16  ;;  %v6288_v16 = vld [vmem:[%s7760_s1 + $0x200] sm:$0xff]  }
  0x90   : > { %v1338_v56 = vrot.slane %v1336_v48, 5 }
  0x91   : > { %v1374_v57 = vrot.slane %v1372_v49, 5  ;;  %v1390_v63 = vrot.slane %v1389_v35, 4  ;;  %v1402_v0 = vrot.slane %v1400_v37, 5 }
  0x92   : > { %5613 = vmatpush3.bf16.msra.mxu1 %v6262_v53  ;;  %v6278_v53 = vld [vmem:[%s7760_s1 + $0x1a0] sm:$0xff]   ;;  %v6898_v14 = vsel %vm6673_vm0, %v1334_v39, %v1338_v56  ;;  %v1414_v39 = vshll.u32 %v6876_v47, 16 }
  0x93   : > { %5638 = vmatprep.subr.bf16.mxu1 %v6265_v32  ;;  %v1303_v32 = vld [vmem:[#allocation2 + $0xc8] sm:$0x11]  ;;  %v1375_v18 = vor.u32 %v1374_v57, %v1371_v51  ;;  %v1910_v51 = vld [vmem:[#allocation2 + $0x18] sm:$0x11] }
  0x95   : > { %1256 = vmatmul.mubr.bf16.vlgmr.msra.gmra.mrb[32].mxu1 %v5026_v3  ;;  %v1364_v3 = vshll.u32 %v1303_v32, 16  ;;  %v6287_v32 = vld [vmem:[%s7760_s1 + $0x240] sm:$0xff]  }
  0x96   : > { %5639 = vmatpush3.bf16.msra.mxu1 %v6266_v4  ;;  %1263 = vmatprep.mubr.bf16.mxu1 %v5029_v7  ;;  %v6280_v4 = vld [vmem:[%s7760_s1 + $0x1a8] sm:$0xff]   ;;  %v1361_v7 = vor.u32 %v1360_v44, %v1357_v41  ;;  %v1911_v41 = vld [vmem:[#allocation2 + $0x20] sm:$0xff] }
  0x97   : > { %5640 = vmatprep.subr.bf16.mxu1 %v6267_v8  ;;  %v1305_v8 = vld [vmem:[#allocation2 + $0xd8] sm:$0x11]  ;;  %v1366_v21 = vrot.slane %v1364_v3, 5  ;;  %v1940_v56 = vshrl.u32 %v1911_v41, 16  ;;  %v1943_v57 = vshll.u32 %v1911_v41, 16  ;;  %v1416_v3 = vrot.slane %v1414_v39, 5 }
  0x98   : > { %v1378_v19 = vshll.u32 %v1305_v8, 16  ;;  %v1362_v20 = vrot.slane %v1361_v7, 4  ;;  %v1935_v8 = vshll.u32 %v1910_v51, 16 }
  0x9a   : > { %5641 = vmatpush3.bf16.msra.mxu1 %v6268_v13  ;;  %v6894_v13 = vsel %vm6673_vm0, %v1320_v26, %v1324_v50  ;;  %v6284_v26 = vld [vmem:[%s7760_s1 + $0x1b0] sm:$0xff]   ;;  %v6922_v48 = vrot.slane %v1378_v19, 5  ;;  %v6929_v47 = vsel %vm6673_vm0, %v1362_v20, %v1366_v21  ;;  %v6931_v50 = vrot.slane %v1392_v22, 5  ;;  %v1916_v19 = vld [vmem:[#allocation2 + $0x48] sm:$0x11] }
  0x9b   : > { %5642 = vmatprep.subr.bf16.mxu1 %v6271_v17  ;;  %v1352_v17 = vrot.slane %v1350_v2, 5  ;;  %v5083_v27 = vcombine.high %v6894_v13, %v6898_v14  ;;  %v1413_v2 = vrot.slane %v1411_v38, 4  ;;  %v5082_v22 = vcombine.low %v6894_v13, %v6898_v14  ;;  %v6290_v13 = vld [vmem:[%s7760_s1 + $0x208] sm:$0xff]  }
  0x9d   : > { %1264 = vmatmul.mubr.bf16.gmra.mrb[36].mxu1 %v5028_v30  ;;  %v1397_v30 = vshrl.u32 %v6874_v46, 16  ;;  %v6918_v44 = vsel %vm6673_vm0, %v1348_v43, %v1352_v17  ;;  %v6286_v46 = vld [vmem:[%s7760_s1 + $0x1b8] sm:$0xff]   ;;  %v1913_v43 = vld [vmem:[#allocation2 + $0x30] sm:$0xff] }
  0x9e   : > { %5643 = vmatpush3.bf16.msra.mxu1 %v6272_v25  ;;  %1271 = vmatprep.mubr.bf16.mxu1 %v5031_v36  ;;  %v1309_v25 = vld [vmem:[#allocation2 + $0xf8] sm:$0x11]  ;;  %v6908_v36 = vld [vmem:[#allocation2 + $0x108] sm:$0x11]  ;;  %v1954_v12 = vshrl.u32 %v1913_v43, 16  ;;  %v1957_v15 = vshll.u32 %v1913_v43, 16 }
  0x9f   : > { %5644 = vmatprep.subr.bf16.mxu1 %v6273_v31  ;;  %v1909_v31 = vld [vmem:[#allocation2 + $0x10] sm:$0xff]  ;;  %v1406_v49 = vshll.u32 %v1309_v25, 16  ;;  %v6289_v25 = vld [vmem:[%s7760_s1 + $0x248] sm:$0xff]  }
  0xa0   : > { %v1926_v52 = vshrl.u32 %v1909_v31, 16  ;;  %v1956_v37 = vrot.slane %v1954_v12, 4  ;;  %v1959_v38 = vrot.slane %v1957_v15, 5 }
  0xa1   : > { %v6937_v7 = vrot.slane %v1406_v49, 5  ;;  %v6291_v49 = vld [vmem:[%s7760_s1 + $0x250] sm:$0xff]  }
  0xa2   : > { %5645 = vmatpush3.bf16.msra.mxu1 %v6274_v42  ;;  %v6285_v42 = vld [vmem:[%s7760_s1 + $0x1f8] sm:$0xff]   ;;  %v1928_v17 = vrot.slane %v1926_v52, 4  ;;  %v1977_v52 = vshll.u32 %v1916_v19, 16 }
  0xa3   : > { %5646 = vmatprep.subr.bf16.mxu1 %v6277_v45  ;;  %v6920_v45 = vrot.slane %v1375_v18, 4 }
  0xa5   : > { %1272 = vmatmul.mubr.bf16.gmra.mrb[40].mxu1 %v5030_v54  ;;  %v1399_v54 = vrot.slane %v1397_v30, 4 }
  0xa6   : > { %5647 = vmatpush3.bf16.msra.mxu1 %v6278_v53  ;;  %1279 = vmatprep.mubr.bf16.mxu1 %v5033_v58  ;;  %v1929_v53 = vshll.u32 %v1909_v31, 16  ;;  %v1915_v58 = vld [vmem:[#allocation2 + $0x40] sm:$0xff]  ;;  %v1417_v31 = vor.u32 %v1416_v3, %v1413_v2  ;;  %v6292_v2 = vld [vmem:[%s7760_s1 + $0x210] sm:$0xff]  }
  0xa7   : > { %5648 = vmatprep.subr.bf16.mxu1 %v6279_v55  ;;  %v1420_v55 = vshll.u32 %v6908_v36, 16  ;;  %v1968_v20 = vshrl.u32 %v1915_v58, 16  ;;  %v1971_v21 = vshll.u32 %v1915_v58, 16  ;;  %v1403_v30 = vor.u32 %v1402_v0, %v1399_v54  ;;  %v1917_v36 = vld [vmem:[#allocation2 + $0x50] sm:$0xff]  ;;  %v6964_v58 = vld [vmem:[#allocation2 + $0x60] sm:$0xff] }
  0xa8   : > { %v1931_v18 = vrot.slane %v1929_v53, 5  ;;  %v1418_v43 = vrot.slane %v1417_v31, 4  ;;  %v1982_v54 = vshrl.u32 %v1917_v36, 16  ;;  %v1985_v0 = vshll.u32 %v1917_v36, 16  ;;  %v6300_v31 = vld [vmem:[%s7760_s1 + $0x230] sm:$0xff]   ;;  %v6301_v36 = vld [vmem:[%s7760_s1 + $0x278] sm:$0xff]  }
  0xa9   : > { %v1970_v41 = vrot.slane %v1968_v20, 4  ;;  %v1404_v53 = vrot.slane %v1403_v30, 4  ;;  %v1999_v19 = vshll.u32 %v6964_v58, 16  ;;  %v6295_v20 = vld [vmem:[%s7760_s1 + $0x260] sm:$0xff]   ;;  %v6298_v30 = vld [vmem:[%s7760_s1 + $0x228] sm:$0xff]  }
  0xaa   : > { %5649 = vmatpush3.bf16.msra.mxu1 %v6280_v4  ;;  %v1912_v4 = vld [vmem:[#allocation2 + $0x28] sm:$0x11]  ;;  %v1932_v14 = vor.u32 %v1931_v18, %v1928_v17  ;;  %v6984_v15 = vrot.slane %v1982_v54, 4  ;;  %v6989_v18 = vrot.slane %v1985_v0, 5  ;;  %v6326_v0 = vld [vmem:[%s7760_s1 + $0x2b8] sm:$0xff]  }
  0xab   : > { %5650 = vmatprep.subr.bf16.mxu1 %v6283_v11  ;;  %v1914_v11 = vld [vmem:[#allocation2 + $0x38] sm:$0x11]  ;;  %v1949_v35 = vshll.u32 %v1912_v4, 16  ;;  %v2001_v54 = vrot.slane %v1999_v19, 5 }
  0xac   : > { %v1963_v39 = vshll.u32 %v1914_v11, 16  ;;  %v6969_v3 = vrot.slane %v1932_v14, 4  ;;  %v6307_v14 = vld [vmem:[%s7760_s1 + $0x2c8] sm:$0xff]  }
  0xad   : > { %1280 = vmatmul.mubr.bf16.gmra.mrb[44].mxu1 %v5032_v9  ;;  %v1942_v9 = vrot.slane %v1940_v56, 4  ;;  %v1381_v56 = vsel %vm6673_vm0, %v6920_v45, %v6922_v48  ;;  %v6971_v4 = vrot.slane %v1949_v35, 5  ;;  %v5084_v45 = vcombine.low %v6918_v44, %v6929_v47  ;;  %v6293_v48 = vld [vmem:[%s7760_s1 + $0x258] sm:$0xff]  }
  0xae   : > { %5651 = vmatpush3.bf16.msra.mxu1 %v6284_v26  ;;  %1617 = vmatprep.mubr.bf16.mxu1 %v5083_v27  ;;  %v1945_v26 = vrot.slane %v1943_v57, 5  ;;  %v5085_v27 = vcombine.high %v6918_v44, %v6929_v47  ;;  %v1395_v57 = vsel %vm6673_vm0, %v1390_v63, %v6931_v50  ;;  %v6982_v63 = vrot.slane %v1977_v52, 5  ;;  %v6294_v44 = vld [vmem:[%s7760_s1 + $0x218] sm:$0xff]  }
  0xaf   : > { %5652 = vmatprep.subr.bf16.mxu1 %v6285_v42  ;;  %v1973_v42 = vrot.slane %v1971_v21, 5  ;;  %v5087_v12 = vcombine.high %v1381_v56, %v1395_v57  ;;  %v1409_v21 = vsel %vm6673_vm0, %v1404_v53, %v6937_v7  ;;  %v6299_v7 = vld [vmem:[%s7760_s1 + $0x270] sm:$0xff]   ;;  %v1918_v52 = vld [vmem:[#allocation2 + $0x58] sm:$0x11]  ;;  %v1920_v53 = vld [vmem:[#allocation2 + $0x68] sm:$0x11] }
  0xb0   : > { %v1946_v51 = vor.u32 %v1945_v26, %v1942_v9  ;;  %v5086_v9 = vcombine.low %v1381_v56, %v1395_v57  ;;  %v6297_v26 = vld [vmem:[%s7760_s1 + $0x268] sm:$0xff]   ;;  %v1921_v56 = vld [vmem:[#allocation2 + $0x70] sm:$0xff] }
  0xb1   : > { %v1974_v11 = vor.u32 %v1973_v42, %v1970_v41  ;;  %v6312_v41 = vld [vmem:[%s7760_s1 + $0x290] sm:$0xff]   ;;  %v6313_v42 = vld [vmem:[%s7760_s1 + $0x2d8] sm:$0xff]  }
  0xb2   : > { %5653 = vmatpush3.bf16.msra.mxu1 %v6286_v46  ;;  %v1422_v46 = vrot.slane %v1420_v55, 5  ;;  %v1960_v55 = vor.u32 %v1959_v38, %v1956_v37  ;;  %v6980_v50 = vrot.slane %v1946_v51, 4  ;;  %v6302_v37 = vld [vmem:[%s7760_s1 + $0x238] sm:$0xff]   ;;  %v6305_v38 = vld [vmem:[%s7760_s1 + $0x2c0] sm:$0xff]  }
  0xb3   : > { %5678 = vmatprep.subr.bf16.mxu1 %v6287_v32  ;;  %v6955_v32 = vrot.slane %v1935_v8, 5  ;;  %v6973_v8 = vrot.slane %v1963_v39, 5  ;;  %v6994_v47 = vrot.slane %v1974_v11, 4  ;;  %v6308_v39 = vld [vmem:[%s7760_s1 + $0x288] sm:$0xff]  }
  0xb4   : > { %v6987_v17 = vrot.slane %v1960_v55, 4  ;;  %v1952_v51 = vsel %vm6673_vm0, %v6980_v50, %v6971_v4  ;;  %v2005_v4 = vshll.u32 %v1920_v53, 16  ;;  %v2013_v50 = vshll.u32 %v1921_v56, 16 }
  0xb5   : > { %1618 = vmatmul.mubr.bf16.vlgmr.msra.gmra.mrb[48].mxu1 %v5082_v22  ;;  %v1423_v22 = vsel %vm6673_vm0, %v1418_v43, %v1422_v46  ;;  %v1938_v46 = vsel %vm6673_vm0, %v6969_v3, %v6955_v32  ;;  %v1988_v3 = vor.u32 %v6989_v18, %v6984_v15  ;;  %v1980_v11 = vsel %vm6673_vm0, %v6994_v47, %v6982_v63  ;;  %v1922_v18 = vld [vmem:[#allocation2 + $0x78] sm:$0x11] }
  0xb6   : > { %5679 = vmatpush3.bf16.msra.mxu1 %v6288_v16  ;;  %1625 = vmatprep.mubr.bf16.mxu1 %v5085_v27  ;;  %v1996_v16 = vshrl.u32 %v6964_v58, 16  ;;  %v5089_v27 = vcombine.high %v1409_v21, %v1423_v22  ;;  %v5088_v35 = vcombine.low %v1409_v21, %v1423_v22  ;;  %v5195_v43 = vcombine.high %v1938_v46, %v1952_v51 }
  0xb7   : > { %5680 = vmatprep.subr.bf16.mxu1 %v6289_v25  ;;  %v6296_v25 = vld [vmem:[%s7760_s1 + $0x220] sm:$0xff]   ;;  %v1991_v58 = vshll.u32 %v1918_v52, 16  ;;  %v1989_v19 = vrot.slane %v1988_v3, 4  ;;  %v2007_v15 = vrot.slane %v2005_v4, 5  ;;  %v2015_v22 = vrot.slane %v2013_v50, 5 }
  0xb8   : > { %v1998_v32 = vrot.slane %v1996_v16, 4 }
  0xba   : > { %5681 = vmatpush3.bf16.msra.mxu1 %v6290_v13  ;;  %v6306_v13 = vld [vmem:[%s7760_s1 + $0x280] sm:$0xff]  }
  0xbb   : > { %5682 = vmatprep.subr.bf16.mxu1 %v6291_v49  ;;  %v6320_v49 = vld [vmem:[%s7760_s1 + $0x2a8] sm:$0xff]  }
  0xbd   : > { %1626 = vmatmul.mubr.bf16.gmra.mrb[52].mxu1 %v5084_v45  ;;  %v2002_v45 = vor.u32 %v2001_v54, %v1998_v32 }
  0xbe   : > { %5683 = vmatpush3.bf16.msra.mxu1 %v6292_v2  ;;  %1633 = vmatprep.mubr.bf16.mxu1 %v5087_v12  ;;  %v1966_v2 = vsel %vm6673_vm0, %v6987_v17, %v6973_v8  ;;  %v5194_v12 = vcombine.low %v1938_v46, %v1952_v51  ;;  %v1993_v8 = vrot.slane %v1991_v58, 5 }
  0xbf   : > { %5684 = vmatprep.subr.bf16.mxu1 %v6293_v48  ;;  %v2010_v48 = vshrl.u32 %v1921_v56, 16 }
  0xc0   : > { %v1994_v47 = vsel %vm6673_vm0, %v1989_v19, %v1993_v8 }
  0xc1   : > { %v2012_v21 = vrot.slane %v2010_v48, 4 }
  0xc2   : > { %5685 = vmatpush3.bf16.msra.mxu1 %v6294_v44  ;;  %v5197_v44 = vcombine.high %v1966_v2, %v1980_v11 }
  0xc3   : > { %5686 = vmatprep.subr.bf16.mxu1 %v6295_v20  ;;  %v2003_v20 = vrot.slane %v2002_v45, 4 }
  0xc5   : > { %1634 = vmatmul.mubr.bf16.gmra.mrb[56].mxu1 %v5086_v9  ;;  %v2019_v9 = vshll.u32 %v1922_v18, 16 }
  0xc6   : > { %5687 = vmatpush3.bf16.msra.mxu1 %v6296_v25  ;;  %1641 = vmatprep.mubr.bf16.mxu1 %v5089_v27  ;;  %v1924_v25 = vld [vmem:[#allocation2 + $0x88] sm:$0x11]  ;;  %v2016_v27 = vor.u32 %v2015_v22, %v2012_v21 }
  0xc7   : > { %5688 = vmatprep.subr.bf16.mxu1 %v6297_v26  ;;  %v2008_v26 = vsel %vm6673_vm0, %v2003_v20, %v2007_v15 }
  0xca   : > { %5689 = vmatpush3.bf16.msra.mxu1 %v6298_v30  ;;  %v2033_v30 = vshll.u32 %v1924_v25, 16 }
  0xcb   : > { %5690 = vmatprep.subr.bf16.mxu1 %v6299_v7  ;;  %v5196_v7 = vcombine.low %v1966_v2, %v1980_v11 }
  0xcd   : > { %1642 = vmatmul.mubr.bf16.gmra.mrb[60].mxu1 %v5088_v35  ;;  %v2017_v35 = vrot.slane %v2016_v27, 4 }
  0xce   : > { %5691 = vmatpush3.bf16.msra.mxu1 %v6300_v31  ;;  %1868 = vmatprep.mubr.bf16.mxu1 %v5139_v24  ;;  %v6311_v24 = vld [vmem:[%s7760_s1 + $0x2d0] sm:$0xff]   ;;  %v5199_v31 = vcombine.high %v1994_v47, %v2008_v26 }
  0xcf   : > { %5692 = vmatprep.subr.bf16.mxu1 %v6301_v36  ;;  %v2021_v36 = vrot.slane %v2019_v9, 5  ;;  %v6327_v9 = vld [vmem:[%s7762_s3] sm:$0xff]  }
  0xd0   : > { %5902 = vmatprep.subr.bf16.mxu0 %v6327_v9 }
  0xd1   : > { %5903 = vmatpush3.bf16.msra.mxu0 %v6327_v9 }
  0xd2   : > { %5693 = vmatpush3.bf16.msra.mxu1 %v6302_v37 }
  0xd3   : > { %5718 = vmatprep.subr.bf16.mxu1 %v6305_v38  ;;  %v2035_v38 = vrot.slane %v2033_v30, 5  ;;  %v6328_v30 = vld [vmem:[%s7762_s3 + $0x8] sm:$0xff]  }
  0xd4   : > { %5904 = vmatprep.subr.bf16.mxu0 %v6328_v30 }
  0xd5   : > { %1869 = vmatmul.mubr.bf16.vlgmr.msra.gmra.mrb[64].mxu1 %v5138_v23  ;;  %v1666_v23 = vld [vmem:[#allocation2 + $0x80] sm:$0xff]  ;;  %5905 = vmatpush3.bf16.msra.mxu0 %v6328_v30 }
  0xd6   : > { %5719 = vmatpush3.bf16.msra.mxu1 %v6306_v13  ;;  %1876 = vmatprep.mubr.bf16.mxu1 %v5141_v59  ;;  %v6318_v59 = vld [vmem:[%s7760_s1 + $0x2a0] sm:$0xff]   ;;  %v5144_v29 = vcombine.low %v6451_v61, %v1666_v23  ;;  %v2024_v57 = vshrl.u32 %v1666_v23, 16  ;;  %v2027_v55 = vshll.u32 %v1666_v23, 16  ;;  %v2022_v13 = vsel %vm6673_vm0, %v2017_v35, %v2021_v36 }
  0xd7   : > { %5720 = vmatprep.subr.bf16.mxu1 %v6307_v14 }
  0xd8   : > { %v2026_v16 = vrot.slane %v2024_v57, 4  ;;  %v2029_v17 = vrot.slane %v2027_v55, 5 }
  0xda   : > { %5721 = vmatpush3.bf16.msra.mxu1 %v6308_v39  ;;  %v2030_v63 = vor.u32 %v2029_v17, %v2026_v16  ;;  %v5198_v39 = vcombine.low %v1994_v47, %v2008_v26 }
  0xdb   : > { %5722 = vmatprep.subr.bf16.mxu1 %v6311_v24 }
  0xdc   : > { %v2031_v37 = vrot.slane %v2030_v63, 4 }
  0xdd   : > { %1877 = vmatmul.mubr.bf16.gmra.mrb[68].mxu1 %v5140_v60  ;;  %v5145_v60 = vcombine.high %v6451_v61, %v1666_v23 }
  0xde   : > { %5723 = vmatpush3.bf16.msra.mxu1 %v6312_v41  ;;  %1884 = vmatprep.mubr.bf16.mxu1 %v5143_v5  ;;  %v6323_v5 = vld [vmem:[%s7760_s1 + $0x2f0] sm:$0xff]   ;;  %v2036_v14 = vsel %vm6673_vm0, %v2031_v37, %v2035_v38 }
  0xdf   : > { %5724 = vmatprep.subr.bf16.mxu1 %v6313_v42  ;;  %v5201_v24 = vcombine.high %v2022_v13, %v2036_v14  ;;  %v5200_v41 = vcombine.low %v2022_v13, %v2036_v14  ;;  %v6329_v37 = vld [vmem:[%s7762_s3 + $0x10] sm:$0xff]  }
  0xe0   : > { %5906 = vmatprep.subr.bf16.mxu0 %v6329_v37 }
  0xe1   : > { %5907 = vmatpush3.bf16.msra.mxu0 %v6329_v37 }
  0xe2   : > { %5725 = vmatpush3.bf16.msra.mxu1 %v6314_v10 }
  0xe3   : > { %5726 = vmatprep.subr.bf16.mxu1 %v6317_v33 }
  0xe5   : > { %1885 = vmatmul.mubr.bf16.gmra.mrb[72].mxu1 %v5142_v6  ;;  %v6325_v6 = vld [vmem:[%s7760_s1 + $0x2f8] sm:$0xff]  }
  0xe6   : > { %5727 = vmatpush3.bf16.msra.mxu1 %v6318_v59  ;;  %1892 = vmatprep.mubr.bf16.mxu1 %v5145_v60 }
  0xe7   : > { %5728 = vmatprep.subr.bf16.mxu1 %v6319_v34 }
  0xea   : > { %5729 = vmatpush3.bf16.msra.mxu1 %v6320_v49 }
  0xeb   : > { %5730 = vmatprep.subr.bf16.mxu1 %v6323_v5 }
  0xed   : > { %1893 = vmatmul.mubr.bf16.gmra.mrb[76].mxu1 %v5144_v29 }
  0xee   : > { %5731 = vmatpush3.bf16.msra.mxu1 %v6324_v62  ;;  %2230 = vmatprep.mubr.bf16.mxu1 %v5195_v43 }
  0xef   : > { %5732 = vmatprep.subr.bf16.mxu1 %v6325_v6 }
  0xf2   : > { %5733 = vmatpush3.bf16.msra.mxu1 %v6326_v0 }
  0xf5   : > { %2231 = vmatmul.mubr.bf16.vlgmr.msra.gmra.mrb[80].mxu1 %v5194_v12 }
  0xf6   : > { %2238 = vmatprep.mubr.bf16.mxu1 %v5197_v44 }
  0xfd   : > { %2239 = vmatmul.mubr.bf16.gmra.mrb[84].mxu1 %v5196_v7 }
  0xfe   : > { %2246 = vmatprep.mubr.bf16.mxu1 %v5199_v31 }
 0x105   : > { %2247 = vmatmul.mubr.bf16.gmra.mrb[88].mxu1 %v5198_v39  ;;  %v6330_v39 = vld [vmem:[%s7762_s3 + $0x40] sm:$0xff]  }
 0x106   : > { %2254 = vmatprep.mubr.bf16.mxu1 %v5201_v24  ;;  %5878 = vmatprep.subr.bf16.mxu1 %v6330_v39 }
 0x107   : > { %5879 = vmatpush3.bf16.msra.mxu1 %v6330_v39 }
 0x10d   : > { %2255 = vmatmul.mubr.bf16.gmra.mrb[92].mxu1 %v5200_v41  ;;  %v6331_v41 = vld [vmem:[%s7762_s3 + $0x18] sm:$0xff]  }
 0x10e   : > { %5908 = vmatprep.subr.bf16.mxu0 %v6331_v41 }
 0x10f   : > { %5909 = vmatpush3.bf16.msra.mxu0 %v6331_v41 }
 0x128   : > { %v5534_v42 = vpop.f32.mrb[0].mxu1 }
 0x129   : > { %v5535_v10 = vpop.f32.mrb[1].mxu1 }
 0x12a   : > { %v5536_v33 = vadd.f32 %v5535_v10, %v5534_v42  ;;  %v5537_v23 = vpop.f32.mrb[2].mxu1  ;;  %v6332_v10 = vld [vmem:[%s7762_s3 + $0x48] sm:$0xff]  }
 0x12b   : > { %v5538_v59 = vpop.f32.mrb[3].mxu1  ;;  %5880 = vmatprep.subr.bf16.mxu1 %v6332_v10 }
 0x12c   : > { %v5539_v34 = vadd.f32 %v5538_v59, %v5537_v23  ;;  %5881 = vmatpush3.bf16.msra.mxu1 %v6332_v10 }
 0x130   : > { %v5540_v61 = vpop.f32.mrb[4].mxu1 }
 0x131   : > { %v5541_v60 = vpop.f32.mrb[5].mxu1 }
 0x132   : > { %v5542_v49 = vadd.f32 %v5541_v60, %v5540_v61  ;;  %v5543_v5 = vpop.f32.mrb[6].mxu1 }
 0x133   : > { %v5544_v46 = vpop.f32.mrb[7].mxu1 }
 0x134   : > { %v5545_v51 = vadd.f32 %v5544_v46, %v5543_v5  ;;  %v6334_v5 = vld [vmem:[%s7762_s3 + $0x50] sm:$0xff]  }
 0x135   : > { %5882 = vmatprep.subr.bf16.mxu1 %v6334_v5 }
 0x136   : > { %5883 = vmatpush3.bf16.msra.mxu1 %v6334_v5 }
 0x138   : > { %v5546_v62 = vpop.f32.mrb[8].mxu1 }
 0x139   : > { %v5547_v29 = vpop.f32.mrb[9].mxu1 }
 0x13a   : > { %v5548_v6 = vadd.f32 %v5547_v29, %v5546_v62  ;;  %v5549_v52 = vpop.f32.mrb[10].mxu1  ;;  %v6336_v29 = vld [vmem:[%s7762_s3 + $0x58] sm:$0xff]  }
 0x13b   : > { %v5550_v53 = vpop.f32.mrb[11].mxu1  ;;  %5884 = vmatprep.subr.bf16.mxu1 %v6336_v29 }
 0x13c   : > { %v5551_v43 = vadd.f32 %v5550_v53, %v5549_v52  ;;  %5885 = vmatpush3.bf16.msra.mxu1 %v6336_v29 }
 0x140   : > { %v5552_v32 = vpop.f32.mrb[12].mxu1 }
 0x141   : > { %v5553_v54 = vpop.f32.mrb[13].mxu1 }
 0x142   : > { %v5554_v56 = vadd.f32 %v5553_v54, %v5552_v32  ;;  %v5555_v57 = vpop.f32.mrb[14].mxu1 }
 0x143   : > { %v5556_v55 = vpop.f32.mrb[15].mxu1 }
 0x144   : > { %v5557_v0 = vadd.f32 %v5556_v55, %v5555_v57  ;;  %v6339_v57 = vld [vmem:[%s7762_s3 + $0x60] sm:$0xff]  }
 0x145   : > { %5886 = vmatprep.subr.bf16.mxu1 %v6339_v57 }
 0x146   : > { %5887 = vmatpush3.bf16.msra.mxu1 %v6339_v57 }
 0x148   : > { %v5574_v2 = vpop.f32.mrb[16].mxu1 }
 0x149   : > { %v5575_v3 = vpop.f32.mrb[17].mxu1 }
 0x14a   : > { %v5576_v58 = vadd.f32 %v5575_v3, %v5574_v2  ;;  %v5577_v4 = vpop.f32.mrb[18].mxu1 }
 0x14b   : > { %v5578_v11 = vpop.f32.mrb[19].mxu1 }
 0x14c   : > { %v1015_v45 = vadd.f32 %v5576_v58, %v5536_v33  ;;  %v5579_v48 = vadd.f32 %v5578_v11, %v5577_v4  ;;  %v6341_v58 = vld [vmem:[%s7762_s3 + $0x68] sm:$0xff]  }
 0x14d   : > { %5888 = vmatprep.subr.bf16.mxu1 %v6341_v58 }
 0x14e   : > { %v1018_v50 = vadd.f32 %v5579_v48, %v5539_v34  ;;  %v6333_v34 = vld [vmem:[%s7762_s3 + $0x20] sm:$0xff]   ;;  %5889 = vmatpush3.bf16.msra.mxu1 %v6341_v58 }
 0x14f   : > { %5910 = vmatprep.subr.bf16.mxu0 %v6333_v34  ;;  %v7183_v48 = vld [vmem:[%s7762_s3 + $0x80] sm:$0xff]  }
 0x150   : > { %v5580_v12 = vpop.f32.mrb[20].mxu1  ;;  %5911 = vmatpush3.bf16.msra.mxu0 %v6333_v34 }
 0x151   : > { %v5581_v16 = vpop.f32.mrb[21].mxu1 }
 0x152   : > { %v5582_v44 = vadd.f32 %v5581_v16, %v5580_v12  ;;  %v5583_v19 = vpop.f32.mrb[22].mxu1 }
 0x153   : > { %v5584_v8 = vpop.f32.mrb[23].mxu1 }
 0x154   : > { %v7122_v17 = vadd.f32 %v5582_v44, %v5542_v49  ;;  %v5585_v20 = vadd.f32 %v5584_v8, %v5583_v19  ;;  %v6344_v44 = vld [vmem:[%s7762_s3 + $0x70] sm:$0xff]  }
 0x155   : > { %5890 = vmatprep.subr.bf16.mxu1 %v6344_v44 }
 0x156   : > { %v7124_v15 = vadd.f32 %v5585_v20, %v5545_v51  ;;  %v6335_v51 = vld [vmem:[%s7762_s3 + $0x28] sm:$0xff]   ;;  %5891 = vmatpush3.bf16.msra.mxu1 %v6344_v44 }
 0x157   : > { %5912 = vmatprep.subr.bf16.mxu0 %v6335_v51 }
 0x158   : > { %v5586_v18 = vpop.f32.mrb[24].mxu1  ;;  %5913 = vmatpush3.bf16.msra.mxu0 %v6335_v51 }
 0x159   : > { %v5587_v21 = vpop.f32.mrb[25].mxu1 }
 0x15a   : > { %v5588_v22 = vadd.f32 %v5587_v21, %v5586_v18  ;;  %v5589_v25 = vpop.f32.mrb[26].mxu1 }
 0x15b   : > { %v5590_v63 = vpop.f32.mrb[27].mxu1 }
 0x15c   : > { %v7129_v47 = vadd.f32 %v5588_v22, %v5548_v6  ;;  %v5591_v26 = vadd.f32 %v5590_v63, %v5589_v25  ;;  %v6346_v22 = vld [vmem:[%s7762_s3 + $0x78] sm:$0xff]  }
 0x15d   : > { %5892 = vmatprep.subr.bf16.mxu1 %v6346_v22 }
 0x15e   : > { %v7131_v27 = vadd.f32 %v5591_v26, %v5551_v43  ;;  %v6337_v43 = vld [vmem:[%s7762_s3 + $0x30] sm:$0xff]   ;;  %5893 = vmatpush3.bf16.msra.mxu1 %v6346_v22 }
 0x15f   : > { %5914 = vmatprep.subr.bf16.mxu0 %v6337_v43 }
 0x160   : > { %v5592_v7 = vpop.f32.mrb[28].mxu1  ;;  %5915 = vmatpush3.bf16.msra.mxu0 %v6337_v43 }
 0x161   : > { %v5593_v31 = vpop.f32.mrb[29].mxu1 }
 0x162   : > { %v5594_v35 = vadd.f32 %v5593_v31, %v5592_v7  ;;  %v5595_v36 = vpop.f32.mrb[30].mxu1 }
 0x163   : > { %v5596_v38 = vpop.f32.mrb[31].mxu1 }
 0x164   : > { %v7139_v13 = vadd.f32 %v5594_v35, %v5554_v56  ;;  %v5597_v14 = vadd.f32 %v5596_v38, %v5595_v36 }
 0x166   : > { %v7144_v24 = vadd.f32 %v5597_v14, %v5557_v0  ;;  %v6340_v0 = vld [vmem:[%s7762_s3 + $0x38] sm:$0xff]  }
 0x167   : > { %5916 = vmatprep.subr.bf16.mxu0 %v6340_v0 }
 0x168   : > { %v5614_v42 = vpop.f32.mrb[32].mxu1  ;;  %5917 = vmatpush3.bf16.msra.mxu0 %v6340_v0 }
 0x169   : > { %v5615_v33 = vpop.f32.mrb[33].mxu1  ;;  %5926 = vmatprep.subr.bf16.mxu0 %v7183_v48 }
 0x16a   : > { %v5616_v23 = vadd.f32 %v5615_v33, %v5614_v42  ;;  %v5617_v59 = vpop.f32.mrb[34].mxu1 }
 0x16b   : > { %v5618_v61 = vpop.f32.mrb[35].mxu1 }
 0x16c   : > { %v7155_v60 = vadd.f32 %v5616_v23, %v1015_v45  ;;  %v5619_v49 = vadd.f32 %v5618_v61, %v5617_v59 }
 0x16e   : > { %v1289_v46 = vadd.f32 %v5619_v49, %v1018_v50 }
 0x170   : > { %v5620_v62 = vpop.f32.mrb[36].mxu1 }
 0x171   : > { %v5621_v6 = vpop.f32.mrb[37].mxu1 }
 0x172   : > { %v5622_v52 = vadd.f32 %v5621_v6, %v5620_v62  ;;  %v5623_v53 = vpop.f32.mrb[38].mxu1 }
 0x173   : > { %v5624_v32 = vpop.f32.mrb[39].mxu1 }
 0x174   : > { %v1290_v54 = vadd.f32 %v5622_v52, %v7122_v17  ;;  %v5625_v56 = vadd.f32 %v5624_v32, %v5623_v53 }
 0x176   : > { %v1291_v55 = vadd.f32 %v5625_v56, %v7124_v15 }
 0x178   : > { %v5626_v2 = vpop.f32.mrb[40].mxu1 }
 0x179   : > { %v5627_v3 = vpop.f32.mrb[41].mxu1 }
 0x17a   : > { %v5628_v4 = vadd.f32 %v5627_v3, %v5626_v2  ;;  %v5629_v11 = vpop.f32.mrb[42].mxu1 }
 0x17b   : > { %v5630_v45 = vpop.f32.mrb[43].mxu1 }
 0x17c   : > { %v1292_v50 = vadd.f32 %v5628_v4, %v7129_v47  ;;  %v5631_v12 = vadd.f32 %v5630_v45, %v5629_v11 }
 0x17e   : > { %v1293_v16 = vadd.f32 %v5631_v12, %v7131_v27 }
 0x180   : > { %v5632_v19 = vpop.f32.mrb[44].mxu1 }
 0x181   : > { %v5633_v8 = vpop.f32.mrb[45].mxu1 }
 0x182   : > { %v5634_v17 = vadd.f32 %v5633_v8, %v5632_v19  ;;  %v5635_v20 = vpop.f32.mrb[46].mxu1 }
 0x183   : > { %v5636_v15 = vpop.f32.mrb[47].mxu1 }
 0x184   : > { %v1294_v18 = vadd.f32 %v5634_v17, %v7139_v13  ;;  %v5637_v21 = vadd.f32 %v5636_v15, %v5635_v20 }
 0x186   : > { %v1295_v25 = vadd.f32 %v5637_v21, %v7144_v24 }
 0x188   : > { %v5654_v9 = vpop.f32.mrb[48].mxu1 }
 0x189   : > { %v5655_v63 = vpop.f32.mrb[49].mxu1 }
 0x18a   : > { %v5656_v47 = vadd.f32 %v5655_v63, %v5654_v9  ;;  %v5657_v26 = vpop.f32.mrb[50].mxu1 }
 0x18b   : > { %v5658_v27 = vpop.f32.mrb[51].mxu1 }
 0x18c   : > { %v1650_v30 = vadd.f32 %v5656_v47, %v7155_v60  ;;  %v5659_v7 = vadd.f32 %v5658_v27, %v5657_v26 }
 0x18e   : > { %v1651_v31 = vadd.f32 %v5659_v7, %v1289_v46 }
 0x190   : > { %v5660_v35 = vpop.f32.mrb[52].mxu1 }
 0x191   : > { %v5661_v36 = vpop.f32.mrb[53].mxu1 }
 0x192   : > { %v5662_v37 = vadd.f32 %v5661_v36, %v5660_v35  ;;  %v5663_v38 = vpop.f32.mrb[54].mxu1  ;;  %v7204_v35 = vld [vmem:[%s7761_s2] ss:$0 sm:$0xff] }
 0x193   : > { %v5664_v13 = vpop.f32.mrb[55].mxu1 }
 0x194   : > { %v1652_v14 = vadd.f32 %v5662_v37, %v1290_v54  ;;  %v5665_v39 = vadd.f32 %v5664_v13, %v5663_v38 }
 0x196   : > { %v1653_v41 = vadd.f32 %v5665_v39, %v1291_v55 }
 0x198   : > { %v5666_v24 = vpop.f32.mrb[56].mxu1 }
 0x199   : > { %v5667_v42 = vpop.f32.mrb[57].mxu1 }
 0x19a   : > { %v5668_v10 = vadd.f32 %v5667_v42, %v5666_v24  ;;  %v5669_v33 = vpop.f32.mrb[58].mxu1 }
 0x19b   : > { %v5670_v23 = vpop.f32.mrb[59].mxu1 }
 0x19c   : > { %v1654_v59 = vadd.f32 %v5668_v10, %v1292_v50  ;;  %v5671_v34 = vadd.f32 %v5670_v23, %v5669_v33 }
 0x19e   : > { %v1655_v61 = vadd.f32 %v5671_v34, %v1293_v16 }
 0x1a0   : > { %v5672_v49 = vpop.f32.mrb[60].mxu1 }
 0x1a1   : > { %v5673_v60 = vpop.f32.mrb[61].mxu1 }
 0x1a2   : > { %v5674_v5 = vadd.f32 %v5673_v60, %v5672_v49  ;;  %v5675_v46 = vpop.f32.mrb[62].mxu1 }
 0x1a3   : > { %v5676_v51 = vpop.f32.mrb[63].mxu1 }
 0x1a4   : > { %v1656_v62 = vadd.f32 %v5674_v5, %v1294_v18  ;;  %v5677_v29 = vadd.f32 %v5676_v51, %v5675_v46  ;;  %v7209_v5 = vld [vmem:[#allocation3] sm:$0xf] }
 0x1a6   : > { %v1657_v6 = vadd.f32 %v5677_v29, %v1295_v25 }
 0x1a8   : > { %v5694_v52 = vpop.f32.mrb[64].mxu1 }
 0x1a9   : > { %v5695_v53 = vpop.f32.mrb[65].mxu1 }
 0x1aa   : > { %v5696_v43 = vadd.f32 %v5695_v53, %v5694_v52  ;;  %v5697_v32 = vpop.f32.mrb[66].mxu1 }
 0x1ab   : > { %v5698_v54 = vpop.f32.mrb[67].mxu1 }
 0x1ac   : > { %v1901_v56 = vadd.f32 %v5696_v43, %v1650_v30  ;;  %v5699_v57 = vadd.f32 %v5698_v54, %v5697_v32  ;;  %v2523_v43 = vshrl.u32 %v7209_v5, 16  ;;  %v2526_v54 = vshll.u32 %v7209_v5, 16 }
 0x1ae   : > { %v1902_v55 = vadd.f32 %v5699_v57, %v1651_v31 }
 0x1b0   : > { %v5700_v0 = vpop.f32.mrb[68].mxu1 }
 0x1b1   : > { %v5701_v2 = vpop.f32.mrb[69].mxu1 }
 0x1b2   : > { %v5702_v3 = vadd.f32 %v5701_v2, %v5700_v0  ;;  %v5703_v58 = vpop.f32.mrb[70].mxu1 }
 0x1b3   : > { %v5704_v4 = vpop.f32.mrb[71].mxu1 }
 0x1b4   : > { %v1903_v11 = vadd.f32 %v5702_v3, %v1652_v14  ;;  %v5705_v45 = vadd.f32 %v5704_v4, %v5703_v58 }
 0x1b6   : > { %v1904_v50 = vadd.f32 %v5705_v45, %v1653_v41 }
 0x1b8   : > { %v5706_v12 = vpop.f32.mrb[72].mxu1 }
 0x1b9   : > { %v5707_v16 = vpop.f32.mrb[73].mxu1 }
 0x1ba   : > { %v5708_v44 = vadd.f32 %v5707_v16, %v5706_v12  ;;  %v5709_v19 = vpop.f32.mrb[74].mxu1  ;;  %v2528_v16 = vrot.slane %v2526_v54, 5 }
 0x1bb   : > { %v5710_v8 = vpop.f32.mrb[75].mxu1 }
 0x1bc   : > { %v1905_v17 = vadd.f32 %v5708_v44, %v1654_v59  ;;  %v5711_v20 = vadd.f32 %v5710_v8, %v5709_v19 }
 0x1be   : > { %v1906_v15 = vadd.f32 %v5711_v20, %v1655_v61 }
 0x1c0   : > { %v5712_v18 = vpop.f32.mrb[76].mxu1 }
 0x1c1   : > { %v5713_v21 = vpop.f32.mrb[77].mxu1 }
 0x1c2   : > { %v5714_v22 = vadd.f32 %v5713_v21, %v5712_v18  ;;  %v5715_v25 = vpop.f32.mrb[78].mxu1 }
 0x1c3   : > { %v5716_v9 = vpop.f32.mrb[79].mxu1 }
 0x1c4   : > { %v7197_v63 = vadd.f32 %v5714_v22, %v1656_v62  ;;  %v5717_v47 = vadd.f32 %v5716_v9, %v5715_v25 }
 0x1c6   : > { %v7199_v26 = vadd.f32 %v5717_v47, %v1657_v6 }
 0x1c8   : > { %v5734_v27 = vpop.f32.mrb[80].mxu1 }
 0x1c9   : > { %v5735_v30 = vpop.f32.mrb[81].mxu1 }
 0x1ca   : > { %v5736_v7 = vadd.f32 %v5735_v30, %v5734_v27  ;;  %v5737_v31 = vpop.f32.mrb[82].mxu1 }
 0x1cb   : > { %v5738_v36 = vpop.f32.mrb[83].mxu1 }
 0x1cc   : > { %v2263_v37 = vadd.f32 %v5736_v7, %v1901_v56  ;;  %v5739_v38 = vadd.f32 %v5738_v36, %v5737_v31 }
 0x1ce   : > { %v2278_v13 = vadd.f32 %v7204_v35, %v2263_v37  ;;  %v2264_v14 = vadd.f32 %v5739_v38, %v1902_v55 }
 0x1d0   : > { %v2294_v39 = vmul.f32 0.70710677, %v2278_v13  ;;  %v2279_v41 = vadd.f32 %v7204_v35, %v2264_v14  ;;  %v5740_v24 = vpop.f32.mrb[84].mxu1  ;;  %v2286_v0 = vmul.f32 0.5, %v2278_v13 }
 0x1d1   : > { %v5741_v42 = vpop.f32.mrb[85].mxu1 }
 0x1d2   : > { %6419 = verf.f32 %v2294_v39  ;;  %v2295_v10 = vmul.f32 0.70710677, %v2279_v41  ;;  %v5742_v33 = vadd.f32 %v5741_v42, %v5740_v24  ;;  %v5743_v23 = vpop.f32.mrb[86].mxu1  ;;  %v7226_v39 = vld [vmem:[#allocation3 + $0x4] sm:$0x1] }
 0x1d3   : > { %v5744_v59 = vpop.f32.mrb[87].mxu1  ;;  %v2442_v24 = vld [vmem:[#allocation3 + $0x8] sm:$0xf]  ;;  %v2445_v42 = vld [vmem:[#allocation3 + $0xc] sm:$0x1] }
 0x1d4   : > { %6421 = verf.f32 %v2295_v10  ;;  %v2265_v34 = vadd.f32 %v5742_v33, %v1903_v11  ;;  %v5745_v61 = vadd.f32 %v5744_v59, %v5743_v23  ;;  %v7217_v11 = vrot.slane %v2523_v43, 4 }
 0x1d5   : > { %v2532_v59 = vshll.u32 %v7226_v39, 16 }
 0x1d6   : > { %v2280_v49 = vadd.f32 %v7204_v35, %v2265_v34  ;;  %v2266_v60 = vadd.f32 %v5745_v61, %v1904_v50  ;;  %v2287_v50 = vmul.f32 0.5, %v2279_v41  ;;  %v2529_v27 = vor.u32 %v2528_v16, %v7217_v11 }
 0x1d8   : > { %v2296_v46 = vmul.f32 0.70710677, %v2280_v49  ;;  %v2281_v51 = vadd.f32 %v7204_v35, %v2266_v60  ;;  %v5746_v62 = vpop.f32.mrb[88].mxu1  ;;  %v2288_v7 = vmul.f32 0.5, %v2280_v49  ;;  %v2448_v49 = vld [vmem:[#allocation3 + $0x10] sm:$0xf] }
 0x1d9   : > { %v5747_v29 = vpop.f32.mrb[89].mxu1 }
 0x1da   : > { %6423 = verf.f32 %v2296_v46  ;;  %v2297_v6 = vmul.f32 0.70710677, %v2281_v51  ;;  %v5748_v52 = vadd.f32 %v5747_v29, %v5746_v62  ;;  %v5749_v53 = vpop.f32.mrb[90].mxu1  ;;  %v2451_v46 = vld [vmem:[#allocation3 + $0x14] sm:$0x1]  ;;  %v2289_v62 = vmul.f32 0.5, %v2281_v51 }
 0x1db   : > { %v5750_v32 = vpop.f32.mrb[91].mxu1 }
 0x1dc   : > { %v6420_v56 = vpop.eup %6419  ;;  %6425 = verf.f32 %v2297_v6  ;;  %v2267_v57 = vadd.f32 %v5748_v52, %v1905_v17  ;;  %v5751_v55 = vadd.f32 %v5750_v32, %v5749_v53 }
 0x1dd   : > { %v2310_v2 = vadd.f32 1.0, %v6420_v56 }
 0x1de   : > { %v6422_v3 = vpop.eup %6421  ;;  %v7215_v58 = vadd.f32 %v7204_v35, %v2267_v57  ;;  %v2268_v4 = vadd.f32 %v5751_v55, %v1906_v15  ;;  %v7240_v55 = vld [vmem:[#allocation3] sm:$0xe] }
 0x1df   : > { %v2318_v45 = vmul.f32 %v2310_v2, %v2286_v0  ;;  %v2311_v12 = vadd.f32 1.0, %v6422_v3 }
 0x1e0   : > { %v2298_v44 = vmul.f32 0.70710677, %v7215_v58  ;;  %v7221_v19 = vadd.f32 %v7204_v35, %v2268_v4  ;;  %v5752_v8 = vpop.f32.mrb[92].mxu1  ;;  %v7242_v4 = vrot.slane %v2529_v27, 4  ;;  %v2290_v11 = vmul.f32 0.5, %v7215_v58 }
 0x1e1   : > { %v5510_v17 = vpack.c.bf16 %v2318_v45, %v2318_v45  ;;  %v2319_v20 = vmul.f32 %v2311_v12, %v2287_v50  ;;  %v5753_v18 = vpop.f32.mrb[93].mxu1  ;;  %v7245_v50 = vrot.slane %v2532_v59, 5 }
 0x1e2   : > { %6427 = verf.f32 %v2298_v44  ;;  %v2299_v21 = vmul.f32 0.70710677, %v7221_v19  ;;  %v5754_v22 = vadd.f32 %v5753_v18, %v5752_v8  ;;  %v5755_v15 = vpop.f32.mrb[94].mxu1  ;;  %v2454_v8 = vld [vmem:[#allocation3 + $0x18] sm:$0xf] }
 0x1e3   : > { %v2359_v25 = vshrl.u32 %v5510_v17, 16  ;;  %v5511_v9 = vpack.c.bf16 %v2319_v20, %v2319_v20  ;;  %v5756_v47 = vpop.f32.mrb[95].mxu1  ;;  %v2362_v38 = vshll.u32 %v5510_v17, 16  ;;  %v5267_v20 = vrot.slane %v7240_v55, 9  ;;  %v2457_v18 = vld [vmem:[#allocation3 + $0x1c] sm:$0x1] }
 0x1e4   : > { %v6424_v30 = vpop.eup %6423  ;;  %6429 = verf.f32 %v2299_v21  ;;  %v2269_v31 = vadd.f32 %v5754_v22, %v7197_v63  ;;  %v5757_v36 = vadd.f32 %v5756_v47, %v5755_v15  ;;  %v2291_v22 = vmul.f32 0.5, %v7221_v19 }
 0x1e5   : > { %v2361_v37 = vrot.slane %v2359_v25, 7  ;;  %v2367_v13 = vshrl.u32 %v5511_v9, 16  ;;  %v2312_v14 = vadd.f32 1.0, %v6424_v30  ;;  %v2370_v10 = vshll.u32 %v5511_v9, 16  ;;  %v2460_v30 = vld [vmem:[#allocation3 + $0x20] sm:$0xf] }
 0x1e6   : > { %v6426_v41 = vpop.eup %6425  ;;  %v2284_v33 = vadd.f32 %v7204_v35, %v2269_v31  ;;  %v2270_v23 = vadd.f32 %v5757_v36, %v7199_v26  ;;  %v2946_v25 = vrot.slane %v7226_v39, 5 }
 0x1e7   : > { %v2364_v34 = vor.u32 %v2362_v38, %v2361_v37  ;;  %v2365_v61 = vrot.slane %v2361_v37, 4  ;;  %v2369_v63 = vrot.slane %v2367_v13, 7  ;;  %v2320_v60 = vmul.f32 %v2312_v14, %v2288_v7  ;;  %v2463_v7 = vld [vmem:[#allocation3 + $0x24] sm:$0x1] }
 0x1e8   : > { %v2313_v29 = vadd.f32 1.0, %v6426_v41  ;;  %v2300_v6 = vmul.f32 0.70710677, %v2284_v33  ;;  %v2285_v52 = vadd.f32 %v7204_v35, %v2270_v23  ;;  %v2292_v37 = vmul.f32 0.5, %v2284_v33 }
 0x1e9   : > { %v2443_v53 = vsel %vm6595_vm11, %v2364_v34, %v2442_v24  ;;  %v2446_v43 = vsel %vm6533_vm3, %v2365_v61, %v2445_v42  ;;  %v2372_v26 = vor.u32 %v2370_v10, %v2369_v63  ;;  %v2373_v32 = vrot.slane %v2369_v63, 4 }
 0x1ea   : > { %2444 = vst [vmem:[#allocation3 + $0x8] sm:$0xf] %v2443_v53  ;;  %2447 = vst [vmem:[#allocation3 + $0xc] sm:$0x1] %v2446_v43  ;;  %v5512_v54 = vpack.c.bf16 %v2320_v60, %v2320_v60  ;;  %v2321_v56 = vmul.f32 %v2313_v29, %v2289_v62  ;;  %6431 = verf.f32 %v2300_v6  ;;  %v2301_v35 = vmul.f32 0.70710677, %v2285_v52 }
 0x1eb   : > { %v2449_v51 = vsel %vm6595_vm11, %v2372_v26, %v2448_v49  ;;  %v2452_v57 = vsel %vm6533_vm3, %v2373_v32, %v2451_v46  ;;  %v2293_v38 = vmul.f32 0.5, %v2285_v52  ;;  %v2466_v49 = vld [vmem:[#allocation3 + $0x28] sm:$0xf]  ;;  %v2469_v53 = vld [vmem:[#allocation3 + $0x2c] sm:$0x1] }
 0x1ec   : > { %v6428_v0 = vpop.eup %6427  ;;  %2450 = vst [vmem:[#allocation3 + $0x10] sm:$0xf] %v2449_v51  ;;  %2453 = vst [vmem:[#allocation3 + $0x14] sm:$0x1] %v2452_v57  ;;  %v2375_v2 = vshrl.u32 %v5512_v54, 16  ;;  %v5513_v3 = vpack.c.bf16 %v2321_v56, %v2321_v56  ;;  %6433 = verf.f32 %v2301_v35  ;;  %v2378_v44 = vshll.u32 %v5512_v54, 16 }
 0x1ed   : > { %v2314_v45 = vadd.f32 1.0, %v6428_v0  ;;  %v2472_v0 = vld [vmem:[#allocation3 + $0x30] sm:$0xf] }
 0x1ee   : > { %v6430_v12 = vpop.eup %6429  ;;  %v2377_v16 = vrot.slane %v2375_v2, 7  ;;  %v2383_v17 = vshrl.u32 %v5513_v3, 16  ;;  %v2386_v27 = vshll.u32 %v5513_v3, 16  ;;  %v2475_v2 = vld [vmem:[#allocation3 + $0x34] sm:$0x1] }
 0x1ef   : > { %v2322_v21 = vmul.f32 %v2314_v45, %v2290_v11  ;;  %v2315_v15 = vadd.f32 1.0, %v6430_v12 }
 0x1f0   : > { %v2380_v9 = vor.u32 %v2378_v44, %v2377_v16  ;;  %v2381_v58 = vrot.slane %v2377_v16, 4  ;;  %v2385_v47 = vrot.slane %v2383_v17, 7 }
 0x1f1   : > { %v5514_v31 = vpack.c.bf16 %v2322_v21, %v2322_v21  ;;  %v2323_v36 = vmul.f32 %v2315_v15, %v2291_v22  ;;  %v2491_v13 = vld [vmem:[#allocation3 + $0x8] sm:$0xf] }
 0x1f2   : > { %v2455_v14 = vsel %vm6595_vm11, %v2380_v9, %v2454_v8  ;;  %v2458_v19 = vsel %vm6533_vm3, %v2381_v58, %v2457_v18  ;;  %v2388_v41 = vor.u32 %v2386_v27, %v2385_v47  ;;  %v2389_v24 = vrot.slane %v2385_v47, 4  ;;  %v7267_v9 = vld [vmem:[#allocation3 + $0xc] sm:$0x1] }
 0x1f3   : > { %2456 = vst [vmem:[#allocation3 + $0x18] sm:$0xf] %v2455_v14  ;;  %2459 = vst [vmem:[#allocation3 + $0x1c] sm:$0x1] %v2458_v19  ;;  %v2391_v42 = vshrl.u32 %v5514_v31, 16  ;;  %v2394_v10 = vshll.u32 %v5514_v31, 16  ;;  %v5515_v23 = vpack.c.bf16 %v2323_v36, %v2323_v36  ;;  %v5255_v46 = vcombine.low %v7209_v5, %v2491_v13 }
 0x1f4   : > { %v2537_v59 = vshrl.u32 %v2491_v13, 16  ;;  %v7254_v34 = vld [vmem:[#allocation3 + $0x10] sm:$0xf]  ;;  %v6432_v61 = vpop.eup %6431  ;;  %v2461_v33 = vsel %vm6595_vm11, %v2388_v41, %v2460_v30  ;;  %v2464_v63 = vsel %vm6533_vm3, %v2389_v24, %v2463_v7  ;;  %v2540_v60 = vshll.u32 %v2491_v13, 16  ;;  %v2478_v14 = vld [vmem:[#allocation3 + $0x38] sm:$0xf] }
 0x1f5   : > { %2462 = vst [vmem:[#allocation3 + $0x20] sm:$0xf] %v2461_v33  ;;  %2465 = vst [vmem:[#allocation3 + $0x24] sm:$0x1] %v2464_v63  ;;  %v2393_v62 = vrot.slane %v2391_v42, 7  ;;  %v2399_v29 = vshrl.u32 %v5515_v23, 16  ;;  %5918 = vmatprep.mubr.bf16.mxu0 %v5255_v46  ;;  %v2535_v58 = vsel %vm6673_vm0, %v7242_v4, %v7245_v50 }
 0x1f6   : > { %v2402_v6 = vshll.u32 %v5515_v23, 16  ;;  %v2316_v52 = vadd.f32 1.0, %v6432_v61  ;;  %v2539_v43 = vrot.slane %v2537_v59, 4  ;;  %v2542_v26 = vrot.slane %v2540_v60, 5  ;;  %v6434_v56 = vpop.eup %6433  ;;  %v6345_v24 = vld [vmem:[%s7762_s3 + $0x88] sm:$0xff]  }
 0x1f7   : > { %v2551_v32 = vshrl.u32 %v7254_v34, 16  ;;  %v2554_v54 = vshll.u32 %v7254_v34, 16  ;;  %v2396_v51 = vor.u32 %v2394_v10, %v2393_v62  ;;  %v2397_v57 = vrot.slane %v2393_v62, 4  ;;  %v7284_v42 = vld [vmem:[#allocation3 + $0x14] sm:$0x1] }
 0x1f8   : > { %v2401_v35 = vrot.slane %v2399_v29, 7  ;;  %v2324_v5 = vmul.f32 %v2316_v52, %v2292_v37  ;;  %v2317_v3 = vadd.f32 1.0, %v6434_v56  ;;  %v2543_v11 = vor.u32 %v2542_v26, %v2539_v43  ;;  %v2481_v23 = vld [vmem:[#allocation3 + $0x3c] sm:$0x1]  ;;  %v2487_v60 = vld [vmem:[#allocation3 + $0x44] sm:$0x1] }
 0x1f9   : > { %v2553_v45 = vrot.slane %v2551_v32, 4  ;;  %v2556_v12 = vrot.slane %v2554_v54, 5  ;;  %v2467_v16 = vsel %vm6595_vm11, %v2396_v51, %v2466_v49  ;;  %v2470_v44 = vsel %vm6533_vm3, %v2397_v57, %v2469_v53  ;;  %v2484_v49 = vld [vmem:[#allocation3 + $0x40] sm:$0xf]  ;;  %v6347_v54 = vld [vmem:[%s7762_s3 + $0x90] sm:$0xff]  }
 0x1fa   : > { %v2404_v8 = vor.u32 %v2402_v6, %v2401_v35  ;;  %v2405_v17 = vrot.slane %v2401_v35, 4  ;;  %2468 = vst [vmem:[#allocation3 + $0x28] sm:$0xf] %v2467_v16  ;;  %2471 = vst [vmem:[#allocation3 + $0x2c] sm:$0x1] %v2470_v44  ;;  %v5516_v18 = vpack.c.bf16 %v2324_v5, %v2324_v5  ;;  %v2325_v21 = vmul.f32 %v2317_v3, %v2293_v38  ;;  %v6349_v16 = vld [vmem:[%s7762_s3 + $0x98] sm:$0xff]  }
 0x1fb   : > { %v2493_v22 = vld [vmem:[#allocation3 + $0x18] sm:$0xf]  ;;  %v2557_v15 = vor.u32 %v2556_v12, %v2553_v45  ;;  %v2544_v38 = vrot.slane %v2543_v11, 4  ;;  %v2546_v41 = vshll.u32 %v7267_v9, 16  ;;  %v7291_v53 = vld [vmem:[#allocation3 + $0x1c] sm:$0x1] }
 0x1fc   : > { %v2473_v47 = vsel %vm6595_vm11, %v2404_v8, %v2472_v0  ;;  %v2476_v27 = vsel %vm6533_vm3, %v2405_v17, %v2475_v2  ;;  %v2565_v30 = vshrl.u32 %v2493_v22, 16  ;;  %v2568_v7 = vshll.u32 %v2493_v22, 16  ;;  %v7277_v13 = vld [vmem:[#allocation3 + $0x20] sm:$0xf]  ;;  %v7303_v2 = vld [vmem:[#allocation3 + $0x24] sm:$0x1] }
 0x1fd   : > { %2474 = vst [vmem:[#allocation3 + $0x30] sm:$0xf] %v2473_v47  ;;  %2477 = vst [vmem:[#allocation3 + $0x34] sm:$0x1] %v2476_v27  ;;  %v2407_v31 = vshrl.u32 %v5516_v18, 16  ;;  %v2410_v36 = vshll.u32 %v5516_v18, 16  ;;  %v5517_v37 = vpack.c.bf16 %v2325_v21, %v2325_v21  ;;  %v5256_v19 = vcombine.low %v7254_v34, %v2493_v22 }
 0x1fe   : > { %v2567_v4 = vrot.slane %v2565_v30, 4  ;;  %v2570_v50 = vrot.slane %v2568_v7, 5  ;;  %v7286_v61 = vrot.slane %v2557_v15, 4  ;;  %v2579_v33 = vshrl.u32 %v7277_v13, 16  ;;  %v2918_v15 = vld [vmem:[#allocation3 + $0x8] sm:$0xe] }
 0x1ff   : > { %v2409_v10 = vrot.slane %v2407_v31, 7  ;;  %v2415_v59 = vshrl.u32 %v5517_v37, 16  ;;  %v2418_v63 = vshll.u32 %v5517_v37, 16  ;;  %5919 = vmatmul.mubr.bf16.vlgmr.msra.gmra.mrb[0].mxu0 %v5256_v19  ;;  %v2548_v34 = vrot.slane %v2546_v41, 5 }
 0x200   : > { %v2571_v46 = vor.u32 %v2570_v50, %v2567_v4  ;;  %v2582_v62 = vshll.u32 %v7277_v13, 16  ;;  %5927 = vmatpush3.bf16.msra.mxu0 %v7183_v48  ;;  %v2560_v43 = vshll.u32 %v7284_v42, 16  ;;  %v2581_v51 = vrot.slane %v2579_v33, 4 }
 0x201   : > { %v2412_v29 = vor.u32 %v2410_v36, %v2409_v10  ;;  %v2413_v6 = vrot.slane %v2409_v10, 4  ;;  %v2417_v52 = vrot.slane %v2415_v59, 7  ;;  %v2549_v32 = vsel %vm6673_vm0, %v2544_v38, %v2548_v34  ;;  %5928 = vmatprep.subr.bf16.mxu0 %v6345_v24  ;;  %v2495_v56 = vld [vmem:[#allocation3 + $0x28] sm:$0xf]  ;;  %v7309_v8 = vld [vmem:[#allocation3 + $0x2c] sm:$0x1] }
 0x202   : > { %v2572_v26 = vrot.slane %v2571_v46, 4  ;;  %v2584_v57 = vrot.slane %v2582_v62, 5  ;;  %v5243_v3 = vcombine.low %v2535_v58, %v2549_v32  ;;  %v2593_v11 = vshrl.u32 %v2495_v56, 16  ;;  %v6350_v10 = vld [vmem:[%s7762_s3 + $0xa0] sm:$0xff]  }
 0x203   : > { %v2479_v35 = vsel %vm6595_vm11, %v2412_v29, %v2478_v14  ;;  %v2482_v48 = vsel %vm6533_vm3, %v2413_v6, %v2481_v23  ;;  %v2420_v0 = vor.u32 %v2418_v63, %v2417_v52  ;;  %v2421_v5 = vrot.slane %v2417_v52, 4 }
 0x204   : > { %2480 = vst [vmem:[#allocation3 + $0x38] sm:$0xf] %v2479_v35  ;;  %2483 = vst [vmem:[#allocation3 + $0x3c] sm:$0x1] %v2482_v48  ;;  %v2596_v45 = vshll.u32 %v2495_v56, 16  ;;  %v5257_v12 = vcombine.low %v7277_v13, %v2495_v56  ;;  %5929 = vmatpush3.bf16.msra.mxu0 %v6345_v24  ;;  %v2562_v21 = vrot.slane %v2560_v43, 5  ;;  %5894 = vmatprep.mubr.bf16.mxu1 %v5243_v3 }
 0x205   : > { %v2496_v44 = vld [vmem:[#allocation3 + $0x30] sm:$0xf]  ;;  %v2485_v17 = vsel %vm6595_vm11, %v2420_v0, %v2484_v49  ;;  %v2488_v18 = vsel %vm6533_vm3, %v2421_v5, %v2487_v60  ;;  %v2574_v22 = vshll.u32 %v7291_v53, 16  ;;  %5930 = vmatprep.subr.bf16.mxu0 %v6347_v54  ;;  %v2595_v58 = vrot.slane %v2593_v11, 4  ;;  %vm7323_vm3 = vmor %vm2941_vm1, %vm2942_vm2  ;;  %v7333_v33 = vld [vmem:[#allocation3 + $0x34] sm:$0x1] }
 0x206   : > { %2486 = vst [vmem:[#allocation3 + $0x40] sm:$0xf] %v2485_v17  ;;  %2489 = vst [vmem:[#allocation3 + $0x44] sm:$0x1] %v2488_v18  ;;  %v2598_v47 = vrot.slane %v2596_v45, 5  ;;  %v2607_v27 = vshrl.u32 %v2496_v44, 16  ;;  %5922 = vmatprep.mubr.bf16.mxu0 %v5257_v12  ;;  %v2585_v40 = vor.u32 %v2584_v57, %v2581_v51  ;;  %v2563_v36 = vsel %vm6673_vm0, %v7286_v61, %v2562_v21 }
 0x207   : > { %v2610_v30 = vshll.u32 %v2496_v44, 16  ;;  %v2576_v7 = vrot.slane %v2574_v22, 5  ;;  %v2588_v31 = vshll.u32 %v7303_v2, 16  ;;  %v2602_v1 = vshll.u32 %v7309_v8, 16  ;;  %v6353_v51 = vld [vmem:[%s7762_s3 + $0xb0] sm:$0xff]   ;;  %v6354_v12 = vld [vmem:[%s7762_s3 + $0xb8] sm:$0xff]  }
 0x208   : > { %v2609_v37 = vrot.slane %v2607_v27, 4  ;;  %v2599_v13 = vor.u32 %v2598_v47, %v2595_v58  ;;  %5931 = vmatpush3.bf16.msra.mxu0 %v6347_v54  ;;  %v2586_v50 = vrot.slane %v2585_v40, 4  ;;  %v5268_v41 = vrot.slane %v2918_v15, 9  ;;  %v2920_v3 = vld [vmem:[#allocation3 + $0x18] sm:$0xe]  ;;  %v6355_v47 = vld [vmem:[%s7762_s3 + $0xc0] sm:$0xff]  }
 0x209   : > { %v2612_v38 = vrot.slane %v2610_v30, 5  ;;  %v2577_v4 = vsel %vm6673_vm0, %v2572_v26, %v2576_v7  ;;  %v2590_v19 = vrot.slane %v2588_v31, 5  ;;  %5932 = vmatprep.subr.bf16.mxu0 %v6349_v16  ;;  %v2604_v59 = vrot.slane %v2602_v1, 5  ;;  %v6352_v26 = vld [vmem:[%s7762_s3 + $0xa8] sm:$0xff]   ;;  %v2921_v18 = vld [vmem:[#allocation3 + $0x20] sm:$0xe] }
 0x20a   : > { %v5244_v24 = vcombine.low %v2563_v36, %v2577_v4  ;;  %v2600_v23 = vrot.slane %v2599_v13, 4  ;;  %v2950_v61 = vrot.slane %v7267_v9, 5  ;;  %v2947_v60 = vsel %vm7323_vm3, %v5267_v20, %v2946_v25  ;;  %v2922_v45 = vld [vmem:[#allocation3 + $0x28] sm:$0xe]  ;;  %v2923_v1 = vld [vmem:[#allocation3 + $0x30] sm:$0xe] }
 0x20b   : > { %v2497_v63 = vld [vmem:[#allocation3 + $0x38] sm:$0xf]  ;;  %v2591_v49 = vsel %vm6673_vm0, %v2586_v50, %v2590_v19  ;;  %v7343_v46 = vld [vmem:[#allocation3 + $0x3c] sm:$0x1]  ;;  %v2613_v34 = vor.u32 %v2612_v38, %v2609_v37  ;;  %v2616_v55 = vshll.u32 %v7333_v33, 16  ;;  %v2958_v17 = vrot.slane %v7291_v53, 5 }
 0x20c   : > { %5895 = vmatmul.mubr.bf16.vlgmr.msra.gmra.mrb[96].mxu1 %v5244_v24  ;;  %v2621_v62 = vshrl.u32 %v2497_v63, 16  ;;  %v2624_v29 = vshll.u32 %v2497_v63, 16  ;;  %v5258_v9 = vcombine.low %v2496_v44, %v2497_v63  ;;  %v2605_v6 = vsel %vm6673_vm0, %v2600_v23, %v2604_v59  ;;  %5933 = vmatpush3.bf16.msra.mxu0 %v6349_v16  ;;  %v2919_v16 = vld [vmem:[#allocation3 + $0x10] sm:$0xe]  ;;  %v2924_v40 = vld [vmem:[#allocation3 + $0x38] sm:$0xe] }
 0x20d   : > { %v5245_v52 = vcombine.low %v2591_v49, %v2605_v6  ;;  %v2951_v39 = vsel %vm7323_vm3, %v5268_v41, %v2950_v61  ;;  %5934 = vmatprep.subr.bf16.mxu0 %v6350_v10  ;;  %v2630_v32 = vshll.u32 %v7343_v46, 16  ;;  %v2614_v54 = vrot.slane %v2613_v34, 4  ;;  %v6357_v50 = vld [vmem:[%s7762_s3 + $0xd0] sm:$0xff]   ;;  %v6360_v59 = vld [vmem:[%s7762_s3 + $0xe0] sm:$0xff]   ;;  %v6361_v61 = vld [vmem:[%s7762_s3 + $0xe8] sm:$0xff]  }
 0x20e   : > { %v2623_v43 = vrot.slane %v2621_v62, 4  ;;  %v2626_v20 = vrot.slane %v2624_v29, 5  ;;  %5923 = vmatmul.mubr.bf16.gmra.mrb[4].mxu0 %v5258_v9  ;;  %v5291_v25 = vcombine.low %v2947_v60, %v2951_v39  ;;  %v2618_v57 = vrot.slane %v2616_v55, 5  ;;  %v6358_v23 = vld [vmem:[#allocation3 + $0x8] ss:$8 sps:$4 sm:$0xff]   ;;  %v6363_v34 = vld [vmem:[%s7762_s3 + $0xf8] sm:$0xff]  }
 0x20f   : > { %5898 = vmatprep.mubr.bf16.mxu1 %v5245_v52  ;;  %v2632_v48 = vrot.slane %v2630_v32, 5  ;;  %v5270_v44 = vrot.slane %v2920_v3, 9  ;;  %v5272_v21 = vrot.slane %v2922_v45, 9  ;;  %v2966_v22 = vrot.slane %v7309_v8, 5  ;;  %v6362_v63 = vld [vmem:[%s7762_s3 + $0xf0] sm:$0xff]   ;;  %v6365_v52 = vld [vmem:[%s7762_s3 + $0x100] sm:$0xff]  }
 0x210   : > { %5942 = vmatprep.mubr.bf16.mxu0 %v5291_v25  ;;  %v2627_v56 = vor.u32 %v2626_v20, %v2623_v43  ;;  %5935 = vmatpush3.bf16.msra.mxu0 %v6350_v10  ;;  %v2619_v0 = vsel %vm6673_vm0, %v2614_v54, %v2618_v57  ;;  %v5269_v15 = vrot.slane %v2919_v16, 9  ;;  %v2954_v58 = vrot.slane %v7284_v42, 5  ;;  %v6359_v10 = vld [vmem:[%s7762_s3 + $0xd8] sm:$0xff]   ;;  %v3300_v49 = vld [vmem:[#allocation3 + $0x8] sm:$0xf] }
 0x211   : > { %5936 = vmatprep.subr.bf16.mxu0 %v6352_v26  ;;  %v5271_v27 = vrot.slane %v2921_v18, 9  ;;  %v2962_v30 = vrot.slane %v7303_v2, 5  ;;  %v2959_v7 = vsel %vm7323_vm3, %v5270_v44, %v2958_v17  ;;  %v2967_v53 = vsel %vm7323_vm3, %v5272_v21, %v2966_v22  ;;  %v6356_v2 = vld [vmem:[%s7762_s3 + $0xc8] sm:$0xff]   ;;  %v7409_v43 = vld [vmem:[#allocation3 + $0x14] sm:$0x1]  ;;  %v6370_v16 = vld [vmem:[%s7762_s3 + $0x118] sm:$0xff]  }
 0x212   : > { %v2628_v35 = vrot.slane %v2627_v56, 4  ;;  %v2955_v8 = vsel %vm7323_vm3, %v5269_v15, %v2954_v58  ;;  %v5274_v37 = vrot.slane %v2924_v40, 9  ;;  %v2974_v38 = vrot.slane %v7343_v46, 5  ;;  %v7411_v25 = vld [vmem:[#allocation3 + $0xc] sm:$0x1]  ;;  %v6371_v21 = vld [vmem:[%s7762_s3 + $0x120] sm:$0xff]  }
 0x213   : > { %v5292_v42 = vcombine.low %v2955_v8, %v2959_v7  ;;  %v2963_v31 = vsel %vm7323_vm3, %v5271_v27, %v2962_v30  ;;  %v5273_v13 = vrot.slane %v2923_v1, 9  ;;  %v2970_v4 = vrot.slane %v7333_v33, 5  ;;  %v3302_v33 = vld [vmem:[#allocation3 + $0x10] sm:$0xf]  ;;  %v6367_v32 = vld [vmem:[%s7762_s3 + $0x108] sm:$0xff]  }
 0x214   : > { %v2633_v5 = vsel %vm6673_vm0, %v2628_v35, %v2632_v48  ;;  %5937 = vmatpush3.bf16.msra.mxu0 %v6352_v26  ;;  %v5293_v36 = vcombine.low %v2963_v31, %v2967_v53  ;;  %v2975_v19 = vsel %vm7323_vm3, %v5274_v37, %v2974_v38  ;;  %v3331_v60 = vshrl.u32 %v3302_v33, 16  ;;  %v6364_v26 = vld [vmem:[#allocation3 + $0x18] ss:$8 sps:$4 sm:$0xff]   ;;  %v6369_v48 = vld [vmem:[%s7762_s3 + $0x110] sm:$0xff]   ;;  %v6372_v40 = vld [vmem:[%s7762_s3 + $0x128] sm:$0xff]  }
 0x215   : > { %v5246_v11 = vcombine.low %v2619_v0, %v2633_v5  ;;  %5938 = vmatprep.subr.bf16.mxu0 %v6353_v51  ;;  %v2971_v41 = vsel %vm7323_vm3, %v5273_v13, %v2970_v4  ;;  %v3334_v46 = vshll.u32 %v3302_v33, 16  ;;  %v3317_v62 = vshrl.u32 %v3300_v49, 16  ;;  %v6368_v45 = vld [vmem:[#allocation3 + $0x38] ss:$8 sps:$4 sm:$0xff]   ;;  %v3310_v18 = vld [vmem:[#allocation3 + $0x30] sm:$0xf] }
 0x216   : > { %v5294_v24 = vcombine.low %v2971_v41, %v2975_v19  ;;  %v3320_v29 = vshll.u32 %v3300_v49, 16  ;;  %v3333_v9 = vrot.slane %v3331_v60, 4  ;;  %v3340_v56 = vshll.u32 %v7409_v43, 16  ;;  %v3306_v17 = vld [vmem:[#allocation3 + $0x20] sm:$0xf]  ;;  %v6373_v38 = vld [vmem:[%s7762_s3 + $0x130] sm:$0xff]  }
 0x217   : > { %5899 = vmatmul.mubr.bf16.gmra.mrb[100].mxu1 %v5246_v11  ;;  %v3336_v6 = vrot.slane %v3334_v46, 5  ;;  %v3319_v39 = vrot.slane %v3317_v62, 4  ;;  %v3326_v57 = vshll.u32 %v7411_v25, 16  ;;  %v3304_v22 = vld [vmem:[#allocation3 + $0x18] sm:$0xf]  ;;  %v3359_v15 = vshrl.u32 %v3306_v17, 16 }
 0x218   : > { %5939 = vmatpush3.bf16.msra.mxu0 %v6353_v51  ;;  %v3322_v55 = vrot.slane %v3320_v29, 5  ;;  %v6366_v51 = vld [vmem:[#allocation3 + $0x28] ss:$8 sps:$4 sm:$0xff]   ;;  %v3342_v5 = vrot.slane %v3340_v56, 5  ;;  %v3362_v58 = vshll.u32 %v3306_v17, 16  ;;  %v3387_v27 = vshrl.u32 %v3310_v18, 16 }
 0x219   : > { %5940 = vmatprep.subr.bf16.mxu0 %v6354_v12  ;;  %v3337_v20 = vor.u32 %v3336_v6, %v3333_v9  ;;  %v3328_v3 = vrot.slane %v3326_v57, 5  ;;  %v3390_v30 = vshll.u32 %v3310_v18, 16  ;;  %v3345_v7 = vshrl.u32 %v3304_v22, 16  ;;  %v3314_v37 = vld [vmem:[#allocation3 + $0x40] sm:$0xf]  ;;  %v6410_v9 = vld [vmem:[%s7764_s5 + $0x8] sm:$0xff]  }
 0x21a   : > { %v3323_v54 = vor.u32 %v3322_v55, %v3319_v39  ;;  %v3348_v53 = vshll.u32 %v3304_v22, 16  ;;  %v3361_v31 = vrot.slane %v3359_v15, 4  ;;  %v3389_v1 = vrot.slane %v3387_v27, 4  ;;  %v7440_v19 = vld [vmem:[#allocation3 + $0x24] sm:$0x1]  ;;  %v6374_v6 = vld [vmem:[%s7762_s3 + $0x138] sm:$0xff]  }
 0x21b   : > { %v3338_v35 = vrot.slane %v3337_v20, 4  ;;  %v3347_v13 = vrot.slane %v3345_v7, 4  ;;  %v3418_v33 = vshll.u32 %v3314_v37, 16  ;;  %v3368_v46 = vshll.u32 %v7440_v19, 16  ;;  %v6376_v7 = vld [vmem:[%s7762_s3 + $0x148] sm:$0xff]  }
 0x21c   : > { %5941 = vmatpush3.bf16.msra.mxu0 %v6354_v12  ;;  %v3324_v0 = vrot.slane %v3323_v54, 4  ;;  %v3350_v4 = vrot.slane %v3348_v53, 5 }
 0x21d   : > { %5950 = vmatprep.subr.bf16.mxu0 %v6355_v47  ;;  %v3343_v11 = vsel %vm6673_vm0, %v3338_v35, %v3342_v5  ;;  %v3370_v57 = vrot.slane %v3368_v46, 5  ;;  %v6375_v5 = vld [vmem:[%s7762_s3 + $0x140] sm:$0xff]  }
 0x21e   : > { %v3329_v12 = vsel %vm6673_vm0, %v3324_v0, %v3328_v3  ;;  %v3351_v60 = vor.u32 %v3350_v4, %v3347_v13  ;;  %v6412_v0 = vld [vmem:[%s7764_s5 + $0x10] sm:$0xff]   ;;  %v3608_v4 = vrot.slane %v7411_v25, 5 }
 0x21f   : > { %5943 = vmatmul.mubr.bf16.vlgmr.msra.gmra.mrb[0].mxu0 %v5292_v42  ;;  %v5347_v44 = vcombine.low %v3329_v12, %v3343_v11 }
 0x220   : > { %5946 = vmatprep.mubr.bf16.mxu0 %v5293_v36  ;;  %5951 = vmatpush3.bf16.msra.mxu0 %v6355_v47  ;;  %v3308_v47 = vld [vmem:[#allocation3 + $0x28] sm:$0xf]  ;;  %v3392_v36 = vrot.slane %v3390_v30, 5 }
 0x221   : > { %5952 = vmatprep.subr.bf16.mxu0 %v6356_v2  ;;  %v3373_v8 = vshrl.u32 %v3308_v47, 16  ;;  %v3376_v42 = vshll.u32 %v3308_v47, 16  ;;  %v3583_v47 = vld [vmem:[#allocation3 + $0x10] sm:$0xe] }
 0x222   : > { %v3393_v49 = vor.u32 %v3392_v36, %v3389_v1 }
 0x223   : > { %v3375_v41 = vrot.slane %v3373_v8, 4 }
 0x224   : > { %5953 = vmatpush3.bf16.msra.mxu0 %v6356_v2  ;;  %v3364_v2 = vrot.slane %v3362_v58, 5  ;;  %v3394_v56 = vrot.slane %v3393_v49, 4  ;;  %v3584_v49 = vld [vmem:[#allocation3 + $0x18] sm:$0xe] }
 0x225   : > { %5954 = vmatprep.subr.bf16.mxu0 %v6357_v50 }
 0x227   : > { %5947 = vmatmul.mubr.bf16.gmra.mrb[4].mxu0 %v5294_v24  ;;  %v3378_v24 = vrot.slane %v3376_v42, 5  ;;  %v3582_v42 = vld [vmem:[#allocation3 + $0x8] sm:$0xe] }
 0x228   : > { %5955 = vmatpush3.bf16.msra.mxu0 %v6357_v50  ;;  %5966 = vmatprep.mubr.bf16.mxu0 %v6358_v23  ;;  %v6408_v50 = vld [vmem:[%s7764_s5] sm:$0xff]   ;;  %v3365_v23 = vor.u32 %v3364_v2, %v3361_v31  ;;  %v5360_v31 = vrot.slane %v3583_v47, 9  ;;  %v3612_v2 = vrot.slane %v7409_v43, 5  ;;  %v5359_v13 = vrot.slane %v3582_v42, 9  ;;  %v4515_v47 = vld [vmem:[#allocation2 + $0xb8] sm:$0x1] }
 0x229   : > { %5956 = vmatprep.subr.bf16.mxu0 %v6359_v10  ;;  %6094 = vmatprep.subr.bf16.mxu1 %v6408_v50  ;;  %v6415_v43 = vld [vmem:[%s7764_s5 + $0x20] sm:$0xff]  }
 0x22a   : > { %6095 = vmatpush3.bf16.msra.mxu1 %v6408_v50  ;;  %v3366_v20 = vrot.slane %v3365_v23, 4  ;;  %v3585_v23 = vld [vmem:[#allocation3 + $0x20] sm:$0xe] }
 0x22b   : > { %6096 = vmatprep.subr.bf16.mxu1 %v6410_v9 }
 0x22c   : > { %5957 = vmatpush3.bf16.msra.mxu0 %v6359_v10  ;;  %v3312_v10 = vld [vmem:[#allocation3 + $0x38] sm:$0xf] }
 0x22d   : > { %5958 = vmatprep.subr.bf16.mxu0 %v6360_v59  ;;  %v3401_v62 = vshrl.u32 %v3312_v10, 16  ;;  %v3404_v29 = vshll.u32 %v3312_v10, 16 }
 0x22e   : > { %6097 = vmatpush3.bf16.msra.mxu1 %v6410_v9  ;;  %v3586_v9 = vld [vmem:[#allocation3 + $0x28] sm:$0xe] }
 0x22f   : > { %v3403_v35 = vrot.slane %v3401_v62, 4  ;;  %6098 = vmatprep.subr.bf16.mxu1 %v6412_v0  ;;  %v5362_v62 = vrot.slane %v3585_v23, 9  ;;  %v4519_v23 = vld [vmem:[#allocation2 + $0xd8] sm:$0x1] }
 0x230   : > { %5959 = vmatpush3.bf16.msra.mxu0 %v6360_v59  ;;  %v7442_v59 = vld [vmem:[#allocation3 + $0x34] sm:$0x1] }
 0x231   : > { %5960 = vmatprep.subr.bf16.mxu0 %v6361_v61  ;;  %v3396_v39 = vshll.u32 %v7442_v59, 16 }
 0x232   : > { %6099 = vmatpush3.bf16.msra.mxu1 %v6412_v0  ;;  %v4511_v0 = vld [vmem:[#allocation2 + $0x98] sm:$0x1] }
 0x233   : > { %v3398_v11 = vrot.slane %v3396_v39, 5 }
 0x234   : > { %5961 = vmatpush3.bf16.msra.mxu0 %v6361_v61  ;;  %v3415_v61 = vshrl.u32 %v3314_v37, 16  ;;  %v6414_v37 = vld [vmem:[%s7764_s5 + $0x18] sm:$0xff]  }
 0x235   : > { %5962 = vmatprep.subr.bf16.mxu0 %v6362_v63  ;;  %v3399_v18 = vsel %vm6673_vm0, %v3394_v56, %v3398_v11  ;;  %6100 = vmatprep.subr.bf16.mxu1 %v6414_v37 }
 0x236   : > { %6101 = vmatpush3.bf16.msra.mxu1 %v6414_v37 }
 0x237   : > { %6102 = vmatprep.subr.bf16.mxu1 %v6415_v43 }
 0x238   : > { %5963 = vmatpush3.bf16.msra.mxu0 %v6362_v63  ;;  %v7444_v63 = vld [vmem:[#allocation3 + $0x1c] sm:$0x1] }
 0x239   : > { %5964 = vmatprep.subr.bf16.mxu0 %v6363_v34  ;;  %v3354_v55 = vshll.u32 %v7444_v63, 16  ;;  %v3616_v39 = vrot.slane %v7444_v63, 5 }
 0x23a   : > { %6103 = vmatpush3.bf16.msra.mxu1 %v6415_v43  ;;  %v4518_v43 = vld [vmem:[#allocation2 + $0xd0] sm:$0xf] }
 0x23b   : > { %v3356_v12 = vrot.slane %v3354_v55, 5  ;;  %v7510_v55 = vld [vmem:[#allocation3 + $0x40] sm:$0xe] }
 0x23c   : > { %5965 = vmatpush3.bf16.msra.mxu0 %v6363_v34  ;;  %v7447_v34 = vld [vmem:[#allocation3 + $0x2c] sm:$0x1] }
 0x23d   : > { %5974 = vmatprep.subr.bf16.mxu0 %v6365_v52  ;;  %v3382_v54 = vshll.u32 %v7447_v34, 16 }
 0x23f   : > { %5967 = vmatmul.mubr.bf16.vlgmr.msra.gmra.mrb[0].mxu0 %v6364_v26  ;;  %v3417_v26 = vrot.slane %v3415_v61, 4  ;;  %v3384_v17 = vrot.slane %v3382_v54, 5  ;;  %v3609_v61 = vsel %vm7323_vm3, %v5359_v13, %v3608_v4  ;;  %v6380_v54 = vld [vmem:[%s7762_s3 + $0x168] sm:$0xff]  }
 0x240   : > { %5970 = vmatprep.mubr.bf16.mxu0 %v6366_v51  ;;  %5975 = vmatpush3.bf16.msra.mxu0 %v6365_v52  ;;  %v3379_v52 = vor.u32 %v3378_v24, %v3375_v41  ;;  %v3352_v51 = vrot.slane %v3351_v60, 4  ;;  %v3613_v24 = vsel %vm7323_vm3, %v5360_v31, %v3612_v2  ;;  %v6416_v60 = vld [vmem:[%s7764_s5 + $0x28] sm:$0xff]  }
 0x241   : > { %5976 = vmatprep.subr.bf16.mxu0 %v6367_v32  ;;  %v5383_v46 = vcombine.low %v3609_v61, %v3613_v24  ;;  %6104 = vmatprep.subr.bf16.mxu1 %v6416_v60  ;;  %v4517_v31 = vld [vmem:[#allocation2 + $0xc8] sm:$0x1] }
 0x242   : > { %v3380_v3 = vrot.slane %v3379_v52, 4  ;;  %v3357_v22 = vsel %vm6673_vm0, %v3352_v51, %v3356_v12  ;;  %v5361_v52 = vrot.slane %v3584_v49, 9  ;;  %v3628_v51 = vrot.slane %v7442_v59, 5  ;;  %6105 = vmatpush3.bf16.msra.mxu1 %v6416_v60  ;;  %v4520_v60 = vld [vmem:[#allocation2 + $0xe0] sm:$0xf] }
 0x243   : > { %v6383_v59 = vld [vmem:[%s7762_s3 + $0x180] sm:$0xff]  }
 0x244   : > { %5977 = vmatpush3.bf16.msra.mxu0 %v6367_v32  ;;  %v3420_v32 = vrot.slane %v3418_v33, 5  ;;  %v3385_v30 = vsel %vm6673_vm0, %v3380_v3, %v3384_v17  ;;  %v6378_v33 = vld [vmem:[%s7762_s3 + $0x158] sm:$0xff]   ;;  %v4513_v3 = vld [vmem:[#allocation2 + $0xa8] sm:$0x1] }
 0x245   : > { %5978 = vmatprep.subr.bf16.mxu0 %v6369_v48  ;;  %v5349_v53 = vcombine.low %v3385_v30, %v3399_v18 }
 0x247   : > { %5971 = vmatmul.mubr.bf16.gmra.mrb[4].mxu0 %v6368_v45  ;;  %v7464_v45 = vld [vmem:[#allocation3 + $0x44] sm:$0x1] }
 0x248   : > { %5979 = vmatpush3.bf16.msra.mxu0 %v6369_v48  ;;  %5990 = vmatprep.mubr.bf16.mxu0 %v5347_v44  ;;  %v3406_v48 = vrot.slane %v3404_v29, 5  ;;  %v3421_v44 = vor.u32 %v3420_v32, %v3417_v26  ;;  %v3424_v58 = vshll.u32 %v7464_v45, 16  ;;  %v3620_v29 = vrot.slane %v7440_v19, 5  ;;  %v6379_v19 = vld [vmem:[%s7762_s3 + $0x160] sm:$0xff]  }
 0x249   : > { %5980 = vmatprep.subr.bf16.mxu0 %v6370_v16  ;;  %v5363_v26 = vrot.slane %v3586_v9, 9  ;;  %v3624_v32 = vrot.slane %v7447_v34, 5  ;;  %v7534_v34 = vsel %vm7323_vm3, %v5361_v52, %v3616_v39  ;;  %v4583_v9 = vshrl.u32 %v4518_v43, 16  ;;  %v6382_v52 = vld [vmem:[%s7762_s3 + $0x178] sm:$0xff]  }
 0x24a   : > { %v3407_v15 = vor.u32 %v3406_v48, %v3403_v35  ;;  %v3422_v8 = vrot.slane %v3421_v44, 4  ;;  %v3426_v36 = vrot.slane %v3424_v58, 5  ;;  %v7524_v63 = vsel %vm7323_vm3, %v5362_v62, %v3620_v29  ;;  %v6418_v35 = vld [vmem:[%s7764_s5 + $0x38] sm:$0xff]   ;;  %v4510_v48 = vld [vmem:[#allocation2 + $0x90] sm:$0xf] }
 0x24b   : > { %v4527_v11 = vshrl.u32 %v4510_v48, 16  ;;  %v4530_v12 = vshll.u32 %v4510_v48, 16  ;;  %v5384_v17 = vcombine.low %v7534_v34, %v7524_v63  ;;  %v7540_v18 = vsel %vm7323_vm3, %v5363_v26, %v3624_v32  ;;  %v4514_v58 = vld [vmem:[#allocation2 + $0xb0] sm:$0xf] }
 0x24c   : > { %5981 = vmatpush3.bf16.msra.mxu0 %v6370_v16  ;;  %v3371_v16 = vsel %vm6673_vm0, %v3366_v20, %v3370_v57  ;;  %v3408_v1 = vrot.slane %v3407_v15, 4  ;;  %v3427_v41 = vsel %vm6673_vm0, %v3422_v8, %v3426_v36  ;;  %v6417_v20 = vld [vmem:[%s7764_s5 + $0x30] sm:$0xff]   ;;  %v5366_v57 = vrot.slane %v7510_v55, 9  ;;  %v6387_v55 = vld [vmem:[%s7762_s3 + $0x198] sm:$0xff]  }
 0x24d   : > { %5982 = vmatprep.subr.bf16.mxu0 %v6371_v21  ;;  %v5348_v27 = vcombine.low %v3357_v22, %v3371_v16  ;;  %6106 = vmatprep.subr.bf16.mxu1 %v6417_v20  ;;  %v4536_v16 = vshll.u32 %v4511_v0, 16  ;;  %v4550_v15 = vshll.u32 %v4513_v3, 16  ;;  %v4532_v30 = vrot.slane %v4530_v12, 5  ;;  %v6381_v36 = vld [vmem:[%s7762_s3 + $0x170] sm:$0xff]  }
 0x24e   : > { %6107 = vmatpush3.bf16.msra.mxu1 %v6417_v20  ;;  %v4555_v2 = vshrl.u32 %v4514_v58, 16  ;;  %v4586_v26 = vshll.u32 %v4518_v43, 16  ;;  %v4592_v32 = vshll.u32 %v4519_v23, 16  ;;  %v4585_v48 = vrot.slane %v4583_v9, 4  ;;  %v6385_v9 = vld [vmem:[%s7762_s3 + $0x190] sm:$0xff]  }
 0x24f   : > { %6108 = vmatprep.subr.bf16.mxu1 %v6418_v35  ;;  %v4552_v42 = vrot.slane %v4550_v15, 5  ;;  %v4597_v0 = vshrl.u32 %v4520_v60, 16 }
 0x250   : > { %5983 = vmatpush3.bf16.msra.mxu0 %v6371_v21  ;;  %v7470_v21 = vld [vmem:[#allocation3 + $0x3c] sm:$0x1] }
 0x251   : > { %5984 = vmatprep.subr.bf16.mxu0 %v6372_v40  ;;  %v4599_v15 = vrot.slane %v4597_v0, 4 }
 0x252   : > { %6109 = vmatpush3.bf16.msra.mxu1 %v6418_v35 }
 0x254   : > { %5985 = vmatpush3.bf16.msra.mxu0 %v6372_v40  ;;  %v3410_v40 = vshll.u32 %v7470_v21, 16 }
 0x255   : > { %5986 = vmatprep.subr.bf16.mxu0 %v6373_v38 }
 0x256   : > { %v3412_v50 = vrot.slane %v3410_v40, 5  ;;  %v4516_v40 = vld [vmem:[#allocation2 + $0xc0] sm:$0xf] }
 0x257   : > { %v4569_v13 = vshrl.u32 %v4516_v40, 16  ;;  %v4572_v4 = vshll.u32 %v4516_v40, 16  ;;  %v4594_v40 = vrot.slane %v4592_v32, 5  ;;  %v6389_v32 = vld [vmem:[%s7762_s3 + $0x1a8] sm:$0xff]  }
 0x258   : > { %5987 = vmatpush3.bf16.msra.mxu0 %v6373_v38  ;;  %v6377_v38 = vld [vmem:[%s7762_s3 + $0x150] sm:$0xff]   ;;  %v3413_v10 = vsel %vm6673_vm0, %v3408_v1, %v3412_v50  ;;  %v4558_v1 = vshll.u32 %v4514_v58, 16  ;;  %v4600_v58 = vshll.u32 %v4520_v60, 16 }
 0x259   : > { %5988 = vmatprep.subr.bf16.mxu0 %v6374_v6  ;;  %v5350_v25 = vcombine.low %v3413_v10, %v3427_v41  ;;  %v4557_v41 = vrot.slane %v4555_v2, 4  ;;  %v4578_v10 = vshll.u32 %v4517_v31, 16  ;;  %v4574_v49 = vrot.slane %v4572_v4, 5 }
 0x25a   : > { %v4560_v24 = vrot.slane %v4558_v1, 5 }
 0x25b   : > { %v4580_v29 = vrot.slane %v4578_v10, 5 }
 0x25c   : > { %5989 = vmatpush3.bf16.msra.mxu0 %v6374_v6  ;;  %v7507_v6 = vld [vmem:[#allocation3 + $0x30] sm:$0xe]  ;;  %v4561_v62 = vor.u32 %v4560_v24, %v4557_v41  ;;  %v6384_v41 = vld [vmem:[%s7762_s3 + $0x188] sm:$0xff]   ;;  %v3636_v24 = vrot.slane %v7464_v45, 5 }
 0x25d   : > { %5998 = vmatprep.subr.bf16.mxu0 %v6375_v5  ;;  %v5364_v56 = vrot.slane %v7507_v6, 9 }
 0x25e   : > { %v3637_v63 = vsel %vm7323_vm3, %v5366_v57, %v3636_v24  ;;  %v6386_v57 = vld [vmem:[#allocation3 + $0x10] ss:$8 sps:$4 sm:$0xff]  }
 0x25f   : > { %5991 = vmatmul.mubr.bf16.vlgmr.msra.gmra.mrb[0].mxu0 %v5348_v27  ;;  %v4529_v27 = vrot.slane %v4527_v11, 4  ;;  %v3629_v3 = vsel %vm7323_vm3, %v5364_v56, %v3628_v51  ;;  %v4525_v51 = vld [vmem:[#allocation2 + $0x108] sm:$0x1] }
 0x260   : > { %5994 = vmatprep.mubr.bf16.mxu0 %v5349_v53  ;;  %5999 = vmatpush3.bf16.msra.mxu0 %v6375_v5  ;;  %v4512_v5 = vld [vmem:[#allocation2 + $0xa0] sm:$0xf]  ;;  %v4634_v43 = vshll.u32 %v4525_v51, 16 }
 0x261   : > { %6000 = vmatprep.subr.bf16.mxu0 %v6376_v7  ;;  %v4541_v44 = vshrl.u32 %v4512_v5, 16  ;;  %v4544_v22 = vshll.u32 %v4512_v5, 16  ;;  %v4533_v37 = vor.u32 %v4532_v30, %v4529_v27  ;;  %v4522_v5 = vld [vmem:[#allocation2 + $0xf0] sm:$0xf]  ;;  %v4524_v27 = vld [vmem:[#allocation2 + $0x100] sm:$0xf] }
 0x262   : > { %v4611_v30 = vshrl.u32 %v4522_v5, 16  ;;  %v4628_v4 = vshll.u32 %v4524_v27, 16 }
 0x263   : > { %v4543_v53 = vrot.slane %v4541_v44, 4  ;;  %v4546_v8 = vrot.slane %v4544_v22, 5  ;;  %v4523_v44 = vld [vmem:[#allocation2 + $0xf8] sm:$0x1] }
 0x264   : > { %6001 = vmatpush3.bf16.msra.mxu0 %v6376_v7  ;;  %v4538_v7 = vrot.slane %v4536_v16, 5  ;;  %v4588_v16 = vrot.slane %v4586_v26, 5  ;;  %v4613_v2 = vrot.slane %v4611_v30, 4  ;;  %v6388_v26 = vld [vmem:[%s7762_s3 + $0x1a0] sm:$0xff]  }
 0x265   : > { %6002 = vmatprep.subr.bf16.mxu0 %v6377_v38  ;;  %v4547_v50 = vor.u32 %v4546_v8, %v4543_v53  ;;  %v4602_v8 = vrot.slane %v4600_v58, 5 }
 0x266   : > { %v4589_v56 = vor.u32 %v4588_v16, %v4585_v48  ;;  %v3963_v48 = vld [vmem:[#allocation3 + $0x10] sm:$0xf] }
 0x267   : > { %5995 = vmatmul.mubr.bf16.gmra.mrb[4].mxu0 %v5350_v25  ;;  %v4534_v25 = vrot.slane %v4533_v37, 4  ;;  %v3588_v37 = vld [vmem:[#allocation3 + $0x38] sm:$0xe] }
 0x268   : > { %6003 = vmatpush3.bf16.msra.mxu0 %v6377_v38  ;;  %6014 = vmatprep.mubr.bf16.mxu0 %v5383_v46  ;;  %v4564_v38 = vshll.u32 %v4515_v47, 16  ;;  %v4548_v46 = vrot.slane %v4547_v50, 4  ;;  %v4590_v31 = vrot.slane %v4589_v56, 4  ;;  %v5385_v50 = vcombine.low %v7540_v18, %v3629_v3  ;;  %v6391_v3 = vld [vmem:[%s7762_s3 + $0x1b8] sm:$0xff]   ;;  %v6395_v56 = vld [vmem:[%s7762_s3 + $0x1c8] sm:$0xff]  }
 0x269   : > { %6004 = vmatprep.subr.bf16.mxu0 %v6378_v33  ;;  %v4539_v39 = vsel %vm6673_vm0, %v4534_v25, %v4538_v7  ;;  %v4614_v7 = vshll.u32 %v4522_v5, 16  ;;  %v5365_v60 = vrot.slane %v3588_v37, 9 }
 0x26a   : > { %v4566_v61 = vrot.slane %v4564_v38, 5  ;;  %v4553_v35 = vsel %vm6673_vm0, %v4548_v46, %v4552_v42  ;;  %v4620_v42 = vshll.u32 %v4523_v44, 16  ;;  %v4603_v38 = vor.u32 %v4602_v8, %v4599_v15  ;;  %v6397_v8 = vld [vmem:[%s7762_s3 + $0x1d0] sm:$0xff]  }
 0x26b   : > { %v5488_v11 = vcombine.low %v4539_v39, %v4553_v35  ;;  %v4616_v1 = vrot.slane %v4614_v7, 5  ;;  %v4595_v25 = vsel %vm6673_vm0, %v4590_v31, %v4594_v40  ;;  %v3632_v46 = vrot.slane %v7470_v21, 5  ;;  %v3965_v35 = vld [vmem:[#allocation3 + $0x18] sm:$0xf] }
 0x26c   : > { %6005 = vmatpush3.bf16.msra.mxu0 %v6378_v33  ;;  %v4571_v33 = vrot.slane %v4569_v13, 4  ;;  %v3994_v0 = vshrl.u32 %v3965_v35, 16  ;;  %v3997_v5 = vshll.u32 %v3965_v35, 16  ;;  %v6394_v7 = vld [vmem:[#allocation3 + $0x30] ss:$8 sps:$4 sm:$0xff]  }
 0x26d   : > { %6006 = vmatprep.subr.bf16.mxu0 %v6379_v19  ;;  %6110 = vmatprep.mubr.bf16.mxu1 %v5488_v11  ;;  %v4617_v10 = vor.u32 %v4616_v1, %v4613_v2  ;;  %v3980_v11 = vshrl.u32 %v3963_v48, 16 }
 0x26e   : > { %v4575_v20 = vor.u32 %v4574_v49, %v4571_v33  ;;  %v4622_v33 = vrot.slane %v4620_v42, 5  ;;  %v4630_v49 = vrot.slane %v4628_v4, 5  ;;  %v3996_v16 = vrot.slane %v3994_v0, 4  ;;  %v3969_v4 = vld [vmem:[#allocation3 + $0x28] sm:$0xf] }
 0x26f   : > { %v4618_v18 = vrot.slane %v4617_v10, 4  ;;  %v3999_v44 = vrot.slane %v3997_v5, 5  ;;  %v3982_v15 = vrot.slane %v3980_v11, 4  ;;  %v4022_v24 = vshrl.u32 %v3969_v4, 16  ;;  %v7644_v11 = vld [vmem:[#allocation3 + $0x34] sm:$0x1] }
 0x270   : > { %6007 = vmatpush3.bf16.msra.mxu0 %v6379_v19  ;;  %v4521_v19 = vld [vmem:[#allocation2 + $0xe8] sm:$0x1]  ;;  %v4576_v12 = vrot.slane %v4575_v20, 4  ;;  %v4025_v10 = vshll.u32 %v3969_v4, 16 }
 0x271   : > { %6008 = vmatprep.subr.bf16.mxu0 %v6380_v54  ;;  %v4606_v47 = vshll.u32 %v4521_v19, 16  ;;  %v4623_v34 = vsel %vm6673_vm0, %v4618_v18, %v4622_v33 }
 0x272   : > { %v4581_v6 = vsel %vm6673_vm0, %v4576_v12, %v4580_v29  ;;  %v4636_v29 = vrot.slane %v4634_v43, 5  ;;  %v3983_v12 = vshll.u32 %v3963_v48, 16  ;;  %v3973_v43 = vld [vmem:[#allocation3 + $0x38] sm:$0xf]  ;;  %v7641_v48 = vld [vmem:[#allocation3 + $0x24] sm:$0x1] }
 0x273   : > { %v4608_v13 = vrot.slane %v4606_v47, 5  ;;  %v7609_v47 = vld [vmem:[#allocation3 + $0x1c] sm:$0x1] }
 0x274   : > { %6009 = vmatpush3.bf16.msra.mxu0 %v6380_v54  ;;  %v4562_v54 = vrot.slane %v4561_v62, 4  ;;  %v3985_v58 = vrot.slane %v3983_v12, 5  ;;  %v4003_v30 = vshll.u32 %v7609_v47, 16  ;;  %v6402_v12 = vld [vmem:[%s7762_s3 + $0x1f8] sm:$0xff]  }
 0x275   : > { %6010 = vmatprep.subr.bf16.mxu0 %v6381_v36 }
 0x276   : > { %v4567_v22 = vsel %vm6673_vm0, %v4562_v54, %v4566_v61  ;;  %v4604_v61 = vrot.slane %v4603_v38, 4  ;;  %v6390_v54 = vld [vmem:[%s7762_s3 + $0x1b0] sm:$0xff]   ;;  %v3986_v51 = vor.u32 %v3985_v58, %v3982_v15  ;;  %v4005_v31 = vrot.slane %v4003_v30, 5  ;;  %v6398_v38 = vld [vmem:[%s7762_s3 + $0x1d8] sm:$0xff]  }
 0x277   : > { %v5489_v53 = vcombine.low %v4567_v22, %v4581_v6  ;;  %v6393_v22 = vld [vmem:[%s7762_s3 + $0x1c0] sm:$0xff]   ;;  %v4017_v58 = vshll.u32 %v7641_v48, 16 }
 0x278   : > { %6011 = vmatpush3.bf16.msra.mxu0 %v6381_v36  ;;  %v4625_v36 = vshrl.u32 %v4524_v27, 16  ;;  %v4609_v45 = vsel %vm6673_vm0, %v4604_v61, %v4608_v13  ;;  %v4000_v27 = vor.u32 %v3999_v44, %v3996_v16  ;;  %v6392_v6 = vld [vmem:[#allocation3 + $0x20] ss:$8 sps:$4 sm:$0xff]   ;;  %v3987_v42 = vrot.slane %v3986_v51, 4 }
 0x279   : > { %6012 = vmatprep.subr.bf16.mxu0 %v6382_v52  ;;  %6111 = vmatmul.mubr.bf16.vlgmr.msra.gmra.mrb[104].mxu1 %v5489_v53  ;;  %v4053_v61 = vshll.u32 %v3973_v43, 16  ;;  %v4045_v51 = vshll.u32 %v7644_v11, 16 }
 0x27a   : > { %v4627_v23 = vrot.slane %v4625_v36, 4  ;;  %v4001_v40 = vrot.slane %v4000_v27, 4  ;;  %v6396_v36 = vld [vmem:[#allocation3 + $0x40] ss:$8 sps:$4 sm:$0xff]  }
 0x27b   : > { %v4047_v4 = vrot.slane %v4045_v51, 5 }
 0x27c   : > { %6013 = vmatpush3.bf16.msra.mxu0 %v6382_v52  ;;  %v4631_v62 = vor.u32 %v4630_v49, %v4627_v23  ;;  %v5490_v52 = vcombine.low %v4595_v25, %v4609_v45  ;;  %v4006_v1 = vsel %vm6673_vm0, %v4001_v40, %v4005_v31  ;;  %v3971_v23 = vld [vmem:[#allocation3 + $0x30] sm:$0xf]  ;;  %v4050_v25 = vshrl.u32 %v3973_v43, 16  ;;  %v3977_v45 = vld [vmem:[#allocation3 + $0x48] sm:$0xf] }
 0x27d   : > { %6022 = vmatprep.subr.bf16.mxu0 %v6383_v59  ;;  %v4036_v18 = vshrl.u32 %v3971_v23, 16  ;;  %v7652_v40 = vld [vmem:[#allocation3 + $0x4c] sm:$0x1] }
 0x27e   : > { %v4632_v21 = vrot.slane %v4631_v62, 4  ;;  %6114 = vmatprep.mubr.bf16.mxu1 %v5490_v52  ;;  %v4024_v62 = vrot.slane %v4022_v24, 4  ;;  %v4055_v52 = vrot.slane %v4053_v61, 5  ;;  %v4246_v24 = vld [vmem:[#allocation3 + $0x18] sm:$0xe] }
 0x27f   : > { %6015 = vmatmul.mubr.bf16.vlgmr.msra.gmra.mrb[0].mxu0 %v5384_v17  ;;  %v3633_v17 = vsel %vm7323_vm3, %v5365_v60, %v3632_v46  ;;  %v6400_v60 = vld [vmem:[%s7762_s3 + $0x1e8] sm:$0xff]   ;;  %v4039_v46 = vshll.u32 %v3971_v23, 16 }
 0x280   : > { %6018 = vmatprep.mubr.bf16.mxu0 %v5385_v50  ;;  %6023 = vmatpush3.bf16.msra.mxu0 %v6383_v59  ;;  %v4637_v39 = vsel %vm6673_vm0, %v4632_v21, %v4636_v29  ;;  %v5386_v20 = vcombine.low %v3633_v17, %v3637_v63  ;;  %v7611_v59 = vld [vmem:[#allocation3 + $0x14] sm:$0x1]  ;;  %v6399_v50 = vld [vmem:[%s7762_s3 + $0x1e0] sm:$0xff]   ;;  %v4027_v29 = vrot.slane %v4025_v10, 5  ;;  %v4078_v17 = vshrl.u32 %v3977_v45, 16 }
 0x281   : > { %6024 = vmatprep.subr.bf16.mxu0 %v6384_v41  ;;  %v5491_v19 = vcombine.low %v4623_v34, %v4637_v39  ;;  %v3989_v53 = vshll.u32 %v7611_v59, 16  ;;  %v3975_v63 = vld [vmem:[#allocation3 + $0x40] sm:$0xf]  ;;  %v6401_v39 = vld [vmem:[%s7762_s3 + $0x1f0] sm:$0xff]  }
 0x282   : > { %v4064_v35 = vshrl.u32 %v3975_v63, 16 }
 0x283   : > { %6115 = vmatmul.mubr.bf16.gmra.mrb[108].mxu1 %v5491_v19  ;;  %v3991_v2 = vrot.slane %v3989_v53, 5  ;;  %v4041_v19 = vrot.slane %v4039_v46, 5  ;;  %v5452_v46 = vrot.slane %v4246_v24, 9 }
 0x284   : > { %6025 = vmatpush3.bf16.msra.mxu0 %v6384_v41  ;;  %v3967_v41 = vld [vmem:[#allocation3 + $0x20] sm:$0xf] }
 0x285   : > { %6026 = vmatprep.subr.bf16.mxu0 %v6385_v9  ;;  %v3992_v37 = vsel %vm6673_vm0, %v3987_v42, %v3991_v2  ;;  %v4008_v33 = vshrl.u32 %v3967_v41, 16  ;;  %v4011_v49 = vshll.u32 %v3967_v41, 16  ;;  %v7657_v2 = vld [vmem:[#allocation3 + $0x44] sm:$0x1] }
 0x286   : > { %v5439_v13 = vcombine.low %v3992_v37, %v4006_v1  ;;  %v4073_v41 = vshll.u32 %v7657_v2, 16 }
 0x287   : > { %6019 = vmatmul.mubr.bf16.gmra.mrb[4].mxu0 %v5386_v20  ;;  %v4010_v34 = vrot.slane %v4008_v33, 4  ;;  %v4013_v21 = vrot.slane %v4011_v49, 5  ;;  %v7637_v20 = vld [vmem:[#allocation3 + $0x2c] sm:$0x1] }
 0x288   : > { %6027 = vmatpush3.bf16.msra.mxu0 %v6385_v9  ;;  %6038 = vmatprep.mubr.bf16.mxu0 %v6386_v57  ;;  %v4052_v9 = vrot.slane %v4050_v25, 4  ;;  %v4081_v57 = vshll.u32 %v3977_v45, 16  ;;  %v6404_v25 = vld [vmem:[%s7762_s3 + $0x208] sm:$0xff]   ;;  %v4275_v45 = vrot.slane %v7609_v47, 5 }
 0x289   : > { %6028 = vmatprep.subr.bf16.mxu0 %v6387_v55  ;;  %v4014_v5 = vor.u32 %v4013_v21, %v4010_v34 }
 0x28a   : > { %v4056_v0 = vor.u32 %v4055_v52, %v4052_v9  ;;  %v4083_v15 = vrot.slane %v4081_v57, 5  ;;  %v4271_v52 = vrot.slane %v7611_v59, 5  ;;  %v4276_v47 = vsel %vm7323_vm3, %v5452_v46, %v4275_v45  ;;  %v4248_v57 = vld [vmem:[#allocation3 + $0x28] sm:$0xe] }
 0x28c   : > { %6029 = vmatpush3.bf16.msra.mxu0 %v6387_v55  ;;  %v4038_v55 = vrot.slane %v4036_v18, 4  ;;  %v4057_v30 = vrot.slane %v4056_v0, 4  ;;  %v4245_v18 = vld [vmem:[#allocation3 + $0x10] sm:$0xe]  ;;  %v5454_v0 = vrot.slane %v4248_v57, 9 }
 0x28d   : > { %6030 = vmatprep.subr.bf16.mxu0 %v6388_v26  ;;  %v5451_v9 = vrot.slane %v4245_v18, 9 }
 0x28e   : > { %v4042_v16 = vor.u32 %v4041_v19, %v4038_v55  ;;  %v6409_v55 = vld [vmem:[%s7762_s3 + $0x228] sm:$0xff]   ;;  %v6411_v19 = vld [vmem:[%s7762_s3 + $0x230] sm:$0xff]  }
 0x290   : > { %6031 = vmatpush3.bf16.msra.mxu0 %v6388_v26  ;;  %v4028_v26 = vor.u32 %v4027_v29, %v4024_v62  ;;  %v4043_v42 = vrot.slane %v4042_v16, 4  ;;  %v4075_v62 = vrot.slane %v4073_v41, 5  ;;  %v6405_v29 = vld [vmem:[%s7762_s3 + $0x210] sm:$0xff]  }
 0x291   : > { %6032 = vmatprep.subr.bf16.mxu0 %v6389_v32 }
 0x292   : > { %v4029_v27 = vrot.slane %v4028_v26, 4  ;;  %v4048_v23 = vsel %vm6673_vm0, %v4043_v42, %v4047_v4  ;;  %v4250_v26 = vld [vmem:[#allocation3 + $0x38] sm:$0xe]  ;;  %v4299_v42 = vrot.slane %v7652_v40, 5 }
 0x294   : > { %6033 = vmatpush3.bf16.msra.mxu0 %v6389_v32  ;;  %v7639_v32 = vld [vmem:[#allocation3 + $0x3c] sm:$0x1] }
 0x295   : > { %6034 = vmatprep.subr.bf16.mxu0 %v6390_v54  ;;  %v4059_v44 = vshll.u32 %v7639_v32, 16  ;;  %v4291_v16 = vrot.slane %v7639_v32, 5 }
 0x297   : > { %v4061_v31 = vrot.slane %v4059_v44, 5 }
 0x298   : > { %6035 = vmatpush3.bf16.msra.mxu0 %v6390_v54  ;;  %v4067_v54 = vshll.u32 %v3975_v63, 16 }
 0x299   : > { %6036 = vmatprep.subr.bf16.mxu0 %v6391_v3  ;;  %v4062_v43 = vsel %vm6673_vm0, %v4057_v30, %v4061_v31 }
 0x29a   : > { %v5441_v61 = vcombine.low %v4048_v23, %v4062_v43 }
 0x29c   : > { %6037 = vmatpush3.bf16.msra.mxu0 %v6391_v3  ;;  %v4031_v3 = vshll.u32 %v7637_v20, 16 }
 0x29d   : > { %6046 = vmatprep.subr.bf16.mxu0 %v6393_v22 }
 0x29e   : > { %v4033_v53 = vrot.slane %v4031_v3, 5  ;;  %v4249_v3 = vld [vmem:[#allocation3 + $0x30] sm:$0xe] }
 0x29f   : > { %6039 = vmatmul.mubr.bf16.vlgmr.msra.gmra.mrb[0].mxu0 %v6392_v6  ;;  %v4066_v6 = vrot.slane %v4064_v35, 4  ;;  %v6413_v35 = vld [vmem:[%s7762_s3 + $0x238] sm:$0xff]  }
 0x2a0   : > { %6042 = vmatprep.mubr.bf16.mxu0 %v6394_v7  ;;  %6047 = vmatpush3.bf16.msra.mxu0 %v6393_v22  ;;  %v4080_v22 = vrot.slane %v4078_v17, 4  ;;  %v4015_v7 = vrot.slane %v4014_v5, 4  ;;  %v4034_v37 = vsel %vm6673_vm0, %v4029_v27, %v4033_v53  ;;  %v4272_v17 = vsel %vm7323_vm3, %v5451_v9, %v4271_v52 }
 0x2a1   : > { %6048 = vmatprep.subr.bf16.mxu0 %v6395_v56  ;;  %v5475_v59 = vcombine.low %v4272_v17, %v4276_v47  ;;  %v4283_v5 = vrot.slane %v7637_v20, 5  ;;  %v4251_v20 = vld [vmem:[#allocation3 + $0x40] sm:$0xe] }
 0x2a2   : > { %v4084_v1 = vor.u32 %v4083_v15, %v4080_v22  ;;  %v4279_v22 = vrot.slane %v7641_v48, 5  ;;  %v5455_v15 = vrot.slane %v4249_v3, 9 }
 0x2a3   : > { %v4284_v27 = vsel %vm7323_vm3, %v5454_v0, %v4283_v5 }
 0x2a4   : > { %6049 = vmatpush3.bf16.msra.mxu0 %v6395_v56  ;;  %v4069_v56 = vrot.slane %v4067_v54, 5  ;;  %v4085_v49 = vrot.slane %v4084_v1, 4  ;;  %v4247_v54 = vld [vmem:[#allocation3 + $0x20] sm:$0xe] }
 0x2a5   : > { %6050 = vmatprep.subr.bf16.mxu0 %v6397_v8  ;;  %v5453_v44 = vrot.slane %v4247_v54, 9 }
 0x2a7   : > { %6043 = vmatmul.mubr.bf16.gmra.mrb[4].mxu0 %v6396_v36  ;;  %v4019_v36 = vrot.slane %v4017_v58, 5  ;;  %v4287_v58 = vrot.slane %v7644_v11, 5  ;;  %v4280_v32 = vsel %vm7323_vm3, %v5453_v44, %v4279_v22  ;;  %v5457_v11 = vrot.slane %v4251_v20, 9 }
 0x2a8   : > { %6051 = vmatpush3.bf16.msra.mxu0 %v6397_v8  ;;  %6062 = vmatprep.mubr.bf16.mxu0 %v5439_v13  ;;  %v6403_v8 = vld [vmem:[%s7762_s3 + $0x200] sm:$0xff]   ;;  %v4087_v13 = vshll.u32 %v7652_v40, 16  ;;  %v5476_v51 = vcombine.low %v4280_v32, %v4284_v27 }
 0x2a9   : > { %6052 = vmatprep.subr.bf16.mxu0 %v6398_v38  ;;  %v4288_v48 = vsel %vm7323_vm3, %v5455_v15, %v4287_v58 }
 0x2ac   : > { %6053 = vmatpush3.bf16.msra.mxu0 %v6398_v38  ;;  %v4070_v38 = vor.u32 %v4069_v56, %v4066_v6  ;;  %v4252_v6 = vld [vmem:[#allocation3 + $0x48] sm:$0xe] }
 0x2ad   : > { %6054 = vmatprep.subr.bf16.mxu0 %v6399_v50  ;;  %v5458_v30 = vrot.slane %v4252_v6, 9 }
 0x2ae   : > { %v4071_v33 = vrot.slane %v4070_v38, 4 }
 0x2af   : > { %v4300_v38 = vsel %vm7323_vm3, %v5458_v30, %v4299_v42 }
 0x2b0   : > { %6055 = vmatpush3.bf16.msra.mxu0 %v6399_v50  ;;  %v4020_v50 = vsel %vm6673_vm0, %v4015_v7, %v4019_v36  ;;  %v4076_v63 = vsel %vm6673_vm0, %v4071_v33, %v4075_v62 }
 0x2b1   : > { %6056 = vmatprep.subr.bf16.mxu0 %v6400_v60  ;;  %v5440_v10 = vcombine.low %v4020_v50, %v4034_v37 }
 0x2b4   : > { %6057 = vmatpush3.bf16.msra.mxu0 %v6400_v60  ;;  %v4089_v60 = vrot.slane %v4087_v13, 5 }
 0x2b5   : > { %6058 = vmatprep.subr.bf16.mxu0 %v6401_v39 }
 0x2b6   : > { %v4090_v34 = vsel %vm6673_vm0, %v4085_v49, %v4089_v60  ;;  %v5487_v49 = vld [vmem:[%s7763_s4] ss:$0 sm:$0xff] }
 0x2b7   : > { %v5442_v21 = vcombine.low %v4076_v63, %v4090_v34 }
 0x2b8   : > { %6059 = vmatpush3.bf16.msra.mxu0 %v6401_v39  ;;  %v6406_v39 = vld [vmem:[%s7762_s3 + $0x218] sm:$0xff]  }
 0x2b9   : > { %6060 = vmatprep.subr.bf16.mxu0 %v6402_v12 }
 0x2bc   : > { %6061 = vmatpush3.bf16.msra.mxu0 %v6402_v12  ;;  %v5456_v12 = vrot.slane %v4250_v26, 9 }
 0x2bd   : > { %6070 = vmatprep.subr.bf16.mxu0 %v6403_v8 }
 0x2be   : > { %v4292_v56 = vsel %vm7323_vm3, %v5456_v12, %v4291_v16 }
 0x2bf   : > { %6063 = vmatmul.mubr.bf16.vlgmr.msra.gmra.mrb[0].mxu0 %v5440_v10  ;;  %v5477_v53 = vcombine.low %v4288_v48, %v4292_v56 }
 0x2c0   : > { %6066 = vmatprep.mubr.bf16.mxu0 %v5441_v61  ;;  %6071 = vmatpush3.bf16.msra.mxu0 %v6403_v8  ;;  %v4295_v8 = vrot.slane %v7657_v2, 5 }
 0x2c1   : > { %6072 = vmatprep.subr.bf16.mxu0 %v6404_v25 }
 0x2c2   : > { %v4296_v37 = vsel %vm7323_vm3, %v5457_v11, %v4295_v8  ;;  %v5500_v8 = vld [vmem:[%s7765_s6] ss:$0 sm:$0xff] }
 0x2c3   : > { %v5478_v13 = vcombine.low %v4296_v37, %v4300_v38 }
 0x2c4   : > { %6073 = vmatpush3.bf16.msra.mxu0 %v6404_v25 }
 0x2c5   : > { %6074 = vmatprep.subr.bf16.mxu0 %v6405_v29 }
 0x2c7   : > { %6067 = vmatmul.mubr.bf16.gmra.mrb[4].mxu0 %v5442_v21 }
 0x2c8   : > { %6075 = vmatpush3.bf16.msra.mxu0 %v6405_v29  ;;  %6086 = vmatprep.mubr.bf16.mxu0 %v5475_v59 }
 0x2c9   : > { %6076 = vmatprep.subr.bf16.mxu0 %v6406_v39 }
 0x2cc   : > { %6077 = vmatpush3.bf16.msra.mxu0 %v6406_v39 }
 0x2cd   : > { %6078 = vmatprep.subr.bf16.mxu0 %v6407_v28 }
 0x2d0   : > { %6079 = vmatpush3.bf16.msra.mxu0 %v6407_v28 }
 0x2d1   : > { %6080 = vmatprep.subr.bf16.mxu0 %v6409_v55 }
 0x2d4   : > { %6081 = vmatpush3.bf16.msra.mxu0 %v6409_v55 }
 0x2d5   : > { %6082 = vmatprep.subr.bf16.mxu0 %v6411_v19 }
 0x2d8   : > { %6083 = vmatpush3.bf16.msra.mxu0 %v6411_v19 }
 0x2d9   : > { %6084 = vmatprep.subr.bf16.mxu0 %v6413_v35 }
 0x2dc   : > { %6085 = vmatpush3.bf16.msra.mxu0 %v6413_v35 }
 0x2df   : > { %v5896_v7 = vpop.f32.mrb[96].mxu1  ;;  %6087 = vmatmul.mubr.bf16.vlgmr.msra.gmra.mrb[0].mxu0 %v5476_v51 }
 0x2e0   : > { %v2749_v31 = vpop.f32.mrb[97].mxu1  ;;  %6090 = vmatprep.mubr.bf16.mxu0 %v5477_v53 }
 0x2e1   : > { %v5897_v1 = vpop.f32.mrb[98].mxu1 }
 0x2e2   : > { %v2752_v36 = vpop.f32.mrb[99].mxu1 }
 0x2e7   : > { %6091 = vmatmul.mubr.bf16.gmra.mrb[4].mxu0 %v5478_v13 }
 0x2ea   : > { %v5900_v4 = vpop.f32.mrb[100].mxu1 }
 0x2eb   : > { %v2765_v43 = vpop.f32.mrb[101].mxu1 }
 0x2ec   : > { %v5901_v50 = vpop.f32.mrb[102].mxu1 }
 0x2ed   : > { %v2768_v41 = vpop.f32.mrb[103].mxu1 }
 0x34c   : > { %v7718_v2 = vpop.f32.mrb[104].mxu1 }
 0x34d   : > { %v7720_v40 = vpop.f32.mrb[105].mxu1 }
 0x34e   : > { %v7722_v24 = vpop.f32.mrb[106].mxu1 }
 0x34f   : > { %v7724_v10 = vpop.f32.mrb[107].mxu1 }
 0x356   : > { %v7726_v23 = vpop.f32.mrb[108].mxu1 }
 0x357   : > { %v7728_v25 = vpop.f32.mrb[109].mxu1 }
 0x358   : > { %v7730_v14 = vpop.f32.mrb[110].mxu1 }
 0x359   : > { %v7732_v61 = vpop.f32.mrb[111].mxu1 }
 0x3b2   : > { %v6088_v33 = vpop.f32.mrb[0].mxu0 }
 0x3b3   : > { %v6118_v60 = vadd.f32 %v6088_v33, %v5896_v7  ;;  %v4416_v18 = vpop.f32.mrb[1].mxu0 }
 0x3b4   : > { %v6119_v46 = vadd.f32 %v4416_v18, %v2749_v31  ;;  %v6089_v45 = vpop.f32.mrb[2].mxu0 }
 0x3b5   : > { %v4464_v62 = vadd.f32 %v6118_v60, %v5487_v49  ;;  %v6120_v29 = vadd.f32 %v6089_v45, %v5897_v1  ;;  %v4419_v9 = vpop.f32.mrb[3].mxu0 }
 0x3b6   : > { %v4462_v52 = vadd.f32 %v6119_v46, %v5487_v49  ;;  %v6121_v63 = vadd.f32 %v4419_v9, %v2752_v36 }
 0x3b7   : > { %v4480_v34 = vmul.f32 0.70710677, %v4464_v62  ;;  %v4465_v47 = vadd.f32 %v6120_v29, %v5487_v49  ;;  %v4472_v56 = vmul.f32 0.5, %v4464_v62 }
 0x3b8   : > { %v4478_v21 = vmul.f32 0.70710677, %v4462_v52  ;;  %v4463_v17 = vadd.f32 %v6121_v63, %v5487_v49  ;;  %v4470_v51 = vmul.f32 0.5, %v4462_v52 }
 0x3b9   : > { %6435 = verf.f32 %v4480_v34  ;;  %v4481_v39 = vmul.f32 0.70710677, %v4465_v47  ;;  %v4473_v53 = vmul.f32 0.5, %v4465_v47 }
 0x3ba   : > { %6437 = verf.f32 %v4478_v21  ;;  %v4479_v59 = vmul.f32 0.70710677, %v4463_v17  ;;  %v6092_v28 = vpop.f32.mrb[4].mxu0  ;;  %v4471_v31 = vmul.f32 0.5, %v4463_v17 }
 0x3bb   : > { %6439 = verf.f32 %v4481_v39  ;;  %v6122_v55 = vadd.f32 %v6092_v28, %v5900_v4  ;;  %v4432_v19 = vpop.f32.mrb[5].mxu0 }
 0x3bc   : > { %6441 = verf.f32 %v4479_v59  ;;  %v6123_v57 = vadd.f32 %v4432_v19, %v2765_v43  ;;  %v6093_v26 = vpop.f32.mrb[6].mxu0 }
 0x3bd   : > { %v4468_v35 = vadd.f32 %v6122_v55, %v5487_v49  ;;  %v6124_v54 = vadd.f32 %v6093_v26, %v5901_v50  ;;  %v4435_v0 = vpop.f32.mrb[7].mxu0 }
 0x3be   : > { %v4466_v5 = vadd.f32 %v6123_v57, %v5487_v49  ;;  %v6125_v3 = vadd.f32 %v4435_v0, %v2768_v41 }
 0x3bf   : > { %v4484_v12 = vmul.f32 0.70710677, %v4468_v35  ;;  %v4469_v16 = vadd.f32 %v6124_v54, %v5487_v49  ;;  %v4476_v18 = vmul.f32 0.5, %v4468_v35 }
 0x3c0   : > { %v4482_v44 = vmul.f32 0.70710677, %v4466_v5  ;;  %v4467_v22 = vadd.f32 %v6125_v3, %v5487_v49  ;;  %v4474_v62 = vmul.f32 0.5, %v4466_v5 }
 0x3c1   : > { %6443 = verf.f32 %v4484_v12  ;;  %v4485_v15 = vmul.f32 0.70710677, %v4469_v16 }
 0x3c2   : > { %6445 = verf.f32 %v4482_v44  ;;  %v4483_v58 = vmul.f32 0.70710677, %v4467_v22  ;;  %v4475_v63 = vmul.f32 0.5, %v4467_v22 }
 0x3c3   : > { %v6436_v27 = vpop.eup %6435  ;;  %6447 = verf.f32 %v4485_v15 }
 0x3c4   : > { %v6438_v6 = vpop.eup %6437  ;;  %6449 = verf.f32 %v4483_v58  ;;  %v4496_v20 = vadd.f32 1.0, %v6436_v27 }
 0x3c5   : > { %v6440_v32 = vpop.eup %6439  ;;  %v4494_v48 = vadd.f32 1.0, %v6438_v6 }
 0x3c6   : > { %v6442_v30 = vpop.eup %6441  ;;  %v4504_v7 = vmul.f32 %v4496_v20, %v4472_v56  ;;  %v4497_v11 = vadd.f32 1.0, %v6440_v32 }
 0x3c7   : > { %v4502_v42 = vmul.f32 %v4494_v48, %v4470_v51  ;;  %v4495_v1 = vadd.f32 1.0, %v6442_v30 }
 0x3c8   : > { %v4785_v36 = vadd.f32 %v7718_v2, %v4504_v7  ;;  %v4505_v37 = vmul.f32 %v4497_v11, %v4473_v53 }
 0x3c9   : > { %v4783_v38 = vadd.f32 %v7720_v40, %v4502_v42  ;;  %v4503_v13 = vmul.f32 %v4495_v1, %v4471_v31 }
 0x3ca   : > { %v4800_v4 = vadd.f32 %v5500_v8, %v4785_v36  ;;  %v4786_v43 = vadd.f32 %v7722_v24, %v4505_v37  ;;  %v4477_v24 = vmul.f32 0.5, %v4469_v16 }
 0x3cb   : > { %v6444_v50 = vpop.eup %6443  ;;  %v4798_v41 = vadd.f32 %v5500_v8, %v4783_v38  ;;  %v4784_v33 = vadd.f32 %v7724_v10, %v4503_v13 }
 0x3cc   : > { %v6446_v49 = vpop.eup %6445  ;;  %4808 = vst [vmem:[%s6564_s11 + $0x10] sm:$0xff] %v4800_v4  ;;  %v4801_v60 = vadd.f32 %v5500_v8, %v4786_v43  ;;  %v4500_v46 = vadd.f32 1.0, %v6444_v50 }
 0x3cd   : > { %v6448_v45 = vpop.eup %6447  ;;  %4806 = vst [vmem:[%s6564_s11] sm:$0xff] %v4798_v41  ;;  %v4799_v2 = vadd.f32 %v5500_v8, %v4784_v33  ;;  %v4498_v40 = vadd.f32 1.0, %v6446_v49 }
 0x3ce   : > { %v6450_v29 = vpop.eup %6449  ;;  %4809 = vst [vmem:[%s6564_s11 + $0x18] sm:$0xff] %v4801_v60  ;;  %v4508_v9 = vmul.f32 %v4500_v46, %v4476_v18  ;;  %v4501_v52 = vadd.f32 1.0, %v6448_v45 }
 0x3cf   : > { %4807 = vst [vmem:[%s6564_s11 + $0x8] sm:$0xff] %v4799_v2  ;;  %v4506_v10 = vmul.f32 %v4498_v40, %v4474_v62  ;;  %v4499_v34 = vadd.f32 1.0, %v6450_v29 }
 0x3d0   : > { %v4789_v47 = vadd.f32 %v7726_v23, %v4508_v9  ;;  %v4509_v21 = vmul.f32 %v4501_v52, %v4477_v24 }
 0x3d1   : > { %v4787_v17 = vadd.f32 %v7728_v25, %v4506_v10  ;;  %v4507_v39 = vmul.f32 %v4499_v34, %v4475_v63 }
 0x3d2   : > { %v4804_v59 = vadd.f32 %v5500_v8, %v4789_v47  ;;  %v4790_v28 = vadd.f32 %v7730_v14, %v4509_v21 }
 0x3d3   : > { %v4802_v55 = vadd.f32 %v5500_v8, %v4787_v17  ;;  %v4788_v19 = vadd.f32 %v7732_v61, %v4507_v39 }
 0x3d4   : > { %4812 = vst [vmem:[%s6564_s11 + $0x30] sm:$0xff] %v4804_v59  ;;  %v4805_v57 = vadd.f32 %v5500_v8, %v4790_v28 }
 0x3d5   : > { %4810 = vst [vmem:[%s6564_s11 + $0x20] sm:$0xff] %v4802_v55  ;;  %v4803_v26 = vadd.f32 %v5500_v8, %v4788_v19 }
 0x3d6   : > { %4813 = vst [vmem:[%s6564_s11 + $0x38] sm:$0xff] %v4805_v57 }
 0x3d7   : > { %4811 = vst [vmem:[%s6564_s11 + $0x28] sm:$0xff] %v4803_v26 }
 0x3d8 PF: > { %s17_s24 = sadd.s32 1, %s6466_s24  }
 0x3d9   : > { %p14_p6 = scmp.ge.s32.totalorder %s17_s24, 4  }
 0x3db   :  { %16 = sbr.rel (!%p14_p6) target bundleno = 1 (0x1), region = 135 }

</bundles_post_ra>
